<compile_context>
chip_gen: v7x
topology: tpu7x:2x2x1
jax: 0.10.0
libtpu: 0.0.40
codegen_flags: <defaults>
</compile_context>

<pallas_src>
import jax
import jax.numpy as jnp
from jax.experimental import pallas as pl
from jax.experimental.pallas import tpu as pltpu


def _round_up(x, m):
    return (x + m - 1) // m * m


# ----------------------------------------------------------------------------
# Fused per-(batch-block, layer) kernel
# ----------------------------------------------------------------------------
def _make_fused_kernel(H, W, B, P_pad, S_pad, mxu_dtype):
    Hp, Wp = H + 2, W + 2
    Q0 = Wp + 1                       # padded-flat index of interior pixel (0, 0)
    S = (H - 1) * Wp + W              # true window length covering all interior pixels
    TAPS = [(dy - 1) * Wp + (dx - 1) for dy in range(3) for dx in range(3)]
    del S  # (tail beyond S is handled by the seam/tail mask built wrapper-side)

    def kernel(rec1_ref, rinit_ref, a_ref, cmask_ref,
               w321_ref, w132_ref, wrb_ref, brb_ref, o_ref, act_ref):
        l = pl.program_id(1)

        # Layer 0: load rec1 into the VMEM-resident carry (output block) and zero
        # the scratch once; its padding ring / tail then stays zero forever because
        # only the interior window is ever written (with seam-masked values).
        @pl.when(l == 0)
        def _():
            o_ref[...] = rec1_ref[...]
            act_ref[...] = jnp.zeros_like(act_ref)

        cmask = cmask_ref[...]                              # (1, B*S_pad) f32
        w321 = w321_ref[l]                                  # (1, 9C)  bf16
        w132 = w132_ref[l]                                  # (C, 9)   bf16

        def im2col(xs):
            # xs: list of B per-image (Cin, P_pad) bf16 arrays (zero padding ring).
            # -> (9*Cin, B*S_pad): rows tap-major/cin-minor, lanes image-major with
            #    128-aligned per-image segments of width S_pad.
            return jnp.concatenate(
                [jnp.concatenate([x[:, Q0 + o: Q0 + o + S_pad] for x in xs], axis=1)
                 for o in TAPS], axis=0)

        def conv(xs, w, bias=None, relu=False):
            y = jnp.dot(w, im2col(xs), preferred_element_type=jnp.float32)
            if bias is not None:
                y = y + bias
            if relu:
                y = jnp.maximum(y, 0.0)
            return y * cmask                                # zero seams + padded tail

        # ---- rec = conv321(rec1) -------------------------------------------
        rec1 = o_ref[...]                                   # (B, C, P_pad) f32
        rec1_bf = rec1.astype(mxu_dtype)
        y321 = conv([rec1_bf[b] for b in range(B)], w321)   # (1, B*S_pad)

        # ---- temp = Phi^T(mask * (Phi rec)) - recon_init  (folded operator, f32)
        a_mat = a_ref[...]                                  # (S_pad, P_pad) f32
        temps = [jnp.dot(y321[:, b * S_pad:(b + 1) * S_pad], a_mat,
                         preferred_element_type=jnp.float32) - rinit_ref[b]
                 for b in range(B)]                         # B x (1, P_pad) f32

        # ---- rec = rec1 - conv132(temp) -> act scratch (padding ring stays 0)
        y132 = conv([t.astype(mxu_dtype) for t in temps], w132)   # (C, B*S_pad)
        for b in range(B):
            act_ref[b, :, Q0:Q0 + S_pad] = (
                rec1[b, :, Q0:Q0 + S_pad] - y132[:, b * S_pad:(b + 1) * S_pad])

        # ---- rec1 = RB2(RB1(rec)),  RB(x) = x + conv2(relu(conv1(x)+b1)) + b2
        for k in range(2):
            x_bf = act_ref[...].astype(mxu_dtype)
            h = conv([x_bf[b] for b in range(B)], wrb_ref[4 * l + 2 * k],
                     bias=brb_ref[4 * l + 2 * k], relu=True)      # (C, B*S_pad)
            # Stash h in o_ref's interior (old rec1 no longer needed); ring stays 0.
            for b in range(B):
                o_ref[b, :, Q0:Q0 + S_pad] = h[:, b * S_pad:(b + 1) * S_pad]
            h_bf = o_ref[...].astype(mxu_dtype)
            y2 = conv([h_bf[b] for b in range(B)], wrb_ref[4 * l + 2 * k + 1],
                      bias=brb_ref[4 * l + 2 * k + 1])
            dst = act_ref if k == 0 else o_ref              # last RB writes the carry
            for b in range(B):
                dst[b, :, Q0:Q0 + S_pad] = (
                    act_ref[b, :, Q0:Q0 + S_pad] + y2[:, b * S_pad:(b + 1) * S_pad])

    return kernel


# ----------------------------------------------------------------------------
# Forward pass (matches DUN_mask.forward)
# ----------------------------------------------------------------------------
def dun_mask_forward(rec1, recon_init, phi, phi_size, mask, params, *,
                     batch_block=2, mxu_dtype=jnp.bfloat16):
    f32 = jnp.float32
    N, C, H, W = rec1.shape
    p = phi_size
    Hb, Wb = H // p, W // p
    NB, P2 = Hb * Wb, p * p
    M = phi.shape[0]
    Hp, Wp = H + 2, W + 2
    P = Hp * Wp
    Q0 = Wp + 1
    S = (H - 1) * Wp + W
    L = len(params)
    B = batch_block
    assert N % B == 0, "batch must be divisible by batch_block"

    # 128-lane-aligned flat layout: S_pad for per-image lane segments, P_pad big
    # enough that every tap slice Q0+o : Q0+o+S_pad stays in bounds.
    S_pad = _round_up(S, 128)
    P_pad = _round_up(max(P, 2 * Q0 + S_pad), 128)

    # ---- activations -> channel-major, zero padded-flat layout (done ONCE) ----
    def to_padflat(x):
        xp = jnp.pad(x.astype(f32), ((0, 0), (0, 0), (1, 1), (1, 1)))
        xp = xp.reshape(x.shape[0], x.shape[1], P)
        return jnp.pad(xp, ((0, 0), (0, 0), (0, P_pad - P)))

    rec1_pf = to_padflat(rec1)               # (N, C, P_pad)
    rinit_pf = to_padflat(recon_init)        # (N, 1, P_pad)

    # ---- fold conv2d(stride=p) -> *mask -> conv_transpose2d(stride=p) into A ----
    # Kept in f32 (accuracy of the "A rec - recon_init" cancellation).
    phi_flat = phi.reshape(M, P2).astype(f32)                        # (M, P2)
    mask_flat = mask.astype(f32).reshape(NB, M)                      # (NB, M)
    g = jnp.einsum('bm,mi,mj->bij', mask_flat, phi_flat, phi_flat)   # (NB, P2, P2)
    bh = jnp.arange(Hb).reshape(Hb, 1, 1, 1)
    bw = jnp.arange(Wb).reshape(1, Wb, 1, 1)
    py = jnp.arange(p).reshape(1, 1, p, 1)
    px = jnp.arange(p).reshape(1, 1, 1, p)
    q = ((bh * p + py + 1) * Wp + (bw * p + px + 1)).reshape(NB, P2)  # padded-flat idx
    a_full = jnp.zeros((P_pad, P_pad), f32).at[q[:, :, None], q[:, None, :]].add(g)
    a_sw = a_full[Q0:Q0 + S_pad, :]          # rows restricted to the output window
    # TODO(synk): for large H/W keep this operator block-structured (NB blocks of
    # P2xP2) instead of dense O(P^2), and use pl.Buffered(1) on the constant inputs,
    # to stay inside v7x's 64 MiB VMEM.

    # ---- seam/tail mask over the (per-image, S_pad-wide) conv output window ----
    j = jnp.arange(S_pad)
    col = (Q0 + j) % Wp
    cmask1 = ((col >= 1) & (col <= W) & (j < S)).astype(f32).reshape(1, S_pad)
    cmask_big = jnp.tile(cmask1, (1, B))                              # (1, B*S_pad)

    # ---- per-layer weights in im2col layout; full-L blocks => VMEM resident ----
    def w_mat(w_oihw):
        co, ci = w_oihw.shape[0], w_oihw.shape[1]
        return jnp.transpose(w_oihw, (0, 2, 3, 1)).reshape(co, 9 * ci)

    w321 = jnp.stack([w_mat(lp['w321']) for lp in params]).astype(mxu_dtype)  # (L,1,9C)
    w132 = jnp.stack([w_mat(lp['w132']) for lp in params]).astype(mxu_dtype)  # (L,C,9)
    wrb = jnp.concatenate(
        [jnp.stack([w_mat(lp['rb1']['w1']), w_mat(lp['rb1']['w2']),
                    w_mat(lp['rb2']['w1']), w_mat(lp['rb2']['w2'])])
         for lp in params]).astype(mxu_dtype)                                 # (4L,C,9C)
    brb = jnp.concatenate(
        [jnp.stack([lp['rb1']['b1'], lp['rb1']['b2'],
                    lp['rb2']['b1'], lp['rb2']['b2']])
         for lp in params]).astype(f32)[..., None]                            # (4L,C,1)

    kernel = _make_fused_kernel(H, W, B, P_pad, S_pad, mxu_dtype)
    out_pf = pl.pallas_call(
        kernel,
        out_shape=jax.ShapeDtypeStruct((N, C, P_pad), f32),
        grid=(N // B, L),        # batch blocks (parallel) x layers (VMEM carry)
        in_specs=[
            pl.BlockSpec((B, C, P_pad), lambda n, l: (n, 0, 0)),       # rec1 (init)
            pl.BlockSpec((B, 1, P_pad), lambda n, l: (n, 0, 0)),       # recon_init
            pl.BlockSpec((S_pad, P_pad), lambda n, l: (0, 0)),         # folded Phi/mask op
            pl.BlockSpec((1, B * S_pad), lambda n, l: (0, 0)),         # seam/tail mask
            pl.BlockSpec((L, 1, 9 * C), lambda n, l: (0, 0, 0)),       # conv321 weights
            pl.BlockSpec((L, C, 9), lambda n, l: (0, 0, 0)),           # conv132 weights
            pl.BlockSpec((4 * L, C, 9 * C), lambda n, l: (0, 0, 0)),   # RB conv weights
            pl.BlockSpec((4 * L, C, 1), lambda n, l: (0, 0, 0)),       # RB conv biases
        ],
        out_specs=pl.BlockSpec((B, C, P_pad), lambda n, l: (n, 0, 0)),
        scratch_shapes=[pltpu.VMEM((B, C, P_pad), f32)],
        compiler_params=pltpu.CompilerParams(
            dimension_semantics=("parallel", "arbitrary")),
    )(rec1_pf, rinit_pf, a_sw, cmask_big, w321, w132, wrb, brb)

    # padded-flat -> NCHW
    return out_pf[:, :, :P].reshape(N, C, Hp, Wp)[:, :, 1:-1, 1:-1]


# ----------------------------------------------------------------------------
# Deterministic parameter init (PyTorch layouts: OIHW weights, (C,) biases;
# conv321 / conv132 are bias-free, matching nn.Conv2d(..., bias=False)).
# ----------------------------------------------------------------------------
def init_params(key, C, num_layers):
    def w(k, shape, scale):
        return (scale * jax.random.normal(k, shape)).astype(jnp.float32)

    params = []
    for _ in range(num_layers):
        key, *ks = jax.random.split(key, 11)
        params.append({
            'w321': w(ks[0], (1, C, 3, 3), 0.1),
            'w132': w(ks[1], (C, 1, 3, 3), 0.1),
            'rb1': {'w1': w(ks[2], (C, C, 3, 3), 0.05), 'b1': w(ks[3], (C,), 0.05),
                    'w2': w(ks[4], (C, C, 3, 3), 0.05), 'b2': w(ks[5], (C,), 0.05)},
            'rb2': {'w1': w(ks[6], (C, C, 3, 3), 0.05), 'b1': w(ks[7], (C,), 0.05),
                    'w2': w(ks[8], (C, C, 3, 3), 0.05), 'b2': w(ks[9], (C,), 0.05)},
        })
    return params


if __name__ == "__main__":
    key = jax.random.PRNGKey(0)
    N, C, H, W = 4, 8, 16, 16       # batch, channels, spatial
    phi_size = 4                    # measurement block size (kernel == stride)
    M = 8                           # measurements per block
    num_layers = 2                  # unfolded iterations (class default is 8)
    Hb, Wb = H // phi_size, W // phi_size

    k1, k2, k3, k4, kp = jax.random.split(key, 5)
    rec1 = jax.random.normal(k1, (N, C, H, W), jnp.float32)
    recon_init = jax.random.normal(k2, (N, 1, H, W), jnp.float32)
    phi = jax.random.normal(k3, (M, 1, phi_size, phi_size), jnp.float32) / phi_size
    mask = (jax.random.uniform(k4, (Hb, Wb, M)) > 0.5).astype(jnp.float32)
    params = init_params(kp, C, num_layers)

    fwd = jax.jit(dun_mask_forward, static_argnums=3)
    out = jax.block_until_ready(fwd(rec1, recon_init, phi, phi_size, mask, params))
    assert out.shape == (N, C, H, W)
    assert bool(jnp.all(jnp.isfinite(out)))
    print("KERNEL_OK")
</pallas_src>

<mosaic_0001>
module attributes {stable_mosaic.version = 11 : i64} {
  func.func private @main(%arg0: i32) attributes {dimension_semantics = [#tpu.dimension_semantics<core_parallel>], iteration_bounds = array<i64: 2>, tpu.core_type = #tpu.core_type<sc_scalar_subcore>, window_params = []} {
    return
  }
}

module attributes {stable_mosaic.version = 11 : i64} {
  func.func private @main(%arg0: i32) attributes {dimension_semantics = [#tpu.dimension_semantics<core_parallel>], iteration_bounds = array<i64: 2>, tpu.core_type = #tpu.core_type<sc_scalar_subcore>, window_params = []} {
    return
  }
}

module attributes {stable_mosaic.version = 11 : i64} {
  func.func @kernel(%arg0: i32, %arg1: i32, %arg2: memref<2x8x512xf32, #tpu.memory_space<vmem>>, %arg3: memref<2x1x512xf32, #tpu.memory_space<vmem>>, %arg4: memref<384x512xf32, #tpu.memory_space<vmem>>, %arg5: memref<1x768xf32, #tpu.memory_space<vmem>>, %arg6: memref<2x1x72xbf16, #tpu.memory_space<vmem>>, %arg7: memref<2x8x9xbf16, #tpu.memory_space<vmem>>, %arg8: memref<8x8x72xbf16, #tpu.memory_space<vmem>>, %arg9: memref<8x8x1xf32, #tpu.memory_space<vmem>>, %arg10: memref<2x8x512xf32, #tpu.memory_space<vmem>>, %arg11: memref<2x8x512xf32, #tpu.memory_space<vmem>>) attributes {dimension_semantics = [#tpu.dimension_semantics<parallel>, #tpu.dimension_semantics<arbitrary>], iteration_bounds = array<i64: 2, 2>, scalar_prefetch = 0 : i64, scratch_operands = 1 : i64, tpu.core_type = #tpu.core_type<tc>, window_params = [{transform_indices = @transform_0, window_bounds = array<i64: 2, 8, 512>}, {transform_indices = @transform_1, window_bounds = array<i64: 2, 1, 512>}, {pipeline_mode = #tpu.pipeline_mode<synchronous>, transform_indices = @transform_2, window_bounds = array<i64: 384, 512>}, {pipeline_mode = #tpu.pipeline_mode<synchronous>, transform_indices = @transform_3, window_bounds = array<i64: 1, 768>}, {pipeline_mode = #tpu.pipeline_mode<synchronous>, transform_indices = @transform_4, window_bounds = array<i64: 2, 1, 72>}, {pipeline_mode = #tpu.pipeline_mode<synchronous>, transform_indices = @transform_5, window_bounds = array<i64: 2, 8, 9>}, {pipeline_mode = #tpu.pipeline_mode<synchronous>, transform_indices = @transform_6, window_bounds = array<i64: 8, 8, 72>}, {pipeline_mode = #tpu.pipeline_mode<synchronous>, transform_indices = @transform_7, window_bounds = array<i64: 8, 8, 1>}, {transform_indices = @transform_8, window_bounds = array<i64: 2, 8, 512>}]} {
    %c0_i32 = arith.constant 0 : i32
    %0 = arith.cmpi eq, %arg1, %c0_i32 : i32
    %1 = arith.extui %0 : i1 to i32
    %c0_i32_0 = arith.constant 0 : i32
    %2 = arith.cmpi ne, %1, %c0_i32_0 : i32
    scf.if %2 {
      %c0_111 = arith.constant 0 : index
      %c0_112 = arith.constant 0 : index
      %c0_113 = arith.constant 0 : index
      %352 = vector.load %arg2[%c0_111, %c0_112, %c0_113] : memref<2x8x512xf32, #tpu.memory_space<vmem>>, vector<2x8x512xf32>
      %c0_114 = arith.constant 0 : index
      %c0_115 = arith.constant 0 : index
      %c0_116 = arith.constant 0 : index
      %353 = vector.load %arg10[%c0_114, %c0_115, %c0_116] : memref<2x8x512xf32, #tpu.memory_space<vmem>>, vector<2x8x512xf32>
      tpu.vector_store %arg10[%c0_114, %c0_115, %c0_116], %352 {strides = array<i32>} : memref<2x8x512xf32, #tpu.memory_space<vmem>>, vector<2x8x512xf32>,
      %cst_117 = arith.constant 0.000000e+00 : f32
      %354 = vector.broadcast %cst_117 : f32 to vector<2x8x512xf32>
      %c0_118 = arith.constant 0 : index
      %c0_119 = arith.constant 0 : index
      %c0_120 = arith.constant 0 : index
      %355 = vector.load %arg11[%c0_118, %c0_119, %c0_120] : memref<2x8x512xf32, #tpu.memory_space<vmem>>, vector<2x8x512xf32>
      tpu.vector_store %arg11[%c0_118, %c0_119, %c0_120], %354 {strides = array<i32>} : memref<2x8x512xf32, #tpu.memory_space<vmem>>, vector<2x8x512xf32>,
    } else {
    }
    %c0 = arith.constant 0 : index
    %c0_1 = arith.constant 0 : index
    %3 = vector.load %arg5[%c0, %c0_1] : memref<1x768xf32, #tpu.memory_space<vmem>>, vector<1x768xf32>
    %4 = arith.index_cast %arg1 : i32 to index
    %c0_2 = arith.constant 0 : index
    %c0_3 = arith.constant 0 : index
    %5 = vector.load %arg6[%4, %c0_2, %c0_3] : memref<2x1x72xbf16, #tpu.memory_space<vmem>>, vector<1x1x72xbf16>
    %6 = vector.shape_cast %5 : vector<1x1x72xbf16> to vector<1x72xbf16>
    %7 = arith.index_cast %arg1 : i32 to index
    %c0_4 = arith.constant 0 : index
    %c0_5 = arith.constant 0 : index
    %8 = vector.load %arg7[%7, %c0_4, %c0_5] : memref<2x8x9xbf16, #tpu.memory_space<vmem>>, vector<1x8x9xbf16>
    %9 = vector.shape_cast %8 : vector<1x8x9xbf16> to vector<8x9xbf16>
    %c0_6 = arith.constant 0 : index
    %c0_7 = arith.constant 0 : index
    %c0_8 = arith.constant 0 : index
    %10 = vector.load %arg10[%c0_6, %c0_7, %c0_8] : memref<2x8x512xf32, #tpu.memory_space<vmem>>, vector<2x8x512xf32>
    %11 = arith.truncf %10 : vector<2x8x512xf32> to vector<2x8x512xbf16>
    %12 = vector.extract_strided_slice %11 {offsets = [0, 0, 0], sizes = [1, 8, 512], strides = [1, 1, 1]} : vector<2x8x512xbf16> to vector<1x8x512xbf16>
    %13 = vector.shape_cast %12 : vector<1x8x512xbf16> to vector<8x512xbf16>
    %14 = vector.extract_strided_slice %11 {offsets = [1, 0, 0], sizes = [1, 8, 512], strides = [1, 1, 1]} : vector<2x8x512xbf16> to vector<1x8x512xbf16>
    %15 = vector.shape_cast %14 : vector<1x8x512xbf16> to vector<8x512xbf16>
    %16 = vector.extract_strided_slice %13 {offsets = [0, 0], sizes = [8, 384], strides = [1, 1]} : vector<8x512xbf16> to vector<8x384xbf16>
    %17 = vector.extract_strided_slice %15 {offsets = [0, 0], sizes = [8, 384], strides = [1, 1]} : vector<8x512xbf16> to vector<8x384xbf16>
    %18 = tpu.concatenate %16, %17 in 1 : vector<8x384xbf16>, vector<8x384xbf16> -> vector<8x768xbf16>
    %19 = vector.extract_strided_slice %13 {offsets = [0, 1], sizes = [8, 384], strides = [1, 1]} : vector<8x512xbf16> to vector<8x384xbf16>
    %20 = vector.extract_strided_slice %15 {offsets = [0, 1], sizes = [8, 384], strides = [1, 1]} : vector<8x512xbf16> to vector<8x384xbf16>
    %21 = tpu.concatenate %19, %20 in 1 : vector<8x384xbf16>, vector<8x384xbf16> -> vector<8x768xbf16>
    %22 = vector.extract_strided_slice %13 {offsets = [0, 2], sizes = [8, 384], strides = [1, 1]} : vector<8x512xbf16> to vector<8x384xbf16>
    %23 = vector.extract_strided_slice %15 {offsets = [0, 2], sizes = [8, 384], strides = [1, 1]} : vector<8x512xbf16> to vector<8x384xbf16>
    %24 = tpu.concatenate %22, %23 in 1 : vector<8x384xbf16>, vector<8x384xbf16> -> vector<8x768xbf16>
    %25 = vector.extract_strided_slice %13 {offsets = [0, 18], sizes = [8, 384], strides = [1, 1]} : vector<8x512xbf16> to vector<8x384xbf16>
    %26 = vector.extract_strided_slice %15 {offsets = [0, 18], sizes = [8, 384], strides = [1, 1]} : vector<8x512xbf16> to vector<8x384xbf16>
    %27 = tpu.concatenate %25, %26 in 1 : vector<8x384xbf16>, vector<8x384xbf16> -> vector<8x768xbf16>
    %28 = vector.extract_strided_slice %13 {offsets = [0, 19], sizes = [8, 384], strides = [1, 1]} : vector<8x512xbf16> to vector<8x384xbf16>
    %29 = vector.extract_strided_slice %15 {offsets = [0, 19], sizes = [8, 384], strides = [1, 1]} : vector<8x512xbf16> to vector<8x384xbf16>
    %30 = tpu.concatenate %28, %29 in 1 : vector<8x384xbf16>, vector<8x384xbf16> -> vector<8x768xbf16>
    %31 = vector.extract_strided_slice %13 {offsets = [0, 20], sizes = [8, 384], strides = [1, 1]} : vector<8x512xbf16> to vector<8x384xbf16>
    %32 = vector.extract_strided_slice %15 {offsets = [0, 20], sizes = [8, 384], strides = [1, 1]} : vector<8x512xbf16> to vector<8x384xbf16>
    %33 = tpu.concatenate %31, %32 in 1 : vector<8x384xbf16>, vector<8x384xbf16> -> vector<8x768xbf16>
    %34 = vector.extract_strided_slice %13 {offsets = [0, 36], sizes = [8, 384], strides = [1, 1]} : vector<8x512xbf16> to vector<8x384xbf16>
    %35 = vector.extract_strided_slice %15 {offsets = [0, 36], sizes = [8, 384], strides = [1, 1]} : vector<8x512xbf16> to vector<8x384xbf16>
    %36 = tpu.concatenate %34, %35 in 1 : vector<8x384xbf16>, vector<8x384xbf16> -> vector<8x768xbf16>
    %37 = vector.extract_strided_slice %13 {offsets = [0, 37], sizes = [8, 384], strides = [1, 1]} : vector<8x512xbf16> to vector<8x384xbf16>
    %38 = vector.extract_strided_slice %15 {offsets = [0, 37], sizes = [8, 384], strides = [1, 1]} : vector<8x512xbf16> to vector<8x384xbf16>
    %39 = tpu.concatenate %37, %38 in 1 : vector<8x384xbf16>, vector<8x384xbf16> -> vector<8x768xbf16>
    %40 = vector.extract_strided_slice %13 {offsets = [0, 38], sizes = [8, 384], strides = [1, 1]} : vector<8x512xbf16> to vector<8x384xbf16>
    %41 = vector.extract_strided_slice %15 {offsets = [0, 38], sizes = [8, 384], strides = [1, 1]} : vector<8x512xbf16> to vector<8x384xbf16>
    %42 = tpu.concatenate %40, %41 in 1 : vector<8x384xbf16>, vector<8x384xbf16> -> vector<8x768xbf16>
    %43 = tpu.concatenate %18, %21, %24, %27, %30, %33, %36, %39, %42 in 0 : vector<8x768xbf16>, vector<8x768xbf16>, vector<8x768xbf16>, vector<8x768xbf16>, vector<8x768xbf16>, vector<8x768xbf16>, vector<8x768xbf16>, vector<8x768xbf16>, vector<8x768xbf16> -> vector<72x768xbf16>
    %cst = arith.constant dense<0.000000e+00> : vector<1x768xf32>
    %44 = tpu.matmul %6, %43, %cst {dimension_numbers = #tpu.dot_dimension_numbers<[1], [0], [0], [1], [0, 0, 1, 1], [], []>} : vector<1x72xbf16>, vector<72x768xbf16>, vector<1x768xf32> -> vector<1x768xf32>
    %45 = arith.mulf %44, %3 : vector<1x768xf32>
    %c0_9 = arith.constant 0 : index
    %c0_10 = arith.constant 0 : index
    %46 = vector.load %arg4[%c0_9, %c0_10] : memref<384x512xf32, #tpu.memory_space<vmem>>, vector<384x512xf32>
    %47 = vector.extract_strided_slice %45 {offsets = [0, 0], sizes = [1, 384], strides = [1, 1]} : vector<1x768xf32> to vector<1x384xf32>
    %cst_11 = arith.constant dense<0.000000e+00> : vector<1x512xf32>
    %48 = tpu.matmul %47, %46, %cst_11 {dimension_numbers = #tpu.dot_dimension_numbers<[1], [0], [0], [1], [0, 0, 1, 1], [], []>} : vector<1x384xf32>, vector<384x512xf32>, vector<1x512xf32> -> vector<1x512xf32>
    %c0_12 = arith.constant 0 : index
    %c0_13 = arith.constant 0 : index
    %c0_14 = arith.constant 0 : index
    %49 = vector.load %arg3[%c0_12, %c0_13, %c0_14] : memref<2x1x512xf32, #tpu.memory_space<vmem>>, vector<1x1x512xf32>
    %50 = vector.shape_cast %49 : vector<1x1x512xf32> to vector<1x512xf32>
    %51 = arith.subf %48, %50 : vector<1x512xf32>
    %52 = vector.extract_strided_slice %45 {offsets = [0, 384], sizes = [1, 384], strides = [1, 1]} : vector<1x768xf32> to vector<1x384xf32>
    %cst_15 = arith.constant dense<0.000000e+00> : vector<1x512xf32>
    %53 = tpu.matmul %52, %46, %cst_15 {dimension_numbers = #tpu.dot_dimension_numbers<[1], [0], [0], [1], [0, 0, 1, 1], [], []>} : vector<1x384xf32>, vector<384x512xf32>, vector<1x512xf32> -> vector<1x512xf32>
    %c1 = arith.constant 1 : index
    %c0_16 = arith.constant 0 : index
    %c0_17 = arith.constant 0 : index
    %54 = vector.load %arg3[%c1, %c0_16, %c0_17] : memref<2x1x512xf32, #tpu.memory_space<vmem>>, vector<1x1x512xf32>
    %55 = vector.shape_cast %54 : vector<1x1x512xf32> to vector<1x512xf32>
    %56 = arith.subf %53, %55 : vector<1x512xf32>
    %57 = arith.truncf %51 : vector<1x512xf32> to vector<1x512xbf16>
    %58 = arith.truncf %56 : vector<1x512xf32> to vector<1x512xbf16>
    %59 = vector.extract_strided_slice %57 {offsets = [0, 0], sizes = [1, 384], strides = [1, 1]} : vector<1x512xbf16> to vector<1x384xbf16>
    %60 = vector.extract_strided_slice %58 {offsets = [0, 0], sizes = [1, 384], strides = [1, 1]} : vector<1x512xbf16> to vector<1x384xbf16>
    %61 = tpu.concatenate %59, %60 in 1 : vector<1x384xbf16>, vector<1x384xbf16> -> vector<1x768xbf16>
    %62 = vector.extract_strided_slice %57 {offsets = [0, 1], sizes = [1, 384], strides = [1, 1]} : vector<1x512xbf16> to vector<1x384xbf16>
    %63 = vector.extract_strided_slice %58 {offsets = [0, 1], sizes = [1, 384], strides = [1, 1]} : vector<1x512xbf16> to vector<1x384xbf16>
    %64 = tpu.concatenate %62, %63 in 1 : vector<1x384xbf16>, vector<1x384xbf16> -> vector<1x768xbf16>
    %65 = vector.extract_strided_slice %57 {offsets = [0, 2], sizes = [1, 384], strides = [1, 1]} : vector<1x512xbf16> to vector<1x384xbf16>
    %66 = vector.extract_strided_slice %58 {offsets = [0, 2], sizes = [1, 384], strides = [1, 1]} : vector<1x512xbf16> to vector<1x384xbf16>
    %67 = tpu.concatenate %65, %66 in 1 : vector<1x384xbf16>, vector<1x384xbf16> -> vector<1x768xbf16>
    %68 = vector.extract_strided_slice %57 {offsets = [0, 18], sizes = [1, 384], strides = [1, 1]} : vector<1x512xbf16> to vector<1x384xbf16>
    %69 = vector.extract_strided_slice %58 {offsets = [0, 18], sizes = [1, 384], strides = [1, 1]} : vector<1x512xbf16> to vector<1x384xbf16>
    %70 = tpu.concatenate %68, %69 in 1 : vector<1x384xbf16>, vector<1x384xbf16> -> vector<1x768xbf16>
    %71 = vector.extract_strided_slice %57 {offsets = [0, 19], sizes = [1, 384], strides = [1, 1]} : vector<1x512xbf16> to vector<1x384xbf16>
    %72 = vector.extract_strided_slice %58 {offsets = [0, 19], sizes = [1, 384], strides = [1, 1]} : vector<1x512xbf16> to vector<1x384xbf16>
    %73 = tpu.concatenate %71, %72 in 1 : vector<1x384xbf16>, vector<1x384xbf16> -> vector<1x768xbf16>
    %74 = vector.extract_strided_slice %57 {offsets = [0, 20], sizes = [1, 384], strides = [1, 1]} : vector<1x512xbf16> to vector<1x384xbf16>
    %75 = vector.extract_strided_slice %58 {offsets = [0, 20], sizes = [1, 384], strides = [1, 1]} : vector<1x512xbf16> to vector<1x384xbf16>
    %76 = tpu.concatenate %74, %75 in 1 : vector<1x384xbf16>, vector<1x384xbf16> -> vector<1x768xbf16>
    %77 = vector.extract_strided_slice %57 {offsets = [0, 36], sizes = [1, 384], strides = [1, 1]} : vector<1x512xbf16> to vector<1x384xbf16>
    %78 = vector.extract_strided_slice %58 {offsets = [0, 36], sizes = [1, 384], strides = [1, 1]} : vector<1x512xbf16> to vector<1x384xbf16>
    %79 = tpu.concatenate %77, %78 in 1 : vector<1x384xbf16>, vector<1x384xbf16> -> vector<1x768xbf16>
    %80 = vector.extract_strided_slice %57 {offsets = [0, 37], sizes = [1, 384], strides = [1, 1]} : vector<1x512xbf16> to vector<1x384xbf16>
    %81 = vector.extract_strided_slice %58 {offsets = [0, 37], sizes = [1, 384], strides = [1, 1]} : vector<1x512xbf16> to vector<1x384xbf16>
    %82 = tpu.concatenate %80, %81 in 1 : vector<1x384xbf16>, vector<1x384xbf16> -> vector<1x768xbf16>
    %83 = vector.extract_strided_slice %57 {offsets = [0, 38], sizes = [1, 384], strides = [1, 1]} : vector<1x512xbf16> to vector<1x384xbf16>
    %84 = vector.extract_strided_slice %58 {offsets = [0, 38], sizes = [1, 384], strides = [1, 1]} : vector<1x512xbf16> to vector<1x384xbf16>
    %85 = tpu.concatenate %83, %84 in 1 : vector<1x384xbf16>, vector<1x384xbf16> -> vector<1x768xbf16>
    %86 = tpu.concatenate %61, %64, %67, %70, %73, %76, %79, %82, %85 in 0 : vector<1x768xbf16>, vector<1x768xbf16>, vector<1x768xbf16>, vector<1x768xbf16>, vector<1x768xbf16>, vector<1x768xbf16>, vector<1x768xbf16>, vector<1x768xbf16>, vector<1x768xbf16> -> vector<9x768xbf16>
    %cst_18 = arith.constant dense<0.000000e+00> : vector<8x768xf32>
    %87 = tpu.matmul %9, %86, %cst_18 {dimension_numbers = #tpu.dot_dimension_numbers<[1], [0], [0], [1], [0, 0, 1, 1], [], []>} : vector<8x9xbf16>, vector<9x768xbf16>, vector<8x768xf32> -> vector<8x768xf32>
    %88 = vector.broadcast %3 : vector<1x768xf32> to vector<8x768xf32>
    %89 = arith.mulf %87, %88 : vector<8x768xf32>
    %90 = vector.extract_strided_slice %10 {offsets = [0, 0, 19], sizes = [1, 8, 384], strides = [1, 1, 1]} : vector<2x8x512xf32> to vector<1x8x384xf32>
    %91 = vector.shape_cast %90 : vector<1x8x384xf32> to vector<8x384xf32>
    %92 = vector.extract_strided_slice %89 {offsets = [0, 0], sizes = [8, 384], strides = [1, 1]} : vector<8x768xf32> to vector<8x384xf32>
    %93 = arith.subf %91, %92 : vector<8x384xf32>
    %c0_19 = arith.constant 0 : index
    %c0_20 = arith.constant 0 : index
    %c19 = arith.constant 19 : index
    %94 = vector.load %arg11[%c0_19, %c0_20, %c19] : memref<2x8x512xf32, #tpu.memory_space<vmem>>, vector<1x8x384xf32>
    %95 = vector.shape_cast %94 : vector<1x8x384xf32> to vector<8x384xf32>
    %96 = vector.shape_cast %93 : vector<8x384xf32> to vector<1x8x384xf32>
    tpu.vector_store %arg11[%c0_19, %c0_20, %c19], %96 {strides = array<i32>} : memref<2x8x512xf32, #tpu.memory_space<vmem>>, vector<1x8x384xf32>,
    %97 = vector.extract_strided_slice %10 {offsets = [1, 0, 19], sizes = [1, 8, 384], strides = [1, 1, 1]} : vector<2x8x512xf32> to vector<1x8x384xf32>
    %98 = vector.shape_cast %97 : vector<1x8x384xf32> to vector<8x384xf32>
    %99 = vector.extract_strided_slice %89 {offsets = [0, 384], sizes = [8, 384], strides = [1, 1]} : vector<8x768xf32> to vector<8x384xf32>
    %100 = arith.subf %98, %99 : vector<8x384xf32>
    %c1_21 = arith.constant 1 : index
    %c0_22 = arith.constant 0 : index
    %c19_23 = arith.constant 19 : index
    %101 = vector.load %arg11[%c1_21, %c0_22, %c19_23] : memref<2x8x512xf32, #tpu.memory_space<vmem>>, vector<1x8x384xf32>
    %102 = vector.shape_cast %101 : vector<1x8x384xf32> to vector<8x384xf32>
    %103 = vector.shape_cast %100 : vector<8x384xf32> to vector<1x8x384xf32>
    tpu.vector_store %arg11[%c1_21, %c0_22, %c19_23], %103 {strides = array<i32>} : memref<2x8x512xf32, #tpu.memory_space<vmem>>, vector<1x8x384xf32>,
    %c0_24 = arith.constant 0 : index
    %c0_25 = arith.constant 0 : index
    %c0_26 = arith.constant 0 : index
    %104 = vector.load %arg11[%c0_24, %c0_25, %c0_26] : memref<2x8x512xf32, #tpu.memory_space<vmem>>, vector<2x8x512xf32>
    %105 = arith.truncf %104 : vector<2x8x512xf32> to vector<2x8x512xbf16>
    %106 = vector.extract_strided_slice %105 {offsets = [0, 0, 0], sizes = [1, 8, 512], strides = [1, 1, 1]} : vector<2x8x512xbf16> to vector<1x8x512xbf16>
    %107 = vector.shape_cast %106 : vector<1x8x512xbf16> to vector<8x512xbf16>
    %108 = vector.extract_strided_slice %105 {offsets = [1, 0, 0], sizes = [1, 8, 512], strides = [1, 1, 1]} : vector<2x8x512xbf16> to vector<1x8x512xbf16>
    %109 = vector.shape_cast %108 : vector<1x8x512xbf16> to vector<8x512xbf16>
    %c4_i32 = arith.constant 4 : i32
    %110 = arith.muli %c4_i32, %arg1 : i32
    %c0_i32_27 = arith.constant 0 : i32
    %111 = arith.addi %110, %c0_i32_27 : i32
    %112 = arith.index_cast %111 : i32 to index
    %c0_28 = arith.constant 0 : index
    %c0_29 = arith.constant 0 : index
    %113 = vector.load %arg8[%112, %c0_28, %c0_29] : memref<8x8x72xbf16, #tpu.memory_space<vmem>>, vector<1x8x72xbf16>
    %114 = vector.shape_cast %113 : vector<1x8x72xbf16> to vector<8x72xbf16>
    %c4_i32_30 = arith.constant 4 : i32
    %115 = arith.muli %c4_i32_30, %arg1 : i32
    %c0_i32_31 = arith.constant 0 : i32
    %116 = arith.addi %115, %c0_i32_31 : i32
    %117 = arith.index_cast %116 : i32 to index
    %c0_32 = arith.constant 0 : index
    %c0_33 = arith.constant 0 : index
    %118 = vector.load %arg9[%117, %c0_32, %c0_33] : memref<8x8x1xf32, #tpu.memory_space<vmem>>, vector<1x8x1xf32>
    %119 = vector.shape_cast %118 : vector<1x8x1xf32> to vector<8x1xf32>
    %120 = vector.extract_strided_slice %107 {offsets = [0, 0], sizes = [8, 384], strides = [1, 1]} : vector<8x512xbf16> to vector<8x384xbf16>
    %121 = vector.extract_strided_slice %109 {offsets = [0, 0], sizes = [8, 384], strides = [1, 1]} : vector<8x512xbf16> to vector<8x384xbf16>
    %122 = tpu.concatenate %120, %121 in 1 : vector<8x384xbf16>, vector<8x384xbf16> -> vector<8x768xbf16>
    %123 = vector.extract_strided_slice %107 {offsets = [0, 1], sizes = [8, 384], strides = [1, 1]} : vector<8x512xbf16> to vector<8x384xbf16>
    %124 = vector.extract_strided_slice %109 {offsets = [0, 1], sizes = [8, 384], strides = [1, 1]} : vector<8x512xbf16> to vector<8x384xbf16>
    %125 = tpu.concatenate %123, %124 in 1 : vector<8x384xbf16>, vector<8x384xbf16> -> vector<8x768xbf16>
    %126 = vector.extract_strided_slice %107 {offsets = [0, 2], sizes = [8, 384], strides = [1, 1]} : vector<8x512xbf16> to vector<8x384xbf16>
    %127 = vector.extract_strided_slice %109 {offsets = [0, 2], sizes = [8, 384], strides = [1, 1]} : vector<8x512xbf16> to vector<8x384xbf16>
    %128 = tpu.concatenate %126, %127 in 1 : vector<8x384xbf16>, vector<8x384xbf16> -> vector<8x768xbf16>
    %129 = vector.extract_strided_slice %107 {offsets = [0, 18], sizes = [8, 384], strides = [1, 1]} : vector<8x512xbf16> to vector<8x384xbf16>
    %130 = vector.extract_strided_slice %109 {offsets = [0, 18], sizes = [8, 384], strides = [1, 1]} : vector<8x512xbf16> to vector<8x384xbf16>
    %131 = tpu.concatenate %129, %130 in 1 : vector<8x384xbf16>, vector<8x384xbf16> -> vector<8x768xbf16>
    %132 = vector.extract_strided_slice %107 {offsets = [0, 19], sizes = [8, 384], strides = [1, 1]} : vector<8x512xbf16> to vector<8x384xbf16>
    %133 = vector.extract_strided_slice %109 {offsets = [0, 19], sizes = [8, 384], strides = [1, 1]} : vector<8x512xbf16> to vector<8x384xbf16>
    %134 = tpu.concatenate %132, %133 in 1 : vector<8x384xbf16>, vector<8x384xbf16> -> vector<8x768xbf16>
    %135 = vector.extract_strided_slice %107 {offsets = [0, 20], sizes = [8, 384], strides = [1, 1]} : vector<8x512xbf16> to vector<8x384xbf16>
    %136 = vector.extract_strided_slice %109 {offsets = [0, 20], sizes = [8, 384], strides = [1, 1]} : vector<8x512xbf16> to vector<8x384xbf16>
    %137 = tpu.concatenate %135, %136 in 1 : vector<8x384xbf16>, vector<8x384xbf16> -> vector<8x768xbf16>
    %138 = vector.extract_strided_slice %107 {offsets = [0, 36], sizes = [8, 384], strides = [1, 1]} : vector<8x512xbf16> to vector<8x384xbf16>
    %139 = vector.extract_strided_slice %109 {offsets = [0, 36], sizes = [8, 384], strides = [1, 1]} : vector<8x512xbf16> to vector<8x384xbf16>
    %140 = tpu.concatenate %138, %139 in 1 : vector<8x384xbf16>, vector<8x384xbf16> -> vector<8x768xbf16>
    %141 = vector.extract_strided_slice %107 {offsets = [0, 37], sizes = [8, 384], strides = [1, 1]} : vector<8x512xbf16> to vector<8x384xbf16>
    %142 = vector.extract_strided_slice %109 {offsets = [0, 37], sizes = [8, 384], strides = [1, 1]} : vector<8x512xbf16> to vector<8x384xbf16>
    %143 = tpu.concatenate %141, %142 in 1 : vector<8x384xbf16>, vector<8x384xbf16> -> vector<8x768xbf16>
    %144 = vector.extract_strided_slice %107 {offsets = [0, 38], sizes = [8, 384], strides = [1, 1]} : vector<8x512xbf16> to vector<8x384xbf16>
    %145 = vector.extract_strided_slice %109 {offsets = [0, 38], sizes = [8, 384], strides = [1, 1]} : vector<8x512xbf16> to vector<8x384xbf16>
    %146 = tpu.concatenate %144, %145 in 1 : vector<8x384xbf16>, vector<8x384xbf16> -> vector<8x768xbf16>
    %147 = tpu.concatenate %122, %125, %128, %131, %134, %137, %140, %143, %146 in 0 : vector<8x768xbf16>, vector<8x768xbf16>, vector<8x768xbf16>, vector<8x768xbf16>, vector<8x768xbf16>, vector<8x768xbf16>, vector<8x768xbf16>, vector<8x768xbf16>, vector<8x768xbf16> -> vector<72x768xbf16>
    %cst_34 = arith.constant dense<0.000000e+00> : vector<8x768xf32>
    %148 = tpu.matmul %114, %147, %cst_34 {dimension_numbers = #tpu.dot_dimension_numbers<[1], [0], [0], [1], [0, 0, 1, 1], [], []>} : vector<8x72xbf16>, vector<72x768xbf16>, vector<8x768xf32> -> vector<8x768xf32>
    %149 = vector.broadcast %119 : vector<8x1xf32> to vector<8x768xf32>
    %150 = arith.addf %148, %149 : vector<8x768xf32>
    %cst_35 = arith.constant 0.000000e+00 : f32
    %151 = vector.broadcast %cst_35 : f32 to vector<8x768xf32>
    %152 = arith.maximumf %150, %151 : vector<8x768xf32>
    %153 = vector.broadcast %3 : vector<1x768xf32> to vector<8x768xf32>
    %154 = arith.mulf %152, %153 : vector<8x768xf32>
    %155 = vector.extract_strided_slice %154 {offsets = [0, 0], sizes = [8, 384], strides = [1, 1]} : vector<8x768xf32> to vector<8x384xf32>
    %c0_36 = arith.constant 0 : index
    %c0_37 = arith.constant 0 : index
    %c19_38 = arith.constant 19 : index
    %156 = vector.load %arg10[%c0_36, %c0_37, %c19_38] : memref<2x8x512xf32, #tpu.memory_space<vmem>>, vector<1x8x384xf32>
    %157 = vector.shape_cast %156 : vector<1x8x384xf32> to vector<8x384xf32>
    %158 = vector.shape_cast %155 : vector<8x384xf32> to vector<1x8x384xf32>
    tpu.vector_store %arg10[%c0_36, %c0_37, %c19_38], %158 {strides = array<i32>} : memref<2x8x512xf32, #tpu.memory_space<vmem>>, vector<1x8x384xf32>,
    %159 = vector.extract_strided_slice %154 {offsets = [0, 384], sizes = [8, 384], strides = [1, 1]} : vector<8x768xf32> to vector<8x384xf32>
    %c1_39 = arith.constant 1 : index
    %c0_40 = arith.constant 0 : index
    %c19_41 = arith.constant 19 : index
    %160 = vector.load %arg10[%c1_39, %c0_40, %c19_41] : memref<2x8x512xf32, #tpu.memory_space<vmem>>, vector<1x8x384xf32>
    %161 = vector.shape_cast %160 : vector<1x8x384xf32> to vector<8x384xf32>
    %162 = vector.shape_cast %159 : vector<8x384xf32> to vector<1x8x384xf32>
    tpu.vector_store %arg10[%c1_39, %c0_40, %c19_41], %162 {strides = array<i32>} : memref<2x8x512xf32, #tpu.memory_space<vmem>>, vector<1x8x384xf32>,
    %c0_42 = arith.constant 0 : index
    %c0_43 = arith.constant 0 : index
    %c0_44 = arith.constant 0 : index
    %163 = vector.load %arg10[%c0_42, %c0_43, %c0_44] : memref<2x8x512xf32, #tpu.memory_space<vmem>>, vector<2x8x512xf32>
    %164 = arith.truncf %163 : vector<2x8x512xf32> to vector<2x8x512xbf16>
    %165 = vector.extract_strided_slice %164 {offsets = [0, 0, 0], sizes = [1, 8, 512], strides = [1, 1, 1]} : vector<2x8x512xbf16> to vector<1x8x512xbf16>
    %166 = vector.shape_cast %165 : vector<1x8x512xbf16> to vector<8x512xbf16>
    %167 = vector.extract_strided_slice %164 {offsets = [1, 0, 0], sizes = [1, 8, 512], strides = [1, 1, 1]} : vector<2x8x512xbf16> to vector<1x8x512xbf16>
    %168 = vector.shape_cast %167 : vector<1x8x512xbf16> to vector<8x512xbf16>
    %c4_i32_45 = arith.constant 4 : i32
    %169 = arith.muli %c4_i32_45, %arg1 : i32
    %c0_i32_46 = arith.constant 0 : i32
    %170 = arith.addi %169, %c0_i32_46 : i32
    %c1_i32 = arith.constant 1 : i32
    %171 = arith.addi %170, %c1_i32 : i32
    %172 = arith.index_cast %171 : i32 to index
    %c0_47 = arith.constant 0 : index
    %c0_48 = arith.constant 0 : index
    %173 = vector.load %arg8[%172, %c0_47, %c0_48] : memref<8x8x72xbf16, #tpu.memory_space<vmem>>, vector<1x8x72xbf16>
    %174 = vector.shape_cast %173 : vector<1x8x72xbf16> to vector<8x72xbf16>
    %c4_i32_49 = arith.constant 4 : i32
    %175 = arith.muli %c4_i32_49, %arg1 : i32
    %c0_i32_50 = arith.constant 0 : i32
    %176 = arith.addi %175, %c0_i32_50 : i32
    %c1_i32_51 = arith.constant 1 : i32
    %177 = arith.addi %176, %c1_i32_51 : i32
    %178 = arith.index_cast %177 : i32 to index
    %c0_52 = arith.constant 0 : index
    %c0_53 = arith.constant 0 : index
    %179 = vector.load %arg9[%178, %c0_52, %c0_53] : memref<8x8x1xf32, #tpu.memory_space<vmem>>, vector<1x8x1xf32>
    %180 = vector.shape_cast %179 : vector<1x8x1xf32> to vector<8x1xf32>
    %181 = vector.extract_strided_slice %166 {offsets = [0, 0], sizes = [8, 384], strides = [1, 1]} : vector<8x512xbf16> to vector<8x384xbf16>
    %182 = vector.extract_strided_slice %168 {offsets = [0, 0], sizes = [8, 384], strides = [1, 1]} : vector<8x512xbf16> to vector<8x384xbf16>
    %183 = tpu.concatenate %181, %182 in 1 : vector<8x384xbf16>, vector<8x384xbf16> -> vector<8x768xbf16>
    %184 = vector.extract_strided_slice %166 {offsets = [0, 1], sizes = [8, 384], strides = [1, 1]} : vector<8x512xbf16> to vector<8x384xbf16>
    %185 = vector.extract_strided_slice %168 {offsets = [0, 1], sizes = [8, 384], strides = [1, 1]} : vector<8x512xbf16> to vector<8x384xbf16>
    %186 = tpu.concatenate %184, %185 in 1 : vector<8x384xbf16>, vector<8x384xbf16> -> vector<8x768xbf16>
    %187 = vector.extract_strided_slice %166 {offsets = [0, 2], sizes = [8, 384], strides = [1, 1]} : vector<8x512xbf16> to vector<8x384xbf16>
    %188 = vector.extract_strided_slice %168 {offsets = [0, 2], sizes = [8, 384], strides = [1, 1]} : vector<8x512xbf16> to vector<8x384xbf16>
    %189 = tpu.concatenate %187, %188 in 1 : vector<8x384xbf16>, vector<8x384xbf16> -> vector<8x768xbf16>
    %190 = vector.extract_strided_slice %166 {offsets = [0, 18], sizes = [8, 384], strides = [1, 1]} : vector<8x512xbf16> to vector<8x384xbf16>
    %191 = vector.extract_strided_slice %168 {offsets = [0, 18], sizes = [8, 384], strides = [1, 1]} : vector<8x512xbf16> to vector<8x384xbf16>
    %192 = tpu.concatenate %190, %191 in 1 : vector<8x384xbf16>, vector<8x384xbf16> -> vector<8x768xbf16>
    %193 = vector.extract_strided_slice %166 {offsets = [0, 19], sizes = [8, 384], strides = [1, 1]} : vector<8x512xbf16> to vector<8x384xbf16>
    %194 = vector.extract_strided_slice %168 {offsets = [0, 19], sizes = [8, 384], strides = [1, 1]} : vector<8x512xbf16> to vector<8x384xbf16>
    %195 = tpu.concatenate %193, %194 in 1 : vector<8x384xbf16>, vector<8x384xbf16> -> vector<8x768xbf16>
    %196 = vector.extract_strided_slice %166 {offsets = [0, 20], sizes = [8, 384], strides = [1, 1]} : vector<8x512xbf16> to vector<8x384xbf16>
    %197 = vector.extract_strided_slice %168 {offsets = [0, 20], sizes = [8, 384], strides = [1, 1]} : vector<8x512xbf16> to vector<8x384xbf16>
    %198 = tpu.concatenate %196, %197 in 1 : vector<8x384xbf16>, vector<8x384xbf16> -> vector<8x768xbf16>
    %199 = vector.extract_strided_slice %166 {offsets = [0, 36], sizes = [8, 384], strides = [1, 1]} : vector<8x512xbf16> to vector<8x384xbf16>
    %200 = vector.extract_strided_slice %168 {offsets = [0, 36], sizes = [8, 384], strides = [1, 1]} : vector<8x512xbf16> to vector<8x384xbf16>
    %201 = tpu.concatenate %199, %200 in 1 : vector<8x384xbf16>, vector<8x384xbf16> -> vector<8x768xbf16>
    %202 = vector.extract_strided_slice %166 {offsets = [0, 37], sizes = [8, 384], strides = [1, 1]} : vector<8x512xbf16> to vector<8x384xbf16>
    %203 = vector.extract_strided_slice %168 {offsets = [0, 37], sizes = [8, 384], strides = [1, 1]} : vector<8x512xbf16> to vector<8x384xbf16>
    %204 = tpu.concatenate %202, %203 in 1 : vector<8x384xbf16>, vector<8x384xbf16> -> vector<8x768xbf16>
    %205 = vector.extract_strided_slice %166 {offsets = [0, 38], sizes = [8, 384], strides = [1, 1]} : vector<8x512xbf16> to vector<8x384xbf16>
    %206 = vector.extract_strided_slice %168 {offsets = [0, 38], sizes = [8, 384], strides = [1, 1]} : vector<8x512xbf16> to vector<8x384xbf16>
    %207 = tpu.concatenate %205, %206 in 1 : vector<8x384xbf16>, vector<8x384xbf16> -> vector<8x768xbf16>
    %208 = tpu.concatenate %183, %186, %189, %192, %195, %198, %201, %204, %207 in 0 : vector<8x768xbf16>, vector<8x768xbf16>, vector<8x768xbf16>, vector<8x768xbf16>, vector<8x768xbf16>, vector<8x768xbf16>, vector<8x768xbf16>, vector<8x768xbf16>, vector<8x768xbf16> -> vector<72x768xbf16>
    %cst_54 = arith.constant dense<0.000000e+00> : vector<8x768xf32>
    %209 = tpu.matmul %174, %208, %cst_54 {dimension_numbers = #tpu.dot_dimension_numbers<[1], [0], [0], [1], [0, 0, 1, 1], [], []>} : vector<8x72xbf16>, vector<72x768xbf16>, vector<8x768xf32> -> vector<8x768xf32>
    %210 = vector.broadcast %180 : vector<8x1xf32> to vector<8x768xf32>
    %211 = arith.addf %209, %210 : vector<8x768xf32>
    %212 = vector.broadcast %3 : vector<1x768xf32> to vector<8x768xf32>
    %213 = arith.mulf %211, %212 : vector<8x768xf32>
    %c0_55 = arith.constant 0 : index
    %c0_56 = arith.constant 0 : index
    %c19_57 = arith.constant 19 : index
    %214 = vector.load %arg11[%c0_55, %c0_56, %c19_57] : memref<2x8x512xf32, #tpu.memory_space<vmem>>, vector<1x8x384xf32>
    %215 = vector.shape_cast %214 : vector<1x8x384xf32> to vector<8x384xf32>
    %216 = vector.extract_strided_slice %213 {offsets = [0, 0], sizes = [8, 384], strides = [1, 1]} : vector<8x768xf32> to vector<8x384xf32>
    %217 = arith.addf %215, %216 : vector<8x384xf32>
    %c0_58 = arith.constant 0 : index
    %c0_59 = arith.constant 0 : index
    %c19_60 = arith.constant 19 : index
    %218 = vector.load %arg11[%c0_58, %c0_59, %c19_60] : memref<2x8x512xf32, #tpu.memory_space<vmem>>, vector<1x8x384xf32>
    %219 = vector.shape_cast %218 : vector<1x8x384xf32> to vector<8x384xf32>
    %220 = vector.shape_cast %217 : vector<8x384xf32> to vector<1x8x384xf32>
    tpu.vector_store %arg11[%c0_58, %c0_59, %c19_60], %220 {strides = array<i32>} : memref<2x8x512xf32, #tpu.memory_space<vmem>>, vector<1x8x384xf32>,
    %c1_61 = arith.constant 1 : index
    %c0_62 = arith.constant 0 : index
    %c19_63 = arith.constant 19 : index
    %221 = vector.load %arg11[%c1_61, %c0_62, %c19_63] : memref<2x8x512xf32, #tpu.memory_space<vmem>>, vector<1x8x384xf32>
    %222 = vector.shape_cast %221 : vector<1x8x384xf32> to vector<8x384xf32>
    %223 = vector.extract_strided_slice %213 {offsets = [0, 384], sizes = [8, 384], strides = [1, 1]} : vector<8x768xf32> to vector<8x384xf32>
    %224 = arith.addf %222, %223 : vector<8x384xf32>
    %c1_64 = arith.constant 1 : index
    %c0_65 = arith.constant 0 : index
    %c19_66 = arith.constant 19 : index
    %225 = vector.load %arg11[%c1_64, %c0_65, %c19_66] : memref<2x8x512xf32, #tpu.memory_space<vmem>>, vector<1x8x384xf32>
    %226 = vector.shape_cast %225 : vector<1x8x384xf32> to vector<8x384xf32>
    %227 = vector.shape_cast %224 : vector<8x384xf32> to vector<1x8x384xf32>
    tpu.vector_store %arg11[%c1_64, %c0_65, %c19_66], %227 {strides = array<i32>} : memref<2x8x512xf32, #tpu.memory_space<vmem>>, vector<1x8x384xf32>,
    %c0_67 = arith.constant 0 : index
    %c0_68 = arith.constant 0 : index
    %c0_69 = arith.constant 0 : index
    %228 = vector.load %arg11[%c0_67, %c0_68, %c0_69] : memref<2x8x512xf32, #tpu.memory_space<vmem>>, vector<2x8x512xf32>
    %229 = arith.truncf %228 : vector<2x8x512xf32> to vector<2x8x512xbf16>
    %230 = vector.extract_strided_slice %229 {offsets = [0, 0, 0], sizes = [1, 8, 512], strides = [1, 1, 1]} : vector<2x8x512xbf16> to vector<1x8x512xbf16>
    %231 = vector.shape_cast %230 : vector<1x8x512xbf16> to vector<8x512xbf16>
    %232 = vector.extract_strided_slice %229 {offsets = [1, 0, 0], sizes = [1, 8, 512], strides = [1, 1, 1]} : vector<2x8x512xbf16> to vector<1x8x512xbf16>
    %233 = vector.shape_cast %232 : vector<1x8x512xbf16> to vector<8x512xbf16>
    %c4_i32_70 = arith.constant 4 : i32
    %234 = arith.muli %c4_i32_70, %arg1 : i32
    %c2_i32 = arith.constant 2 : i32
    %235 = arith.addi %234, %c2_i32 : i32
    %236 = arith.index_cast %235 : i32 to index
    %c0_71 = arith.constant 0 : index
    %c0_72 = arith.constant 0 : index
    %237 = vector.load %arg8[%236, %c0_71, %c0_72] : memref<8x8x72xbf16, #tpu.memory_space<vmem>>, vector<1x8x72xbf16>
    %238 = vector.shape_cast %237 : vector<1x8x72xbf16> to vector<8x72xbf16>
    %c4_i32_73 = arith.constant 4 : i32
    %239 = arith.muli %c4_i32_73, %arg1 : i32
    %c2_i32_74 = arith.constant 2 : i32
    %240 = arith.addi %239, %c2_i32_74 : i32
    %241 = arith.index_cast %240 : i32 to index
    %c0_75 = arith.constant 0 : index
    %c0_76 = arith.constant 0 : index
    %242 = vector.load %arg9[%241, %c0_75, %c0_76] : memref<8x8x1xf32, #tpu.memory_space<vmem>>, vector<1x8x1xf32>
    %243 = vector.shape_cast %242 : vector<1x8x1xf32> to vector<8x1xf32>
    %244 = vector.extract_strided_slice %231 {offsets = [0, 0], sizes = [8, 384], strides = [1, 1]} : vector<8x512xbf16> to vector<8x384xbf16>
    %245 = vector.extract_strided_slice %233 {offsets = [0, 0], sizes = [8, 384], strides = [1, 1]} : vector<8x512xbf16> to vector<8x384xbf16>
    %246 = tpu.concatenate %244, %245 in 1 : vector<8x384xbf16>, vector<8x384xbf16> -> vector<8x768xbf16>
    %247 = vector.extract_strided_slice %231 {offsets = [0, 1], sizes = [8, 384], strides = [1, 1]} : vector<8x512xbf16> to vector<8x384xbf16>
    %248 = vector.extract_strided_slice %233 {offsets = [0, 1], sizes = [8, 384], strides = [1, 1]} : vector<8x512xbf16> to vector<8x384xbf16>
    %249 = tpu.concatenate %247, %248 in 1 : vector<8x384xbf16>, vector<8x384xbf16> -> vector<8x768xbf16>
    %250 = vector.extract_strided_slice %231 {offsets = [0, 2], sizes = [8, 384], strides = [1, 1]} : vector<8x512xbf16> to vector<8x384xbf16>
    %251 = vector.extract_strided_slice %233 {offsets = [0, 2], sizes = [8, 384], strides = [1, 1]} : vector<8x512xbf16> to vector<8x384xbf16>
    %252 = tpu.concatenate %250, %251 in 1 : vector<8x384xbf16>, vector<8x384xbf16> -> vector<8x768xbf16>
    %253 = vector.extract_strided_slice %231 {offsets = [0, 18], sizes = [8, 384], strides = [1, 1]} : vector<8x512xbf16> to vector<8x384xbf16>
    %254 = vector.extract_strided_slice %233 {offsets = [0, 18], sizes = [8, 384], strides = [1, 1]} : vector<8x512xbf16> to vector<8x384xbf16>
    %255 = tpu.concatenate %253, %254 in 1 : vector<8x384xbf16>, vector<8x384xbf16> -> vector<8x768xbf16>
    %256 = vector.extract_strided_slice %231 {offsets = [0, 19], sizes = [8, 384], strides = [1, 1]} : vector<8x512xbf16> to vector<8x384xbf16>
    %257 = vector.extract_strided_slice %233 {offsets = [0, 19], sizes = [8, 384], strides = [1, 1]} : vector<8x512xbf16> to vector<8x384xbf16>
    %258 = tpu.concatenate %256, %257 in 1 : vector<8x384xbf16>, vector<8x384xbf16> -> vector<8x768xbf16>
    %259 = vector.extract_strided_slice %231 {offsets = [0, 20], sizes = [8, 384], strides = [1, 1]} : vector<8x512xbf16> to vector<8x384xbf16>
    %260 = vector.extract_strided_slice %233 {offsets = [0, 20], sizes = [8, 384], strides = [1, 1]} : vector<8x512xbf16> to vector<8x384xbf16>
    %261 = tpu.concatenate %259, %260 in 1 : vector<8x384xbf16>, vector<8x384xbf16> -> vector<8x768xbf16>
    %262 = vector.extract_strided_slice %231 {offsets = [0, 36], sizes = [8, 384], strides = [1, 1]} : vector<8x512xbf16> to vector<8x384xbf16>
    %263 = vector.extract_strided_slice %233 {offsets = [0, 36], sizes = [8, 384], strides = [1, 1]} : vector<8x512xbf16> to vector<8x384xbf16>
    %264 = tpu.concatenate %262, %263 in 1 : vector<8x384xbf16>, vector<8x384xbf16> -> vector<8x768xbf16>
    %265 = vector.extract_strided_slice %231 {offsets = [0, 37], sizes = [8, 384], strides = [1, 1]} : vector<8x512xbf16> to vector<8x384xbf16>
    %266 = vector.extract_strided_slice %233 {offsets = [0, 37], sizes = [8, 384], strides = [1, 1]} : vector<8x512xbf16> to vector<8x384xbf16>
    %267 = tpu.concatenate %265, %266 in 1 : vector<8x384xbf16>, vector<8x384xbf16> -> vector<8x768xbf16>
    %268 = vector.extract_strided_slice %231 {offsets = [0, 38], sizes = [8, 384], strides = [1, 1]} : vector<8x512xbf16> to vector<8x384xbf16>
    %269 = vector.extract_strided_slice %233 {offsets = [0, 38], sizes = [8, 384], strides = [1, 1]} : vector<8x512xbf16> to vector<8x384xbf16>
    %270 = tpu.concatenate %268, %269 in 1 : vector<8x384xbf16>, vector<8x384xbf16> -> vector<8x768xbf16>
    %271 = tpu.concatenate %246, %249, %252, %255, %258, %261, %264, %267, %270 in 0 : vector<8x768xbf16>, vector<8x768xbf16>, vector<8x768xbf16>, vector<8x768xbf16>, vector<8x768xbf16>, vector<8x768xbf16>, vector<8x768xbf16>, vector<8x768xbf16>, vector<8x768xbf16> -> vector<72x768xbf16>
    %cst_77 = arith.constant dense<0.000000e+00> : vector<8x768xf32>
    %272 = tpu.matmul %238, %271, %cst_77 {dimension_numbers = #tpu.dot_dimension_numbers<[1], [0], [0], [1], [0, 0, 1, 1], [], []>} : vector<8x72xbf16>, vector<72x768xbf16>, vector<8x768xf32> -> vector<8x768xf32>
    %273 = vector.broadcast %243 : vector<8x1xf32> to vector<8x768xf32>
    %274 = arith.addf %272, %273 : vector<8x768xf32>
    %cst_78 = arith.constant 0.000000e+00 : f32
    %275 = vector.broadcast %cst_78 : f32 to vector<8x768xf32>
    %276 = arith.maximumf %274, %275 : vector<8x768xf32>
    %277 = vector.broadcast %3 : vector<1x768xf32> to vector<8x768xf32>
    %278 = arith.mulf %276, %277 : vector<8x768xf32>
    %279 = vector.extract_strided_slice %278 {offsets = [0, 0], sizes = [8, 384], strides = [1, 1]} : vector<8x768xf32> to vector<8x384xf32>
    %c0_79 = arith.constant 0 : index
    %c0_80 = arith.constant 0 : index
    %c19_81 = arith.constant 19 : index
    %280 = vector.load %arg10[%c0_79, %c0_80, %c19_81] : memref<2x8x512xf32, #tpu.memory_space<vmem>>, vector<1x8x384xf32>
    %281 = vector.shape_cast %280 : vector<1x8x384xf32> to vector<8x384xf32>
    %282 = vector.shape_cast %279 : vector<8x384xf32> to vector<1x8x384xf32>
    tpu.vector_store %arg10[%c0_79, %c0_80, %c19_81], %282 {strides = array<i32>} : memref<2x8x512xf32, #tpu.memory_space<vmem>>, vector<1x8x384xf32>,
    %283 = vector.extract_strided_slice %278 {offsets = [0, 384], sizes = [8, 384], strides = [1, 1]} : vector<8x768xf32> to vector<8x384xf32>
    %c1_82 = arith.constant 1 : index
    %c0_83 = arith.constant 0 : index
    %c19_84 = arith.constant 19 : index
    %284 = vector.load %arg10[%c1_82, %c0_83, %c19_84] : memref<2x8x512xf32, #tpu.memory_space<vmem>>, vector<1x8x384xf32>
    %285 = vector.shape_cast %284 : vector<1x8x384xf32> to vector<8x384xf32>
    %286 = vector.shape_cast %283 : vector<8x384xf32> to vector<1x8x384xf32>
    tpu.vector_store %arg10[%c1_82, %c0_83, %c19_84], %286 {strides = array<i32>} : memref<2x8x512xf32, #tpu.memory_space<vmem>>, vector<1x8x384xf32>,
    %c0_85 = arith.constant 0 : index
    %c0_86 = arith.constant 0 : index
    %c0_87 = arith.constant 0 : index
    %287 = vector.load %arg10[%c0_85, %c0_86, %c0_87] : memref<2x8x512xf32, #tpu.memory_space<vmem>>, vector<2x8x512xf32>
    %288 = arith.truncf %287 : vector<2x8x512xf32> to vector<2x8x512xbf16>
    %289 = vector.extract_strided_slice %288 {offsets = [0, 0, 0], sizes = [1, 8, 512], strides = [1, 1, 1]} : vector<2x8x512xbf16> to vector<1x8x512xbf16>
    %290 = vector.shape_cast %289 : vector<1x8x512xbf16> to vector<8x512xbf16>
    %291 = vector.extract_strided_slice %288 {offsets = [1, 0, 0], sizes = [1, 8, 512], strides = [1, 1, 1]} : vector<2x8x512xbf16> to vector<1x8x512xbf16>
    %292 = vector.shape_cast %291 : vector<1x8x512xbf16> to vector<8x512xbf16>
    %c4_i32_88 = arith.constant 4 : i32
    %293 = arith.muli %c4_i32_88, %arg1 : i32
    %c2_i32_89 = arith.constant 2 : i32
    %294 = arith.addi %293, %c2_i32_89 : i32
    %c1_i32_90 = arith.constant 1 : i32
    %295 = arith.addi %294, %c1_i32_90 : i32
    %296 = arith.index_cast %295 : i32 to index
    %c0_91 = arith.constant 0 : index
    %c0_92 = arith.constant 0 : index
    %297 = vector.load %arg8[%296, %c0_91, %c0_92] : memref<8x8x72xbf16, #tpu.memory_space<vmem>>, vector<1x8x72xbf16>
    %298 = vector.shape_cast %297 : vector<1x8x72xbf16> to vector<8x72xbf16>
    %c4_i32_93 = arith.constant 4 : i32
    %299 = arith.muli %c4_i32_93, %arg1 : i32
    %c2_i32_94 = arith.constant 2 : i32
    %300 = arith.addi %299, %c2_i32_94 : i32
    %c1_i32_95 = arith.constant 1 : i32
    %301 = arith.addi %300, %c1_i32_95 : i32
    %302 = arith.index_cast %301 : i32 to index
    %c0_96 = arith.constant 0 : index
    %c0_97 = arith.constant 0 : index
    %303 = vector.load %arg9[%302, %c0_96, %c0_97] : memref<8x8x1xf32, #tpu.memory_space<vmem>>, vector<1x8x1xf32>
    %304 = vector.shape_cast %303 : vector<1x8x1xf32> to vector<8x1xf32>
    %305 = vector.extract_strided_slice %290 {offsets = [0, 0], sizes = [8, 384], strides = [1, 1]} : vector<8x512xbf16> to vector<8x384xbf16>
    %306 = vector.extract_strided_slice %292 {offsets = [0, 0], sizes = [8, 384], strides = [1, 1]} : vector<8x512xbf16> to vector<8x384xbf16>
    %307 = tpu.concatenate %305, %306 in 1 : vector<8x384xbf16>, vector<8x384xbf16> -> vector<8x768xbf16>
    %308 = vector.extract_strided_slice %290 {offsets = [0, 1], sizes = [8, 384], strides = [1, 1]} : vector<8x512xbf16> to vector<8x384xbf16>
    %309 = vector.extract_strided_slice %292 {offsets = [0, 1], sizes = [8, 384], strides = [1, 1]} : vector<8x512xbf16> to vector<8x384xbf16>
    %310 = tpu.concatenate %308, %309 in 1 : vector<8x384xbf16>, vector<8x384xbf16> -> vector<8x768xbf16>
    %311 = vector.extract_strided_slice %290 {offsets = [0, 2], sizes = [8, 384], strides = [1, 1]} : vector<8x512xbf16> to vector<8x384xbf16>
    %312 = vector.extract_strided_slice %292 {offsets = [0, 2], sizes = [8, 384], strides = [1, 1]} : vector<8x512xbf16> to vector<8x384xbf16>
    %313 = tpu.concatenate %311, %312 in 1 : vector<8x384xbf16>, vector<8x384xbf16> -> vector<8x768xbf16>
    %314 = vector.extract_strided_slice %290 {offsets = [0, 18], sizes = [8, 384], strides = [1, 1]} : vector<8x512xbf16> to vector<8x384xbf16>
    %315 = vector.extract_strided_slice %292 {offsets = [0, 18], sizes = [8, 384], strides = [1, 1]} : vector<8x512xbf16> to vector<8x384xbf16>
    %316 = tpu.concatenate %314, %315 in 1 : vector<8x384xbf16>, vector<8x384xbf16> -> vector<8x768xbf16>
    %317 = vector.extract_strided_slice %290 {offsets = [0, 19], sizes = [8, 384], strides = [1, 1]} : vector<8x512xbf16> to vector<8x384xbf16>
    %318 = vector.extract_strided_slice %292 {offsets = [0, 19], sizes = [8, 384], strides = [1, 1]} : vector<8x512xbf16> to vector<8x384xbf16>
    %319 = tpu.concatenate %317, %318 in 1 : vector<8x384xbf16>, vector<8x384xbf16> -> vector<8x768xbf16>
    %320 = vector.extract_strided_slice %290 {offsets = [0, 20], sizes = [8, 384], strides = [1, 1]} : vector<8x512xbf16> to vector<8x384xbf16>
    %321 = vector.extract_strided_slice %292 {offsets = [0, 20], sizes = [8, 384], strides = [1, 1]} : vector<8x512xbf16> to vector<8x384xbf16>
    %322 = tpu.concatenate %320, %321 in 1 : vector<8x384xbf16>, vector<8x384xbf16> -> vector<8x768xbf16>
    %323 = vector.extract_strided_slice %290 {offsets = [0, 36], sizes = [8, 384], strides = [1, 1]} : vector<8x512xbf16> to vector<8x384xbf16>
    %324 = vector.extract_strided_slice %292 {offsets = [0, 36], sizes = [8, 384], strides = [1, 1]} : vector<8x512xbf16> to vector<8x384xbf16>
    %325 = tpu.concatenate %323, %324 in 1 : vector<8x384xbf16>, vector<8x384xbf16> -> vector<8x768xbf16>
    %326 = vector.extract_strided_slice %290 {offsets = [0, 37], sizes = [8, 384], strides = [1, 1]} : vector<8x512xbf16> to vector<8x384xbf16>
    %327 = vector.extract_strided_slice %292 {offsets = [0, 37], sizes = [8, 384], strides = [1, 1]} : vector<8x512xbf16> to vector<8x384xbf16>
    %328 = tpu.concatenate %326, %327 in 1 : vector<8x384xbf16>, vector<8x384xbf16> -> vector<8x768xbf16>
    %329 = vector.extract_strided_slice %290 {offsets = [0, 38], sizes = [8, 384], strides = [1, 1]} : vector<8x512xbf16> to vector<8x384xbf16>
    %330 = vector.extract_strided_slice %292 {offsets = [0, 38], sizes = [8, 384], strides = [1, 1]} : vector<8x512xbf16> to vector<8x384xbf16>
    %331 = tpu.concatenate %329, %330 in 1 : vector<8x384xbf16>, vector<8x384xbf16> -> vector<8x768xbf16>
    %332 = tpu.concatenate %307, %310, %313, %316, %319, %322, %325, %328, %331 in 0 : vector<8x768xbf16>, vector<8x768xbf16>, vector<8x768xbf16>, vector<8x768xbf16>, vector<8x768xbf16>, vector<8x768xbf16>, vector<8x768xbf16>, vector<8x768xbf16>, vector<8x768xbf16> -> vector<72x768xbf16>
    %cst_98 = arith.constant dense<0.000000e+00> : vector<8x768xf32>
    %333 = tpu.matmul %298, %332, %cst_98 {dimension_numbers = #tpu.dot_dimension_numbers<[1], [0], [0], [1], [0, 0, 1, 1], [], []>} : vector<8x72xbf16>, vector<72x768xbf16>, vector<8x768xf32> -> vector<8x768xf32>
    %334 = vector.broadcast %304 : vector<8x1xf32> to vector<8x768xf32>
    %335 = arith.addf %333, %334 : vector<8x768xf32>
    %336 = vector.broadcast %3 : vector<1x768xf32> to vector<8x768xf32>
    %337 = arith.mulf %335, %336 : vector<8x768xf32>
    %c0_99 = arith.constant 0 : index
    %c0_100 = arith.constant 0 : index
    %c19_101 = arith.constant 19 : index
    %338 = vector.load %arg11[%c0_99, %c0_100, %c19_101] : memref<2x8x512xf32, #tpu.memory_space<vmem>>, vector<1x8x384xf32>
    %339 = vector.shape_cast %338 : vector<1x8x384xf32> to vector<8x384xf32>
    %340 = vector.extract_strided_slice %337 {offsets = [0, 0], sizes = [8, 384], strides = [1, 1]} : vector<8x768xf32> to vector<8x384xf32>
    %341 = arith.addf %339, %340 : vector<8x384xf32>
    %c0_102 = arith.constant 0 : index
    %c0_103 = arith.constant 0 : index
    %c19_104 = arith.constant 19 : index
    %342 = vector.load %arg10[%c0_102, %c0_103, %c19_104] : memref<2x8x512xf32, #tpu.memory_space<vmem>>, vector<1x8x384xf32>
    %343 = vector.shape_cast %342 : vector<1x8x384xf32> to vector<8x384xf32>
    %344 = vector.shape_cast %341 : vector<8x384xf32> to vector<1x8x384xf32>
    tpu.vector_store %arg10[%c0_102, %c0_103, %c19_104], %344 {strides = array<i32>} : memref<2x8x512xf32, #tpu.memory_space<vmem>>, vector<1x8x384xf32>,
    %c1_105 = arith.constant 1 : index
    %c0_106 = arith.constant 0 : index
    %c19_107 = arith.constant 19 : index
    %345 = vector.load %arg11[%c1_105, %c0_106, %c19_107] : memref<2x8x512xf32, #tpu.memory_space<vmem>>, vector<1x8x384xf32>
    %346 = vector.shape_cast %345 : vector<1x8x384xf32> to vector<8x384xf32>
    %347 = vector.extract_strided_slice %337 {offsets = [0, 384], sizes = [8, 384], strides = [1, 1]} : vector<8x768xf32> to vector<8x384xf32>
    %348 = arith.addf %346, %347 : vector<8x384xf32>
    %c1_108 = arith.constant 1 : index
    %c0_109 = arith.constant 0 : index
    %c19_110 = arith.constant 19 : index
    %349 = vector.load %arg10[%c1_108, %c0_109, %c19_110] : memref<2x8x512xf32, #tpu.memory_space<vmem>>, vector<1x8x384xf32>
    %350 = vector.shape_cast %349 : vector<1x8x384xf32> to vector<8x384xf32>
    %351 = vector.shape_cast %348 : vector<8x384xf32> to vector<1x8x384xf32>
    tpu.vector_store %arg10[%c1_108, %c0_109, %c19_110], %351 {strides = array<i32>} : memref<2x8x512xf32, #tpu.memory_space<vmem>>, vector<1x8x384xf32>,
    return
  }
  func.func @transform_0(%arg0: i32, %arg1: i32) -> (i32, i32, i32) {
    %c0_i32 = arith.constant 0 : i32
    %c0_i32_0 = arith.constant 0 : i32
    %c0_i32_1 = arith.constant 0 : i32
    return %arg0, %c0_i32, %c0_i32_0 : i32, i32, i32
  }
  func.func @transform_1(%arg0: i32, %arg1: i32) -> (i32, i32, i32) {
    %c0_i32 = arith.constant 0 : i32
    %c0_i32_0 = arith.constant 0 : i32
    %c0_i32_1 = arith.constant 0 : i32
    return %arg0, %c0_i32, %c0_i32_0 : i32, i32, i32
  }
  func.func @transform_2(%arg0: i32, %arg1: i32) -> (i32, i32) {
    %c0_i32 = arith.constant 0 : i32
    %c0_i32_0 = arith.constant 0 : i32
    %c0_i32_1 = arith.constant 0 : i32
    return %c0_i32, %c0_i32_0 : i32, i32
  }
  func.func @transform_3(%arg0: i32, %arg1: i32) -> (i32, i32) {
    %c0_i32 = arith.constant 0 : i32
    %c0_i32_0 = arith.constant 0 : i32
    %c0_i32_1 = arith.constant 0 : i32
    return %c0_i32, %c0_i32_0 : i32, i32
  }
  func.func @transform_4(%arg0: i32, %arg1: i32) -> (i32, i32, i32) {
    %c0_i32 = arith.constant 0 : i32
    %c0_i32_0 = arith.constant 0 : i32
    %c0_i32_1 = arith.constant 0 : i32
    %c0_i32_2 = arith.constant 0 : i32
    return %c0_i32, %c0_i32_0, %c0_i32_1 : i32, i32, i32
  }
  func.func @transform_5(%arg0: i32, %arg1: i32) -> (i32, i32, i32) {
    %c0_i32 = arith.constant 0 : i32
    %c0_i32_0 = arith.constant 0 : i32
    %c0_i32_1 = arith.constant 0 : i32
    %c0_i32_2 = arith.constant 0 : i32
    return %c0_i32, %c0_i32_0, %c0_i32_1 : i32, i32, i32
  }
  func.func @transform_6(%arg0: i32, %arg1: i32) -> (i32, i32, i32) {
    %c0_i32 = arith.constant 0 : i32
    %c0_i32_0 = arith.constant 0 : i32
    %c0_i32_1 = arith.constant 0 : i32
    %c0_i32_2 = arith.constant 0 : i32
    return %c0_i32, %c0_i32_0, %c0_i32_1 : i32, i32, i32
  }
  func.func @transform_7(%arg0: i32, %arg1: i32) -> (i32, i32, i32) {
    %c0_i32 = arith.constant 0 : i32
    %c0_i32_0 = arith.constant 0 : i32
    %c0_i32_1 = arith.constant 0 : i32
    %c0_i32_2 = arith.constant 0 : i32
    return %c0_i32, %c0_i32_0, %c0_i32_1 : i32, i32, i32
  }
  func.func @transform_8(%arg0: i32, %arg1: i32) -> (i32, i32, i32) {
    %c0_i32 = arith.constant 0 : i32
    %c0_i32_0 = arith.constant 0 : i32
    %c0_i32_1 = arith.constant 0 : i32
    return %arg0, %c0_i32, %c0_i32_0 : i32, i32, i32
  }
}

</mosaic_0001>

<bundles_post_ra>
// kernel: dun_mask_forward.1
= control target key start
LH: loop header
LB: loop body
LE: loop exit
PB: predicated region body
PF: predicated region fallthrough
CT: control target
= control target key end

     0   :  { %s5248_s27 = smov 0   ;;  %s5250_s28 = smov 0   ;;  %s8399_s0 = inlined_call_operand.vmem [shape: f32[4,8,512], index: 0, kind: input, shape index: {}]   ;;  %s8400_s1 = inlined_call_operand.vmem [shape: f32[4,1,512], index: 1, kind: input, shape index: {}]   ;;  %s8401_s2 = inlined_call_operand.vmem [shape: f32[384,512], index: 2, kind: input, shape index: {}]   ;;  %s8402_s3 = inlined_call_operand.vmem [shape: f32[1,768], index: 3, kind: input, shape index: {}]   ;;  %s8403_s4 = inlined_call_operand.vmem [shape: bf16[2,1,72], index: 4, kind: input, shape index: {}]   ;;  %s8404_s5 = inlined_call_operand.vmem [shape: bf16[2,8,9], index: 5, kind: input, shape index: {}]   ;;  %s8405_s6 = inlined_call_operand.vmem [shape: bf16[8,8,72], index: 6, kind: input, shape index: {}]   ;;  %s8406_s7 = inlined_call_operand.vmem [shape: f32[8,8,1], index: 7, kind: input, shape index: {}]   ;;  %s8407_s8 = inlined_call_operand.vmem [shape: f32[4,8,512], index: 8, kind: output, shape index: {}]  }
   0x1   :  { %s5252_s29 = smov 0   ;;  %s5254_s30 = smov 0  }
   0x2   :  { %s5256_s9 = smov 0  }
   0x3 LB: > { %s27_s10 = sadd.s32 1, %s5180_s29  ;;  %s30_s11 = sadd.s32 1, %s5184_s30  ;;  %s5188_s9 = sphi %s5256_s9, %s18_s9   ;;  %s5184_s30 = sphi %s5254_s30, %s8663_s30   ;;  %s5180_s29 = sphi %s5252_s29, %s8662_s29   ;;  %s5176_s28 = sphi %s5250_s28, %s8661_s28   ;;  %s5172_s27 = sphi %s5248_s27, %s8660_s27  }
   0x4   : > { %p28_p0 = scmp.ge.s32.totalorder %s27_s10, 2  ;;  %p4605_p1 = scmp.ge.s32.totalorder %s5188_s9, 1 }
   0x5   : > { %p287_p2 = scmp.lt.s32.totalorder %s5188_s9, 5 }
   0x6   : > { %s8665_s10 = smov (%p28_p0, %s27_s10), 0  ;;  %s8667_s11 = smov (!%p28_p0, %s30_s11), %s5184_s30 }
   0x7   : > { %p288_p3 = pnand %p4605_p1, %p287_p2  ;;  %p32_p4 = scmp.ge.s32.totalorder %s8667_s11, 2 }
   0x9   : > { %s8669_s11 = smov (%p32_p4, %s8667_s11), 0  ;;  %291 = sbr.rel (%p288_p3) target bundleno = 3552 (0xde0), region = 52 }
  0x10   : > { %s4606_s12 = sshll.u32 %s5176_s28, 1  ;;  %p4614_p6 = scmp.ne.s32.totalorder %s5172_s27, 0 }
  0x11   : > { %p329_p5 = scmp.lt.s32.totalorder %s4606_s12, 3  ;;  %v5190_v6 = vmov (!%p4614_p6), 0.0  }
  0x12   : > { %352 = sbr.rel (%p4614_p6) target bundleno = 27 (0x1b), region = 56  ;;  %369 = vst [vmem:[#allocation2] sm:$0xff] (!%p4614_p6), %v5190_v6  ;;  %370 = vst [vmem:[#allocation2 + $0x8] sm:$0xff] (!%p4614_p6), %v5190_v6 }
  0x13   : > { %s8671_s12 = smov (!%p329_p5, %s4606_s12), 3  ;;  %371 = vst [vmem:[#allocation2 + $0x10] sm:$0xff] (!%p4614_p6), %v5190_v6  ;;  %372 = vst [vmem:[#allocation2 + $0x18] sm:$0xff] (!%p4614_p6), %v5190_v6 }
  0x14   : > { %s4685_s13 = sshll.u32 %s8671_s12, 5  ;;  %s4610_s14 = sshll.u32 %s8671_s12, 2  ;;  %373 = vst [vmem:[#allocation2 + $0x20] sm:$0xff] (!%p4614_p6), %v5190_v6  ;;  %374 = vst [vmem:[#allocation2 + $0x28] sm:$0xff] (!%p4614_p6), %v5190_v6 }
  0x15   : > { %s333_s17 = scalar_lea.vmem %s8399_s0, %s4685_s13  ;;  %s5286_s20 = scalar_lea.vmem %s8400_s1, %s4610_s14  ;;  %375 = vst [vmem:[#allocation2 + $0x30] sm:$0xff] (!%p4614_p6), %v5190_v6  ;;  %376 = vst [vmem:[#allocation2 + $0x38] sm:$0xff] (!%p4614_p6), %v5190_v6 }
  0x16   : > { %s5291_s23 = scalar_lea.vmem %s8407_s8, %s4685_s13  ;;  %v353_v0 = vld [vmem:[%s333_s17] sm:$0xff] (!%p4614_p6)  ;;  %v354_v1 = vld [vmem:[%s333_s17 + $0x8] sm:$0xff] (!%p4614_p6)  ;;  %v355_v2 = vld [vmem:[%s333_s17 + $0x10] sm:$0xff] (!%p4614_p6) }
  0x17   : > { %361 = vst [vmem:[%s5291_s23] sm:$0xff] (!%p4614_p6), %v353_v0  ;;  %362 = vst [vmem:[%s5291_s23 + $0x8] sm:$0xff] (!%p4614_p6), %v354_v1  ;;  %v356_v3 = vld [vmem:[%s333_s17 + $0x18] sm:$0xff] (!%p4614_p6)  ;;  %v357_v4 = vld [vmem:[%s333_s17 + $0x20] sm:$0xff] (!%p4614_p6) }
  0x18   : > { %363 = vst [vmem:[%s5291_s23 + $0x10] sm:$0xff] (!%p4614_p6), %v355_v2  ;;  %v358_v5 = vld [vmem:[%s333_s17 + $0x28] sm:$0xff] (!%p4614_p6)  ;;  %364 = vst [vmem:[%s5291_s23 + $0x18] sm:$0xff] (!%p4614_p6), %v356_v3  ;;  %v359_v7 = vld [vmem:[%s333_s17 + $0x30] sm:$0xff] (!%p4614_p6) }
  0x19   : > { %365 = vst [vmem:[%s5291_s23 + $0x20] sm:$0xff] %v357_v4  ;;  %366 = vst [vmem:[%s5291_s23 + $0x28] sm:$0xff] %v358_v5  ;;  %v360_v8 = vld [vmem:[%s333_s17 + $0x38] sm:$0xff] }
  0x1a   : > { %367 = vst [vmem:[%s5291_s23 + $0x30] sm:$0xff] %v359_v7  ;;  %368 = vst [vmem:[%s5291_s23 + $0x38] sm:$0xff] %v360_v8 }
  0x1b PF: > { %s5191_s24 = smov 127   ;;  %s5192_s25 = smov 110   ;;  %v8416_v20 = vmov 0   ;;  %vm411_vm0 = vcmask 1039360   ;;  %vm461_vm1 = vcmask 900096   ;;  %vm615_vm2 = vcmask 1043456  }
  0x1c   : > { %s8449_s26 = smov 126   ;;  %s8434_s28 = smov 108   ;;  %766 = vmatprep.mubr.bf16.mxu0 %v8416_v20  ;;  %807 = vmatprep.mubr.bf16.mxu1 %v8416_v20  ;;  %vm8476_vm3 = vcmask 1031168   ;;  %vm8475_vm4 = vcmask 883712   ;;  %vm484_vm5 = vcmask 891904   ;;  %vm553_vm6 = vcmask 744448  }
  0x1d   : > { %s8412_s12 = smov 109   ;;  %s8414_s13 = smov 91   ;;  %5140 = vset.pattern.permute.xlu0 %v8416_v20  ;;  %5141 = vset.pattern.permute.xlu1 %v8416_v20  ;;  %vm530_vm7 = vcmask 752640   ;;  %vm576_vm8 = vcmask 736256   ;;  %vm8474_vm9 = vcmask 588800   ;;  %vm2037_vm10 = vcmask 1040384  }
  0x1e   : > { %s8408_s14 = smov 92   ;;  %s8410_s15 = smov 90   ;;  %vm2038_vm11 = vsmask.f32 256  ;;  %vm2170_vm12 = vcmask 1044480   ;;  %vm2071_vm13 = vcmask 1041408  }
  0x1f   : > { %s378_s18 = scalar_lea.vmem %s8403_s4, %s5172_s27  ;;  %vm2072_vm14 = vsmask.f32 1280  ;;  %vm2105_vm15 = vcmask 1042432   ;;  %s5202_s17 = smov 19  }
  0x20   : > { %v384_v9 = vld [vmem:[%s5291_s23 + $0x8] sm:$0xff]  ;;  %v383_v10 = vld [vmem:[%s5291_s23] sm:$0xff]  ;;  %s4687_s22 = sshll.u32 %s5172_s27, 4 }
  0x21   : > { %v385_v11 = vld [vmem:[%s5291_s23 + $0x10] sm:$0xff]  ;;  %v5305_v12 = vpack.c.bf16 %v384_v9, %v384_v9  ;;  %v5307_v13 = vpack.c.bf16 %v383_v10, %v383_v10  ;;  %v386_v19 = vld [vmem:[%s5291_s23 + $0x18] sm:$0xff]  ;;  %s7253_s19 = scalar_lea.vmem %s8405_s6, %s4687_s22 }
  0x22   : > { %v5313_v14 = vpack.c.bf16 %v385_v11, %v385_v11  ;;  %v387_v15 = vld [vmem:[%s5291_s23 + $0x20] sm:$0xff]  ;;  %v388_v16 = vld [vmem:[%s5291_s23 + $0x28] sm:$0xff]  ;;  %v394_v21 = vpack.c.bf16 %v386_v19, %v386_v19  ;;  %v389_v22 = vld [vmem:[%s5291_s23 + $0x30] sm:$0xff] }
  0x23   : > { %405 = vrot.lane.b32.xlu0 %v5305_v12, %s5191_s24  ;;  %403 = vrot.lane.b32.xlu1 %v5307_v13, %s5191_s24  ;;  %v5361_v17 = vpack.c.bf16 %v387_v15, %v387_v15  ;;  %v5363_v18 = vpack.c.bf16 %v388_v16, %v388_v16  ;;  %v390_v23 = vld [vmem:[%s5291_s23 + $0x38] sm:$0xff]  ;;  %v5412_v24 = vpack.c.bf16 %v389_v22, %v389_v22 }
  0x24   : > { %v398_v25 = vpack.c.bf16 %v390_v23, %v390_v23  ;;  %v5494_v23 = vld [vmem:[%s378_s18] sm:$0x1]  ;;  %s4688_s18 = sshll.u32 %s5172_s27, 5 }
  0x25   : > { %s7171_s21 = scalar_lea.vmem %s8406_s7, %s4688_s18 }
  0x27   : > { %407 = vrot.lane.b32.xlu0 %v5313_v14, %s5191_s24  ;;  %455 = vrot.lane.b32.xlu1 %v5305_v12, %s5192_s25 }
  0x2b   : > { %457 = vrot.lane.b32.xlu0 %v5313_v14, %s5192_s25  ;;  %453 = vrot.lane.b32.xlu1 %v5307_v13, %s5192_s25 }
  0x2f   : > { %432 = vrot.lane.b32.xlu0 %v5305_v12, %s8449_s26  ;;  %434 = vrot.lane.b32.xlu1 %v5313_v14, %s8449_s26 }
  0x33   : > { %430 = vrot.lane.b32.xlu0 %v5307_v13, %s8449_s26  ;;  %501 = vrot.lane.b32.xlu1 %v5305_v12, %s8434_s28 }
  0x37   : > { %503 = vrot.lane.b32.xlu0 %v5313_v14, %s8434_s28  ;;  %499 = vrot.lane.b32.xlu1 %v5307_v13, %s8434_s28 }
  0x3b   : > { %478 = vrot.lane.b32.xlu0 %v5305_v12, %s8412_s12  ;;  %480 = vrot.lane.b32.xlu1 %v5313_v14, %s8412_s12 }
  0x3f   : > { %476 = vrot.lane.b32.xlu0 %v5307_v13, %s8412_s12  ;;  %547 = vrot.lane.b32.xlu1 %v5305_v12, %s8414_s13 }
  0x43   : > { %549 = vrot.lane.b32.xlu0 %v5313_v14, %s8414_s13  ;;  %545 = vrot.lane.b32.xlu1 %v5307_v13, %s8414_s13 }
  0x47   : > { %524 = vrot.lane.b32.xlu0 %v5305_v12, %s8408_s14  ;;  %526 = vrot.lane.b32.xlu1 %v5313_v14, %s8408_s14 }
  0x4b   : > { %522 = vrot.lane.b32.xlu0 %v5307_v13, %s8408_s14  ;;  %568 = vrot.lane.b32.xlu1 %v5307_v13, %s8410_s15 }
  0x4f   : > { %570 = vrot.lane.b32.xlu0 %v5305_v12, %s8410_s15  ;;  %572 = vrot.lane.b32.xlu1 %v5313_v14, %s8410_s15 }
  0x53   : > { %419 = vrot.lane.b32.xlu0 %v5361_v17, %s5191_s24  ;;  %421 = vrot.lane.b32.xlu1 %v5363_v18, %s5191_s24 }
  0x57   : > { %409 = vrot.lane.b32.xlu0 %v394_v21, %s5191_s24  ;;  %465 = vrot.lane.b32.xlu1 %v5361_v17, %s5192_s25 }
  0x5b   : > { %467 = vrot.lane.b32.xlu0 %v5363_v18, %s5192_s25  ;;  %459 = vrot.lane.b32.xlu1 %v394_v21, %s5192_s25 }
  0x5f   : > { %442 = vrot.lane.b32.xlu0 %v5361_v17, %s8449_s26  ;;  %444 = vrot.lane.b32.xlu1 %v5363_v18, %s8449_s26 }
  0x63   : > { %436 = vrot.lane.b32.xlu0 %v394_v21, %s8449_s26  ;;  %511 = vrot.lane.b32.xlu1 %v5361_v17, %s8434_s28 }
  0x67   : > { %513 = vrot.lane.b32.xlu0 %v5363_v18, %s8434_s28  ;;  %505 = vrot.lane.b32.xlu1 %v394_v21, %s8434_s28 }
  0x6b   : > { %488 = vrot.lane.b32.xlu0 %v5361_v17, %s8412_s12  ;;  %490 = vrot.lane.b32.xlu1 %v5363_v18, %s8412_s12 }
  0x6f   : > { %482 = vrot.lane.b32.xlu0 %v394_v21, %s8412_s12  ;;  %557 = vrot.lane.b32.xlu1 %v5361_v17, %s8414_s13 }
  0x73   : > { %559 = vrot.lane.b32.xlu0 %v5363_v18, %s8414_s13  ;;  %551 = vrot.lane.b32.xlu1 %v394_v21, %s8414_s13 }
  0x77   : > { %534 = vrot.lane.b32.xlu0 %v5361_v17, %s8408_s14  ;;  %536 = vrot.lane.b32.xlu1 %v5363_v18, %s8408_s14 }
  0x7b   : > { %528 = vrot.lane.b32.xlu0 %v394_v21, %s8408_s14  ;;  %574 = vrot.lane.b32.xlu1 %v394_v21, %s8410_s15 }
  0x7f   : > { %580 = vrot.lane.b32.xlu0 %v5361_v17, %s8410_s15  ;;  %582 = vrot.lane.b32.xlu1 %v5363_v18, %s8410_s15 }
  0x83   : > { %423 = vrot.lane.b32.xlu0 %v5412_v24, %s5191_s24  ;;  %425 = vrot.lane.b32.xlu1 %v398_v25, %s5191_s24 }
  0x87   : > { %469 = vrot.lane.b32.xlu0 %v5412_v24, %s5192_s25  ;;  %471 = vrot.lane.b32.xlu1 %v398_v25, %s5192_s25 }
  0x8b   : > { %446 = vrot.lane.b32.xlu0 %v5412_v24, %s8449_s26  ;;  %448 = vrot.lane.b32.xlu1 %v398_v25, %s8449_s26  ;;  %s8580_s26 = smov 109  }
  0x8f   : > { %515 = vrot.lane.b32.xlu0 %v5412_v24, %s8434_s28  ;;  %517 = vrot.lane.b32.xlu1 %v398_v25, %s8434_s28  ;;  %s8579_s28 = smov 91  }
  0x93   : > { %492 = vrot.lane.b32.xlu0 %v5412_v24, %s8412_s12  ;;  %494 = vrot.lane.b32.xlu1 %v398_v25, %s8412_s12  ;;  %s8581_s12 = smov 90  }
  0x95   : > { %v406_v26 = vpop.permute.xlu0 %405  ;;  %v404_v27 = vpop.permute.xlu1 %403 }
  0x96   : > { %v412_v28 = vsel %vm411_vm0, %v404_v27, %v406_v26 }
  0x97   : > { %561 = vrot.lane.b32.xlu0 %v5412_v24, %s8414_s13  ;;  %563 = vrot.lane.b32.xlu1 %v398_v25, %s8414_s13  ;;  %v591_v31 = vrot.slane %v412_v28, 4  ;;  %s8582_s13 = smov 92  }
  0x99   : > { %v5433_v29 = vpop.permute.xlu0 %407  ;;  %v456_v30 = vpop.permute.xlu1 %455  ;;  %v618_v38 = vsel %vm615_vm2, %v5307_v13, %v591_v31 }
  0x9a   : > { %v413_v32 = vsel %vm411_vm0, %v406_v26, %v5433_v29 }
  0x9b   : > { %v592_v33 = vrot.slane %v413_v32, 4  ;;  %538 = vrot.lane.b32.xlu0 %v5412_v24, %s8408_s14  ;;  %540 = vrot.lane.b32.xlu1 %v398_v25, %s8408_s14  ;;  %s8576_s14 = smov 126  }
  0x9d   : > { %v5440_v34 = vpop.permute.xlu0 %457  ;;  %v454_v35 = vpop.permute.xlu1 %453  ;;  %v622_v36 = vsel %vm615_vm2, %v5305_v12, %v592_v33 }
  0x9e   : > { %v463_v37 = vsel %vm461_vm1, %v456_v30, %v5440_v34  ;;  %734 = vmatprep.subr.bf16.mxu0 %v622_v36  ;;  %v462_v42 = vsel %vm461_vm1, %v454_v35, %v456_v30 }
  0x9f   : > { %584 = vrot.lane.b32.xlu0 %v5412_v24, %s8410_s15  ;;  %735 = vmatpush1.bf16.msra.mxu0 %v618_v38  ;;  %v598_v39 = vrot.slane %v463_v37, 4  ;;  %v597_v45 = vrot.slane %v462_v42, 4 }
  0xa0   : > { %586 = vrot.lane.b32.xlu1 %v398_v25, %s8410_s15  ;;  %s8577_s15 = smov 108  }
  0xa1   : > { %v433_v40 = vpop.permute.xlu0 %432  ;;  %v5451_v41 = vpop.permute.xlu1 %434 }
  0xa2   : > { %v440_v43 = vsel %vm8476_vm3, %v433_v40, %v5451_v41 }
  0xa3   : > { %v646_v44 = vsel %vm615_vm2, %v440_v43, %v598_v39 }
  0xa4   : > { %736 = vmatprep.subr.bf16.mxu0 %v646_v44 }
  0xa5   : > { %v431_v46 = vpop.permute.xlu0 %430  ;;  %v502_v47 = vpop.permute.xlu1 %501 }
  0xa6   : > { %v439_v48 = vsel %vm8476_vm3, %v431_v46, %v433_v40 }
  0xa7   : > { %v642_v49 = vsel %vm615_vm2, %v439_v48, %v597_v45 }
  0xa8   : > { %737 = vmatpush1.bf16.msra.mxu0 %v642_v49 }
  0xa9   : > { %v5459_v50 = vpop.permute.xlu0 %503  ;;  %v500_v51 = vpop.permute.xlu1 %499 }
  0xaa   : > { %v509_v52 = vsel %vm8475_vm4, %v502_v47, %v5459_v50  ;;  %v508_v56 = vsel %vm8475_vm4, %v500_v51, %v502_v47 }
  0xab   : > { %v604_v53 = vrot.slane %v509_v52, 4  ;;  %v603_v59 = vrot.slane %v508_v56, 4 }
  0xad   : > { %v479_v54 = vpop.permute.xlu0 %478  ;;  %v5463_v55 = vpop.permute.xlu1 %480 }
  0xae   : > { %v486_v57 = vsel %vm484_vm5, %v479_v54, %v5463_v55 }
  0xaf   : > { %v670_v58 = vsel %vm615_vm2, %v486_v57, %v604_v53 }
  0xb0   : > { %738 = vmatprep.subr.bf16.mxu0 %v670_v58 }
  0xb1   : > { %v477_v60 = vpop.permute.xlu0 %476  ;;  %v548_v61 = vpop.permute.xlu1 %547 }
  0xb2   : > { %v485_v62 = vsel %vm484_vm5, %v477_v60, %v479_v54 }
  0xb3   : > { %v666_v63 = vsel %vm615_vm2, %v485_v62, %v603_v59 }
  0xb4   : > { %739 = vmatpush1.bf16.msra.mxu0 %v666_v63 }
  0xb5   : > { %v5471_v0 = vpop.permute.xlu0 %549  ;;  %v546_v1 = vpop.permute.xlu1 %545 }
  0xb6   : > { %v555_v2 = vsel %vm553_vm6, %v548_v61, %v5471_v0  ;;  %v554_v6 = vsel %vm553_vm6, %v546_v1, %v548_v61 }
  0xb7   : > { %v610_v3 = vrot.slane %v555_v2, 4  ;;  %v609_v9 = vrot.slane %v554_v6, 4 }
  0xb9   : > { %v525_v4 = vpop.permute.xlu0 %524  ;;  %v5475_v5 = vpop.permute.xlu1 %526 }
  0xba   : > { %v532_v7 = vsel %vm530_vm7, %v525_v4, %v5475_v5 }
  0xbb   : > { %v694_v8 = vsel %vm615_vm2, %v532_v7, %v610_v3 }
  0xbc   : > { %740 = vmatprep.subr.bf16.mxu0 %v694_v8 }
  0xbd   : > { %v523_v10 = vpop.permute.xlu0 %522  ;;  %v569_v11 = vpop.permute.xlu1 %568 }
  0xbe   : > { %v531_v12 = vsel %vm530_vm7, %v523_v10, %v525_v4 }
  0xbf   : > { %v690_v13 = vsel %vm615_vm2, %v531_v12, %v609_v9  ;;  %v895_v12 = vld [vmem:[%s8401_s2 + $0x8] sm:$0xff] }
  0xc0   : > { %741 = vmatpush1.bf16.msra.mxu0 %v690_v13 }
  0xc1   : > { %v571_v15 = vpop.permute.xlu0 %570  ;;  %v5483_v16 = vpop.permute.xlu1 %572 }
  0xc2   : > { %v578_v19 = vsel %vm576_vm8, %v571_v15, %v5483_v16  ;;  %v577_v21 = vsel %vm576_vm8, %v569_v11, %v571_v15 }
  0xc3   : > { %4616 = vmatprep.subr.msk.bf16.mxu0 %vm615_vm2, %v578_v19  ;;  %v717_v22 = vsel %vm615_vm2, %v577_v21, 0 }
  0xc4   : > { %743 = vmatpush1.bf16.msra.mxu0 %v717_v22 }
  0xc5   : > { %v420_v25 = vpop.permute.xlu0 %419  ;;  %v5496_v26 = vpop.permute.xlu1 %421 }
  0xc6   : > { %v427_v27 = vsel %vm411_vm0, %v420_v25, %v5496_v26  ;;  %v898_v25 = vld [vmem:[%s8401_s2 + $0x20] sm:$0xff] }
  0xc7   : > { %v594_v28 = vrot.slane %v427_v27, 4  ;;  %4617 = vmatmul.mubr.msk.bf16.vlgmr.msra.gmra.mrb[0].mxu0 %vm8474_vm9, %v5494_v23 }
  0xc8   : > { %848 = vmatprep.mubr.bf16.mxu0 %v8416_v20  ;;  %v996_v20 = vld [vmem:[%s8401_s2 + $0x330] sm:$0xff] }
  0xc9   : > { %v410_v30 = vpop.permute.xlu0 %409  ;;  %v466_v31 = vpop.permute.xlu1 %465  ;;  %v630_v32 = vsel %vm615_vm2, %v5361_v17, %v594_v28  ;;  %v907_v28 = vld [vmem:[%s8401_s2 + $0x68] sm:$0xff] }
  0xca   : > { %v414_v33 = vsel %vm411_vm0, %v5433_v29, %v410_v30  ;;  %775 = vmatprep.subr.bf16.mxu1 %v630_v32 }
  0xcb   : > { %v593_v35 = vrot.slane %v414_v33, 4 }
  0xcd   : > { %v5507_v36 = vpop.permute.xlu0 %467  ;;  %v460_v37 = vpop.permute.xlu1 %459  ;;  %v626_v38 = vsel %vm615_vm2, %v5313_v14, %v593_v35 }
  0xce   : > { %v473_v39 = vsel %vm461_vm1, %v466_v31, %v5507_v36  ;;  %776 = vmatpush1.bf16.msra.mxu1 %v626_v38  ;;  %v464_v17 = vsel %vm461_vm1, %v5440_v34, %v460_v37  ;;  %v902_v37 = vld [vmem:[%s8401_s2 + $0x40] sm:$0xff] }
  0xcf   : > { %v600_v40 = vrot.slane %v473_v39, 4  ;;  %v599_v45 = vrot.slane %v464_v17, 4  ;;  %v906_v38 = vld [vmem:[%s8401_s2 + $0x60] sm:$0xff]  ;;  %v915_v17 = vld [vmem:[%s8401_s2 + $0xa8] sm:$0xff] }
  0xd1   : > { %v443_v42 = vpop.permute.xlu0 %442  ;;  %v5513_v43 = vpop.permute.xlu1 %444 }
  0xd2   : > { %v450_v29 = vsel %vm8476_vm3, %v443_v42, %v5513_v43  ;;  %v911_v42 = vld [vmem:[%s8401_s2 + $0x88] sm:$0xff] }
  0xd3   : > { %v654_v44 = vsel %vm615_vm2, %v450_v29, %v600_v40 }
  0xd4   : > { %777 = vmatprep.subr.bf16.mxu1 %v654_v44 }
  0xd5   : > { %v437_v46 = vpop.permute.xlu0 %436  ;;  %v512_v14 = vpop.permute.xlu1 %511 }
  0xd6   : > { %v441_v47 = vsel %vm8476_vm3, %v5451_v41, %v437_v46 }
  0xd7   : > { %v650_v48 = vsel %vm615_vm2, %v441_v47, %v599_v45  ;;  %v5602_v45 = vpack.c.bf16 %v906_v38, %v902_v37  ;;  %v947_v37 = vld [vmem:[%s8401_s2 + $0x1a8] sm:$0xff] }
  0xd8   : > { %778 = vmatpush1.bf16.msra.mxu1 %v650_v48  ;;  %v5609_v48 = vpack.c.bf16 %v915_v17, %v911_v42 }
  0xd9   : > { %v5523_v49 = vpop.permute.xlu0 %513  ;;  %v506_v51 = vpop.permute.xlu1 %505 }
  0xda   : > { %v519_v34 = vsel %vm8475_vm4, %v512_v14, %v5523_v49  ;;  %v510_v56 = vsel %vm8475_vm4, %v5459_v50, %v506_v51  ;;  %v910_v51 = vld [vmem:[%s8401_s2 + $0x80] sm:$0xff] }
  0xdb   : > { %v606_v52 = vrot.slane %v519_v34, 4  ;;  %v605_v58 = vrot.slane %v510_v56, 4  ;;  %v914_v34 = vld [vmem:[%s8401_s2 + $0xa0] sm:$0xff] }
  0xdd   : > { %v489_v53 = vpop.permute.xlu0 %488  ;;  %v5527_v54 = vpop.permute.xlu1 %490 }
  0xde   : > { %v496_v57 = vsel %vm484_vm5, %v489_v53, %v5527_v54  ;;  %v923_v53 = vld [vmem:[%s8401_s2 + $0xe8] sm:$0xff] }
  0xdf   : > { %v678_v41 = vsel %vm615_vm2, %v496_v57, %v606_v52  ;;  %v5627_v57 = vpack.c.bf16 %v914_v34, %v910_v51 }
  0xe0   : > { %779 = vmatprep.subr.bf16.mxu1 %v678_v41 }
  0xe1   : > { %v483_v59 = vpop.permute.xlu0 %482  ;;  %v558_v60 = vpop.permute.xlu1 %557 }
  0xe2   : > { %v487_v61 = vsel %vm484_vm5, %v5463_v55, %v483_v59 }
  0xe3   : > { %v674_v62 = vsel %vm615_vm2, %v487_v61, %v605_v58  ;;  %v922_v61 = vld [vmem:[%s8401_s2 + $0xe0] sm:$0xff] }
  0xe4   : > { %780 = vmatpush1.bf16.msra.mxu1 %v674_v62 }
  0xe5   : > { %v5537_v63 = vpop.permute.xlu0 %559  ;;  %v552_v1 = vpop.permute.xlu1 %551 }
  0xe6   : > { %v565_v50 = vsel %vm553_vm6, %v558_v60, %v5537_v63  ;;  %v556_v6 = vsel %vm553_vm6, %v5471_v0, %v552_v1  ;;  %v899_v0 = vld [vmem:[%s8401_s2 + $0x28] sm:$0xff]  ;;  %v918_v60 = vld [vmem:[%s8401_s2 + $0xc0] sm:$0xff] }
  0xe7   : > { %v612_v2 = vrot.slane %v565_v50, 4  ;;  %v611_v8 = vrot.slane %v556_v6, 4  ;;  %v5561_v22 = vpack.c.bf16 %v899_v0, %v895_v12  ;;  %v927_v50 = vld [vmem:[%s8401_s2 + $0x108] sm:$0xff] }
  0xe8   : > { %v935_v0 = vld [vmem:[%s8401_s2 + $0x148] sm:$0xff] }
  0xe9   : > { %v535_v3 = vpop.permute.xlu0 %534  ;;  %v5541_v4 = vpop.permute.xlu1 %536 }
  0xea   : > { %v542_v7 = vsel %vm530_vm7, %v535_v3, %v5541_v4 }
  0xeb   : > { %v702_v55 = vsel %vm615_vm2, %v542_v7, %v612_v2  ;;  %v931_v2 = vld [vmem:[%s8401_s2 + $0x128] sm:$0xff]  ;;  %v5650_v7 = vpack.c.bf16 %v922_v61, %v918_v60 }
  0xec   : > { %781 = vmatprep.subr.bf16.mxu1 %v702_v55  ;;  %v963_v60 = vld [vmem:[%s8401_s2 + $0x228] sm:$0xff] }
  0xed   : > { %v529_v9 = vpop.permute.xlu0 %528  ;;  %v575_v10 = vpop.permute.xlu1 %574 }
  0xee   : > { %v533_v11 = vsel %vm530_vm7, %v5475_v5, %v529_v9  ;;  %v579_v15 = vsel %vm576_vm8, %v5483_v16, %v575_v10  ;;  %v894_v5 = vld [vmem:[%s8401_s2] sm:$0xff]  ;;  %v903_v16 = vld [vmem:[%s8401_s2 + $0x48] sm:$0xff] }
  0xef   : > { %v698_v13 = vsel %vm615_vm2, %v533_v11, %v611_v8  ;;  %v723_v30 = vsel %vm615_vm2, %v579_v15, 0  ;;  %v5579_v31 = vpack.c.bf16 %v898_v25, %v894_v5  ;;  %v5582_v35 = vpack.c.bf16 %v907_v28, %v903_v16  ;;  %v926_v9 = vld [vmem:[%s8401_s2 + $0x100] sm:$0xff] }
  0xf0   : > { %782 = vmatpush1.bf16.msra.mxu1 %v698_v13  ;;  %v5653_v8 = vpack.c.bf16 %v931_v2, %v927_v50  ;;  %v930_v10 = vld [vmem:[%s8401_s2 + $0x120] sm:$0xff]  ;;  %v939_v13 = vld [vmem:[%s8401_s2 + $0x168] sm:$0xff] }
  0xf1   : > { %v581_v19 = vpop.permute.xlu0 %580  ;;  %v5559_v21 = vpop.permute.xlu1 %582  ;;  %v934_v16 = vld [vmem:[%s8401_s2 + $0x140] sm:$0xff] }
  0xf2   : > { %v588_v27 = vsel %vm576_vm8, %v581_v19, %v5559_v21  ;;  %v5671_v19 = vpack.c.bf16 %v930_v10, %v926_v9  ;;  %v938_v28 = vld [vmem:[%s8401_s2 + $0x160] sm:$0xff] }
  0xf3   : > { %4618 = vmatprep.subr.msk.bf16.mxu1 %vm615_vm2, %v588_v27 }
  0xf4   : > { %784 = vmatpush1.bf16.msra.mxu1 %v723_v30 }
  0xf5   : > { %v424_v32 = vpop.permute.xlu0 %423  ;;  %v426_v33 = vpop.permute.xlu1 %425  ;;  %4696 = vmatprep.subr.bf16.mxu1 %v5561_v22 }
  0xf6   : > { %v428_v39 = vsel %vm411_vm0, %v5496_v26, %v424_v32  ;;  %v429_v40 = vsel %vm411_vm0, %v424_v32, %v426_v33  ;;  %v943_v33 = vld [vmem:[%s8401_s2 + $0x188] sm:$0xff] }
  0xf7   : > { %v595_v29 = vrot.slane %v428_v39, 4  ;;  %v596_v44 = vrot.slane %v429_v40, 4  ;;  %4619 = vmatmul.mubr.msk.bf16.vlgmr.msra.gmra.mrb[0].mxu1 %vm8474_vm9, %v5494_v23  ;;  %v5694_v40 = vpack.c.bf16 %v938_v28, %v934_v16  ;;  %v5697_v17 = vpack.c.bf16 %v947_v37, %v943_v33  ;;  %v904_v28 = vld [vmem:[%s8401_s2 + $0x50] sm:$0xff]  ;;  %v970_v33 = vld [vmem:[%s8401_s2 + $0x260] sm:$0xff] }
  0xf8   : > { %4698 = vmatpush1.bf16.msra.mxu1 %v5579_v31 }
  0xf9   : > { %v470_v26 = vpop.permute.xlu0 %469  ;;  %v472_v46 = vpop.permute.xlu1 %471  ;;  %v638_v14 = vsel %vm615_vm2, %v5412_v24, %v596_v44  ;;  %v634_v47 = vsel %vm615_vm2, %v5363_v18, %v595_v29  ;;  %4700 = vmatprep.subr.bf16.mxu1 %v5582_v35  ;;  %v919_v18 = vld [vmem:[%s8401_s2 + $0xc8] sm:$0xff]  ;;  %v942_v29 = vld [vmem:[%s8401_s2 + $0x180] sm:$0xff] }
  0xfa   : > { %v474_v52 = vsel %vm461_vm1, %v5507_v36, %v470_v26  ;;  %v475_v24 = vsel %vm461_vm1, %v470_v26, %v472_v46  ;;  %816 = vmatprep.subr.bf16.mxu0 %v638_v14  ;;  %v5630_v59 = vpack.c.bf16 %v923_v53, %v919_v18  ;;  %v946_v44 = vld [vmem:[%s8401_s2 + $0x1a0] sm:$0xff]  ;;  %v951_v14 = vld [vmem:[%s8401_s2 + $0x1c8] sm:$0xff] }
  0xfb   : > { %v602_v56 = vrot.slane %v475_v24, 4  ;;  %817 = vmatpush1.bf16.msra.mxu0 %v634_v47  ;;  %v601_v41 = vrot.slane %v474_v52, 4  ;;  %v955_v47 = vld [vmem:[%s8401_s2 + $0x1e8] sm:$0xff]  ;;  %v5715_v34 = vpack.c.bf16 %v946_v44, %v942_v29  ;;  %v950_v53 = vld [vmem:[%s8401_s2 + $0x1c0] sm:$0xff]  ;;  %v917_v29 = vld [vmem:[%s8401_s2 + $0xb8] sm:$0xff] }
  0xfc   : > { %4702 = vmatpush1.bf16.msra.mxu1 %v5602_v45 }
  0xfd   : > { %v447_v58 = vpop.permute.xlu0 %446  ;;  %v449_v36 = vpop.permute.xlu1 %448  ;;  %4704 = vmatprep.subr.bf16.mxu1 %v5609_v48 }
  0xfe   : > { %v451_v62 = vsel %vm8476_vm3, %v5513_v43, %v447_v58  ;;  %v452_v1 = vsel %vm8476_vm3, %v447_v58, %v449_v36  ;;  %v959_v36 = vld [vmem:[%s8401_s2 + $0x208] sm:$0xff] }
  0xff   : > { %v662_v3 = vsel %vm615_vm2, %v452_v1, %v602_v56  ;;  %v658_v6 = vsel %vm615_vm2, %v451_v62, %v601_v41  ;;  %v954_v56 = vld [vmem:[%s8401_s2 + $0x1e0] sm:$0xff]  ;;  %v897_v1 = vld [vmem:[%s8401_s2 + $0x18] sm:$0xff] }
 0x100   : > { %818 = vmatprep.subr.bf16.mxu0 %v662_v3  ;;  %4706 = vmatpush1.bf16.msra.mxu1 %v5627_v57  ;;  %v5744_v50 = vpack.c.bf16 %v954_v56, %v950_v53  ;;  %v896_v3 = vld [vmem:[%s8401_s2 + $0x10] sm:$0xff]  ;;  %v921_v53 = vld [vmem:[%s8401_s2 + $0xd8] sm:$0xff] }
 0x101   : > { %v516_v43 = vpop.permute.xlu0 %515  ;;  %v518_v55 = vpop.permute.xlu1 %517  ;;  %819 = vmatpush1.bf16.msra.mxu0 %v658_v6  ;;  %4708 = vmatprep.subr.bf16.mxu1 %v5630_v59  ;;  %v5750_v6 = vpack.c.bf16 %v963_v60, %v959_v36  ;;  %v925_v56 = vld [vmem:[%s8401_s2 + $0xf8] sm:$0xff]  ;;  %v920_v36 = vld [vmem:[%s8401_s2 + $0xd0] sm:$0xff] }
 0x102   : > { %v520_v11 = vsel %vm8475_vm4, %v5523_v49, %v516_v43  ;;  %v521_v12 = vsel %vm8475_vm4, %v516_v43, %v518_v55  ;;  %v5674_v49 = vpack.c.bf16 %v939_v13, %v935_v0  ;;  %v958_v43 = vld [vmem:[%s8401_s2 + $0x200] sm:$0xff]  ;;  %v967_v0 = vld [vmem:[%s8401_s2 + $0x248] sm:$0xff] }
 0x103   : > { %v608_v15 = vrot.slane %v521_v12, 4  ;;  %v607_v5 = vrot.slane %v520_v11, 4  ;;  %v962_v55 = vld [vmem:[%s8401_s2 + $0x220] sm:$0xff]  ;;  %v900_v12 = vld [vmem:[%s8401_s2 + $0x30] sm:$0xff]  ;;  %v971_v13 = vld [vmem:[%s8401_s2 + $0x268] sm:$0xff] }
 0x104   : > { %4710 = vmatpush1.bf16.msra.mxu1 %v5650_v7  ;;  %v5783_v16 = vpack.c.bf16 %v900_v12, %v896_v3  ;;  %v995_v3 = vld [vmem:[%s8401_s2 + $0x328] sm:$0xff]  ;;  %v928_v12 = vld [vmem:[%s8401_s2 + $0x110] sm:$0xff] }
 0x105   : > { %v493_v25 = vpop.permute.xlu0 %492  ;;  %v495_v27 = vpop.permute.xlu1 %494  ;;  %4712 = vmatprep.subr.bf16.mxu1 %v5653_v8 }
 0x106   : > { %v497_v30 = vsel %vm484_vm5, %v5527_v54, %v493_v25  ;;  %v498_v32 = vsel %vm484_vm5, %v493_v25, %v495_v27  ;;  %v909_v25 = vld [vmem:[%s8401_s2 + $0x78] sm:$0xff]  ;;  %v5781_v27 = vpack.c.bf16 %v962_v55, %v958_v43 }
 0x107   : > { %v686_v38 = vsel %vm615_vm2, %v498_v32, %v608_v15  ;;  %v682_v39 = vsel %vm615_vm2, %v497_v30, %v607_v5  ;;  %v5789_v30 = vpack.c.bf16 %v971_v13, %v967_v0  ;;  %v966_v32 = vld [vmem:[%s8401_s2 + $0x240] sm:$0xff]  ;;  %v929_v43 = vld [vmem:[%s8401_s2 + $0x118] sm:$0xff] }
 0x108   : > { %820 = vmatprep.subr.bf16.mxu0 %v686_v38  ;;  %4714 = vmatpush1.bf16.msra.mxu1 %v5671_v19  ;;  %v908_v38 = vld [vmem:[%s8401_s2 + $0x70] sm:$0xff]  ;;  %v5818_v44 = vpack.c.bf16 %v970_v33, %v966_v32  ;;  %v933_v55 = vld [vmem:[%s8401_s2 + $0x138] sm:$0xff]  ;;  %v990_v13 = vld [vmem:[%s8401_s2 + $0x300] sm:$0xff] }
 0x109   : > { %v562_v54 = vpop.permute.xlu0 %561  ;;  %v564_v42 = vpop.permute.xlu1 %563  ;;  %821 = vmatpush1.bf16.msra.mxu0 %v682_v39  ;;  %4716 = vmatprep.subr.bf16.mxu1 %v5674_v49  ;;  %v975_v39 = vld [vmem:[%s8401_s2 + $0x288] sm:$0xff]  ;;  %v937_v32 = vld [vmem:[%s8401_s2 + $0x158] sm:$0xff] }
 0x10a   : > { %v566_v26 = vsel %vm553_vm6, %v5537_v63, %v562_v54  ;;  %v567_v46 = vsel %vm553_vm6, %v562_v54, %v564_v42  ;;  %v5718_v63 = vpack.c.bf16 %v955_v47, %v951_v14  ;;  %v979_v54 = vld [vmem:[%s8401_s2 + $0x2a8] sm:$0xff]  ;;  %v913_v42 = vld [vmem:[%s8401_s2 + $0x98] sm:$0xff]  ;;  %v978_v47 = vld [vmem:[%s8401_s2 + $0x2a0] sm:$0xff] }
 0x10b   : > { %v614_v51 = vrot.slane %v567_v46, 4  ;;  %v613_v52 = vrot.slane %v566_v26, 4  ;;  %v5821_v26 = vpack.c.bf16 %v908_v38, %v904_v28  ;;  %v912_v46 = vld [vmem:[%s8401_s2 + $0x90] sm:$0xff]  ;;  %v5827_v14 = vpack.c.bf16 %v979_v54, %v975_v39  ;;  %v1003_v28 = vld [vmem:[%s8401_s2 + $0x368] sm:$0xff]  ;;  %v941_v33 = vld [vmem:[%s8401_s2 + $0x178] sm:$0xff] }
 0x10c   : > { %4718 = vmatpush1.bf16.msra.mxu1 %v5694_v40  ;;  %v936_v54 = vld [vmem:[%s8401_s2 + $0x150] sm:$0xff] }
 0x10d   : > { %v539_v24 = vpop.permute.xlu0 %538  ;;  %v541_v18 = vpop.permute.xlu1 %540  ;;  %4720 = vmatprep.subr.bf16.mxu1 %v5697_v17 }
 0x10e   : > { %v543_v41 = vsel %vm530_vm7, %v5541_v4, %v539_v24  ;;  %v544_v58 = vsel %vm530_vm7, %v539_v24, %v541_v18  ;;  %v901_v4 = vld [vmem:[%s8401_s2 + $0x38] sm:$0xff]  ;;  %v983_v24 = vld [vmem:[%s8401_s2 + $0x2c8] sm:$0xff] }
 0x10f   : > { %v710_v61 = vsel %vm615_vm2, %v544_v58, %v614_v51  ;;  %v706_v62 = vsel %vm615_vm2, %v543_v41, %v613_v52  ;;  %v5760_v11 = vpack.c.bf16 %v901_v4, %v897_v1  ;;  %v5836_v51 = vpack.c.bf16 %v917_v29, %v913_v42  ;;  %v916_v52 = vld [vmem:[%s8401_s2 + $0xb0] sm:$0xff]  ;;  %v987_v18 = vld [vmem:[%s8401_s2 + $0x2e8] sm:$0xff]  ;;  %v998_v29 = vld [vmem:[%s8401_s2 + $0x340] sm:$0xff] }
 0x110   : > { %822 = vmatprep.subr.bf16.mxu0 %v710_v61  ;;  %4722 = vmatpush1.bf16.msra.mxu1 %v5715_v34  ;;  %v5857_v58 = vpack.c.bf16 %v916_v52, %v912_v46  ;;  %v5863_v60 = vpack.c.bf16 %v987_v18, %v983_v24  ;;  %v982_v61 = vld [vmem:[%s8401_s2 + $0x2c0] sm:$0xff]  ;;  %v5872_v1 = vpack.c.bf16 %v925_v56, %v921_v53  ;;  %v924_v4 = vld [vmem:[%s8401_s2 + $0xf0] sm:$0xff]  ;;  %v1007_v52 = vld [vmem:[%s8401_s2 + $0x388] sm:$0xff] }
 0x111   : > { %v585_v2 = vpop.permute.xlu0 %584  ;;  %823 = vmatpush1.bf16.msra.mxu0 %v706_v62  ;;  %4724 = vmatprep.subr.bf16.mxu1 %v5718_v63  ;;  %v986_v62 = vld [vmem:[%s8401_s2 + $0x2e0] sm:$0xff]  ;;  %v1011_v24 = vld [vmem:[%s8401_s2 + $0x3a8] sm:$0xff]  ;;  %v945_v18 = vld [vmem:[%s8401_s2 + $0x198] sm:$0xff] }
 0x112   : > { %v589_v9 = vsel %vm576_vm8, %v5559_v21, %v585_v2  ;;  %v587_v10 = vpop.permute.xlu1 %586  ;;  %v905_v21 = vld [vmem:[%s8401_s2 + $0x58] sm:$0xff]  ;;  %8484 = vst [vmem:[#allocation4_spill] sm:$0xff] %v5863_v60  ;;  %v1002_v46 = vld [vmem:[%s8401_s2 + $0x360] sm:$0xff] }
 0x113   : > { %v590_v15 = vsel %vm576_vm8, %v585_v2, %v587_v10  ;;  %v729_v5 = vsel %vm615_vm2, %v589_v9, 0  ;;  %v5798_v37 = vpack.c.bf16 %v909_v25, %v905_v21  ;;  %v991_v2 = vld [vmem:[%s8401_s2 + $0x308] sm:$0xff]  ;;  %v5890_v9 = vpack.c.bf16 %v986_v62, %v982_v61  ;;  %v932_v21 = vld [vmem:[%s8401_s2 + $0x130] sm:$0xff]  ;;  %v949_v53 = vld [vmem:[%s8401_s2 + $0x1b8] sm:$0xff] }
 0x114   : > { %4620 = vmatprep.subr.msk.bf16.mxu0 %vm615_vm2, %v590_v15  ;;  %4726 = vmatpush1.bf16.msra.mxu1 %v5744_v50  ;;  %v5893_v10 = vpack.c.bf16 %v924_v4, %v920_v36  ;;  %v5899_v0 = vpack.c.bf16 %v995_v3, %v991_v2  ;;  %v994_v15 = vld [vmem:[%s8401_s2 + $0x320] sm:$0xff]  ;;  %v999_v25 = vld [vmem:[%s8401_s2 + $0x348] sm:$0xff]  ;;  %v5929_v39 = vpack.c.bf16 %v932_v21, %v928_v12  ;;  %v944_v61 = vld [vmem:[%s8401_s2 + $0x190] sm:$0xff] }
 0x115   : > { %825 = vmatpush1.bf16.msra.mxu0 %v729_v5  ;;  %4728 = vmatprep.subr.bf16.mxu1 %v5750_v6  ;;  %8485 = vst [vmem:[#allocation5_spill] sm:$0xff] %v5890_v9  ;;  %v5908_v5 = vpack.c.bf16 %v933_v55, %v929_v43  ;;  %v5926_v38 = vpack.c.bf16 %v994_v15, %v990_v13  ;;  %v1006_v4 = vld [vmem:[%s8401_s2 + $0x380] sm:$0xff]  ;;  %v948_v43 = vld [vmem:[%s8401_s2 + $0x1b0] sm:$0xff]  ;;  %v1015_v55 = vld [vmem:[%s8401_s2 + $0x3c8] sm:$0xff] }
 0x116   : > { %4792 = vmatprep.subr.bf16.mxu0 %v5760_v11  ;;  %8486 = vst [vmem:[#allocation6_spill] sm:$0xff] %v5899_v0  ;;  %v5935_v42 = vpack.c.bf16 %v1003_v28, %v999_v25  ;;  %v5962_v56 = vpack.c.bf16 %v1002_v46, %v998_v29  ;;  %v5971_v62 = vpack.c.bf16 %v1011_v24, %v1007_v52  ;;  %v1010_v2 = vld [vmem:[%s8401_s2 + $0x3a0] sm:$0xff]  ;;  %v1019_v12 = vld [vmem:[%s8401_s2 + $0x3e8] sm:$0xff]  ;;  %v953_v13 = vld [vmem:[%s8401_s2 + $0x1d8] sm:$0xff] }
 0x117   : > { %8487 = vst [vmem:[#allocation7_spill] sm:$0xff] %v5926_v38  ;;  %v5980_v3 = vpack.c.bf16 %v949_v53, %v945_v18  ;;  %v957_v15 = vld [vmem:[%s8401_s2 + $0x1f8] sm:$0xff]  ;;  %v5998_v21 = vpack.c.bf16 %v1010_v2, %v1006_v4  ;;  %v6001_v25 = vpack.c.bf16 %v948_v43, %v944_v61  ;;  %v952_v28 = vld [vmem:[%s8401_s2 + $0x1d0] sm:$0xff]  ;;  %v1027_v52 = vld [vmem:[%s8401_s2 + $0x428] sm:$0xff] }
 0x118   : > { %4621 = vmatmul.mubr.msk.bf16.vlgmr.msra.gmra.mrb[4].mxu0 %vm8474_vm9, %v5494_v23  ;;  %4730 = vmatpush1.bf16.msra.mxu1 %v5781_v27  ;;  %v974_v23 = vld [vmem:[%s8401_s2 + $0x280] sm:$0xff]  ;;  %8488 = vst [vmem:[#allocation8_spill] sm:$0xff] %v5935_v42  ;;  %8489 = vst [vmem:[#allocation9_spill] sm:$0xff] %v5962_v56  ;;  %v6016_v29 = vpack.c.bf16 %v957_v15, %v953_v13  ;;  %v956_v46 = vld [vmem:[%s8401_s2 + $0x1f0] sm:$0xff]  ;;  %vm2106_vm9 = vsmask.f32 2304 }
 0x119   : > { %4794 = vmatpush1.bf16.msra.mxu0 %v5783_v16  ;;  %4732 = vmatprep.subr.bf16.mxu1 %v5789_v30  ;;  %v5854_v41 = vpack.c.bf16 %v978_v47, %v974_v23  ;;  %v5944_v23 = vpack.c.bf16 %v941_v33, %v937_v32  ;;  %v940_v47 = vld [vmem:[%s8401_s2 + $0x170] sm:$0xff]  ;;  %8490 = vst [vmem:[#allocation10_spill] sm:$0xff] %v5971_v62  ;;  %8491 = vst [vmem:[#allocation11_spill] sm:$0xff] %v5998_v21  ;;  %v1014_v33 = vld [vmem:[%s8401_s2 + $0x3c0] sm:$0xff] }
 0x11a   : > { %4796 = vmatprep.subr.bf16.mxu0 %v5798_v37  ;;  %v5965_v36 = vpack.c.bf16 %v940_v47, %v936_v54  ;;  %v6007_v32 = vpack.c.bf16 %v1019_v12, %v1015_v55  ;;  %v1018_v54 = vld [vmem:[%s8401_s2 + $0x3e0] sm:$0xff]  ;;  %v1023_v47 = vld [vmem:[%s8401_s2 + $0x408] sm:$0xff]  ;;  %v961_v24 = vld [vmem:[%s8401_s2 + $0x218] sm:$0xff]  ;;  %v6037_v61 = vpack.c.bf16 %v956_v46, %v952_v28 }
 0x11b   : > { %8483 = vst [vmem:[#allocation3_spill] sm:$0xff] %v5854_v41  ;;  %v965_v18 = vld [vmem:[%s8401_s2 + $0x238] sm:$0xff]  ;;  %v6034_v53 = vpack.c.bf16 %v1018_v54, %v1014_v33  ;;  %v6040_v4 = vpack.c.bf16 %v1027_v52, %v1023_v47  ;;  %v960_v43 = vld [vmem:[%s8401_s2 + $0x210] sm:$0xff] }
 0x11c   : > { %4734 = vmatpush1.bf16.msra.mxu1 %v5818_v44  ;;  %8492 = vst [vmem:[#allocation12_spill] sm:$0xff] %v6007_v32  ;;  %v6043_v2 = vpack.c.bf16 %v965_v18, %v961_v24  ;;  %v964_v55 = vld [vmem:[%s8401_s2 + $0x230] sm:$0xff]  ;;  %v969_v12 = vld [vmem:[%s8401_s2 + $0x258] sm:$0xff] }
 0x11d   : > { %4798 = vmatpush1.bf16.msra.mxu0 %v5821_v26  ;;  %4736 = vmatprep.subr.bf16.mxu1 %v5827_v14  ;;  %8493 = vst [vmem:[#allocation13_spill] sm:$0xff] %v6034_v53  ;;  %8494 = vst [vmem:[#allocation14_spill] sm:$0xff] %v6040_v4  ;;  %v973_v13 = vld [vmem:[%s8401_s2 + $0x278] sm:$0xff]  ;;  %v6059_v15 = vpack.c.bf16 %v964_v55, %v960_v43  ;;  %v968_v33 = vld [vmem:[%s8401_s2 + $0x250] sm:$0xff] }
 0x11e   : > { %4800 = vmatprep.subr.bf16.mxu0 %v5836_v51  ;;  %v6063_v28 = vpack.c.bf16 %v973_v13, %v969_v12  ;;  %v972_v54 = vld [vmem:[%s8401_s2 + $0x270] sm:$0xff]  ;;  %v977_v46 = vld [vmem:[%s8401_s2 + $0x298] sm:$0xff] }
 0x11f   : > { %v981_v47 = vld [vmem:[%s8401_s2 + $0x2b8] sm:$0xff]  ;;  %v6078_v52 = vpack.c.bf16 %v972_v54, %v968_v33  ;;  %v976_v18 = vld [vmem:[%s8401_s2 + $0x290] sm:$0xff] }
 0x120   : > { %4738 = vmatpush1.bf16.msra.mxu1 %v5854_v41  ;;  %v6081_v24 = vpack.c.bf16 %v981_v47, %v977_v46  ;;  %v980_v43 = vld [vmem:[%s8401_s2 + $0x2b0] sm:$0xff]  ;;  %v985_v55 = vld [vmem:[%s8401_s2 + $0x2d8] sm:$0xff] }
 0x121   : > { %4802 = vmatpush1.bf16.msra.mxu0 %v5857_v58  ;;  %4740 = vmatprep.subr.bf16.mxu1 %v5863_v60  ;;  %v989_v12 = vld [vmem:[%s8401_s2 + $0x2f8] sm:$0xff]  ;;  %v6096_v13 = vpack.c.bf16 %v980_v43, %v976_v18  ;;  %v984_v54 = vld [vmem:[%s8401_s2 + $0x2d0] sm:$0xff]  ;;  %v1030_v60 = vld [vmem:[%s8401_s2 + $0x440] sm:$0xff] }
 0x122   : > { %4804 = vmatprep.subr.bf16.mxu0 %v5872_v1  ;;  %8495 = vst [vmem:[#allocation15_spill] sm:$0xff] %v6081_v24  ;;  %v6099_v33 = vpack.c.bf16 %v989_v12, %v985_v55  ;;  %v988_v46 = vld [vmem:[%s8401_s2 + $0x2f0] sm:$0xff]  ;;  %v993_v47 = vld [vmem:[%s8401_s2 + $0x318] sm:$0xff] }
 0x123   : > { %8496 = vst [vmem:[#allocation16_spill] sm:$0xff] %v6096_v13  ;;  %v997_v18 = vld [vmem:[%s8401_s2 + $0x338] sm:$0xff]  ;;  %v6114_v43 = vpack.c.bf16 %v988_v46, %v984_v54  ;;  %v992_v12 = vld [vmem:[%s8401_s2 + $0x310] sm:$0xff] }
 0x124   : > { %4742 = vmatpush1.bf16.msra.mxu1 %v5890_v9  ;;  %8497 = vst [vmem:[#allocation17_spill] sm:$0xff] %v6099_v33  ;;  %v6117_v55 = vpack.c.bf16 %v997_v18, %v993_v47  ;;  %v1005_v54 = vld [vmem:[%s8401_s2 + $0x378] sm:$0xff]  ;;  %v6132_v46 = vpack.c.bf16 %v996_v20, %v992_v12  ;;  %v1000_v18 = vld [vmem:[%s8401_s2 + $0x350] sm:$0xff] }
 0x125   : > { %4806 = vmatpush1.bf16.msra.mxu0 %v5893_v10  ;;  %4744 = vmatprep.subr.bf16.mxu1 %v5899_v0  ;;  %8498 = vst [vmem:[#allocation18_spill] sm:$0xff] %v6114_v43  ;;  %v1013_v20 = vld [vmem:[%s8401_s2 + $0x3b8] sm:$0xff] }
 0x126   : > { %4808 = vmatprep.subr.bf16.mxu0 %v5908_v5  ;;  %8499 = vst [vmem:[#allocation19_spill] sm:$0xff] %v6117_v55  ;;  %8500 = vst [vmem:[#allocation20_spill] sm:$0xff] %v6132_v46 }
 0x128   : > { %4746 = vmatpush1.bf16.msra.mxu1 %v5926_v38 }
 0x129   : > { %4810 = vmatpush1.bf16.msra.mxu0 %v5929_v39  ;;  %4748 = vmatprep.subr.bf16.mxu1 %v5935_v42  ;;  %v1033_v42 = vld [vmem:[%s8401_s2 + $0x458] sm:$0xff] }
 0x12a   : > { %4812 = vmatprep.subr.bf16.mxu0 %v5944_v23 }
 0x12c   : > { %4750 = vmatpush1.bf16.msra.mxu1 %v5962_v56  ;;  %v1020_v56 = vld [vmem:[%s8401_s2 + $0x3f0] sm:$0xff] }
 0x12d   : > { %4814 = vmatpush1.bf16.msra.mxu0 %v5965_v36  ;;  %4752 = vmatprep.subr.bf16.mxu1 %v5971_v62  ;;  %v1017_v62 = vld [vmem:[%s8401_s2 + $0x3d8] sm:$0xff] }
 0x12e   : > { %4816 = vmatprep.subr.bf16.mxu0 %v5980_v3 }
 0x130   : > { %4754 = vmatpush1.bf16.msra.mxu1 %v5998_v21  ;;  %v1012_v21 = vld [vmem:[%s8401_s2 + $0x3b0] sm:$0xff] }
 0x131   : > { %4818 = vmatpush1.bf16.msra.mxu0 %v6001_v25  ;;  %4756 = vmatprep.subr.bf16.mxu1 %v6007_v32  ;;  %v1009_v32 = vld [vmem:[%s8401_s2 + $0x398] sm:$0xff] }
 0x132   : > { %4820 = vmatprep.subr.bf16.mxu0 %v6016_v29  ;;  %v6153_v12 = vpack.c.bf16 %v1013_v20, %v1009_v32  ;;  %v1016_v20 = vld [vmem:[%s8401_s2 + $0x3d0] sm:$0xff] }
 0x134   : > { %4758 = vmatpush1.bf16.msra.mxu1 %v6034_v53  ;;  %v1004_v53 = vld [vmem:[%s8401_s2 + $0x370] sm:$0xff]  ;;  %8503 = vst [vmem:[#allocation23_spill] sm:$0xff] %v6153_v12 }
 0x135   : > { %4822 = vmatpush1.bf16.msra.mxu0 %v6037_v61  ;;  %4760 = vmatprep.subr.bf16.mxu1 %v6040_v4  ;;  %v1001_v4 = vld [vmem:[%s8401_s2 + $0x358] sm:$0xff] }
 0x136   : > { %4824 = vmatprep.subr.bf16.mxu0 %v6043_v2  ;;  %v6135_v47 = vpack.c.bf16 %v1005_v54, %v1001_v4  ;;  %v6150_v4 = vpack.c.bf16 %v1004_v53, %v1000_v18  ;;  %v1008_v54 = vld [vmem:[%s8401_s2 + $0x390] sm:$0xff]  ;;  %v1021_v53 = vld [vmem:[%s8401_s2 + $0x3f8] sm:$0xff] }
 0x137   : > { %v6168_v32 = vpack.c.bf16 %v1012_v21, %v1008_v54  ;;  %v6171_v18 = vpack.c.bf16 %v1021_v53, %v1017_v62  ;;  %v1029_v21 = vld [vmem:[%s8401_s2 + $0x438] sm:$0xff]  ;;  %v6186_v62 = vpack.c.bf16 %v1020_v56, %v1016_v20  ;;  %v858_v53 = vlaneseq }
 0x138   : > { %8501 = vst [vmem:[#allocation21_spill] sm:$0xff] %v6135_v47  ;;  %8502 = vst [vmem:[#allocation22_spill] sm:$0xff] %v6150_v4 }
 0x139   : > { %4826 = vmatpush1.bf16.msra.mxu0 %v6059_v15  ;;  %8504 = vst [vmem:[#allocation24_spill] sm:$0xff] %v6168_v32  ;;  %8505 = vst [vmem:[#allocation25_spill] sm:$0xff] %v6171_v18 }
 0x13a   : > { %4828 = vmatprep.subr.bf16.mxu0 %v6063_v28  ;;  %8506 = vst [vmem:[#allocation26_spill] sm:$0xff] %v6186_v62 }
 0x13d   : > { %4830 = vmatpush1.bf16.msra.mxu0 %v6078_v52 }
 0x13e   : > { %4832 = vmatprep.subr.bf16.mxu0 %v6081_v24 }
 0x141   : > { %4834 = vmatpush1.bf16.msra.mxu0 %v6096_v13  ;;  %v1034_v13 = vld [vmem:[%s8401_s2 + $0x460] sm:$0xff] }
 0x142   : > { %4836 = vmatprep.subr.bf16.mxu0 %v6099_v33 }
 0x145   : > { %4838 = vmatpush1.bf16.msra.mxu0 %v6114_v43 }
 0x146   : > { %4840 = vmatprep.subr.bf16.mxu0 %v6117_v55 }
 0x149   : > { %4842 = vmatpush1.bf16.msra.mxu0 %v6132_v46  ;;  %v1037_v46 = vld [vmem:[%s8401_s2 + $0x478] sm:$0xff] }
 0x14a   : > { %4844 = vmatprep.subr.bf16.mxu0 %v6135_v47  ;;  %v1025_v47 = vld [vmem:[%s8401_s2 + $0x418] sm:$0xff] }
 0x14b   : > { %v6189_v54 = vpack.c.bf16 %v1029_v21, %v1025_v47  ;;  %v1022_v21 = vld [vmem:[%s8401_s2 + $0x400] sm:$0xff] }
 0x14d   : > { %4846 = vmatpush1.bf16.msra.mxu0 %v6150_v4  ;;  %8507 = vst [vmem:[#allocation27_spill] sm:$0xff] %v6189_v54 }
 0x14e   : > { %4848 = vmatprep.subr.bf16.mxu0 %v6153_v12  ;;  %v6193_v12 = vshrl.u32 %v858_v53, 7  ;;  %v1026_v53 = vld [vmem:[%s8401_s2 + $0x420] sm:$0xff] }
 0x14f   : > { %v6240_v9 = vpack.c.bf16 %v1026_v53, %v1022_v21  ;;  %v1047_v53 = vld [vmem:[%s8401_s2 + $0x4c8] sm:$0xff] }
 0x150   : > { %v6196_v4 = vsub.s32 0, %v6193_v12  ;;  %v6204_v56 = vsub.s32 1, %v6193_v12 }
 0x151   : > { %4850 = vmatpush1.bf16.msra.mxu0 %v6168_v32  ;;  %v6201_v32 = vld [vmem:[%s8402_s3] sm:$0x3f] }
 0x152   : > { %4852 = vmatprep.subr.bf16.mxu0 %v6171_v18  ;;  %8508 = vst [vmem:[#allocation28_spill] sm:$0xff] %v6196_v4  ;;  %8509 = vst [vmem:[#allocation29_spill] sm:$0xff] %v6204_v56  ;;  %v6208_v47 = vrot.slane %v6201_v32, %v6196_v4  ;;  %v6212_v20 = vrot.slane %v6201_v32, %v6204_v56  ;;  %v1028_v4 = vld [vmem:[%s8401_s2 + $0x430] sm:$0xff]  ;;  %v1031_v56 = vld [vmem:[%s8401_s2 + $0x448] sm:$0xff] }
 0x153   : > { %v1035_v18 = vld [vmem:[%s8401_s2 + $0x468] sm:$0xff] }
 0x154   : > { %8510 = vst [vmem:[#allocation30_spill] sm:$0xff] %v6208_v47  ;;  %8511 = vst [vmem:[#allocation31_spill] sm:$0xff] %v6212_v20  ;;  %v6250_v24 = vpack.c.bf16 %v1035_v18, %v1031_v56  ;;  %v6274_v18 = vpack.c.bf16 %v1034_v13, %v1030_v60  ;;  %v1042_v56 = vld [vmem:[%s8401_s2 + $0x4a0] sm:$0xff]  ;;  %v1040_v60 = vld [vmem:[%s8401_s2 + $0x490] sm:$0xff] }
 0x155   : > { %4854 = vmatpush1.bf16.msra.mxu0 %v6186_v62  ;;  %v1044_v13 = vld [vmem:[%s8401_s2 + $0x4b0] sm:$0xff] }
 0x156   : > { %4856 = vmatprep.subr.bf16.mxu0 %v6189_v54  ;;  %v1024_v54 = vld [vmem:[%s8401_s2 + $0x410] sm:$0xff]  ;;  %8512 = vst [vmem:[#allocation32_spill] sm:$0xff] %v6274_v18 }
 0x157   : > { %v6242_v33 = vpack.c.bf16 %v1028_v4, %v1024_v54  ;;  %v1039_v4 = vld [vmem:[%s8401_s2 + $0x488] sm:$0xff]  ;;  %v1038_v54 = vld [vmem:[%s8401_s2 + $0x480] sm:$0xff] }
 0x19a   : > { %v768_v62 = vpop.f32.mrb[0].mxu0 }
 0x19b   : > { %v888_v38 = vmul.f32 %v6208_v47, %v768_v62  ;;  %v770_v55 = vpop.f32.mrb[1].mxu0  ;;  %v6252_v62 = vpack.c.bf16 %v1037_v46, %v1033_v42  ;;  %v1041_v42 = vld [vmem:[%s8401_s2 + $0x498] sm:$0xff]  ;;  %v1050_v47 = vld [vmem:[%s8401_s2 + $0x4e0] sm:$0xff] }
 0x19c   : > { %v889_v0 = vmul.f32 %v6212_v20, %v770_v55  ;;  %v772_v43 = vpop.f32.mrb[2].mxu0  ;;  %v1036_v55 = vld [vmem:[%s8401_s2 + $0x470] sm:$0xff]  ;;  %v1045_v46 = vld [vmem:[%s8401_s2 + $0x4b8] sm:$0xff]  ;;  %v1046_v20 = vld [vmem:[%s8401_s2 + $0x4c0] sm:$0xff] }
 0x19d   : > { %v773_v41 = vpop.f32.mrb[3].mxu0  ;;  %v1032_v43 = vld [vmem:[%s8401_s2 + $0x450] sm:$0xff]  ;;  %v6288_v21 = vpack.c.bf16 %v1045_v46, %v1041_v42  ;;  %v6312_v42 = vpack.c.bf16 %v1042_v56, %v1038_v54  ;;  %v6314_v46 = vpack.c.bf16 %v1044_v13, %v1040_v60  ;;  %v1055_v60 = vld [vmem:[%s8401_s2 + $0x508] sm:$0xff] }
 0x19e   : > { %1150 = vmatprep.mubr.f32.mxu1 %v889_v0  ;;  %1292 = vmatprep.mubr.f32.mxu0 %v889_v0  ;;  %v1043_v41 = vld [vmem:[%s8401_s2 + $0x4a8] sm:$0xff]  ;;  %v6276_v0 = vpack.c.bf16 %v1036_v55, %v1032_v43  ;;  %v1049_v55 = vld [vmem:[%s8401_s2 + $0x4d8] sm:$0xff]  ;;  %v1048_v54 = vld [vmem:[%s8401_s2 + $0x4d0] sm:$0xff] }
 0x19f   : > { %1151 = vmatmul.mubr.f32.vlgmr.msra.gmra.mrb[4].mxu1 %v888_v38  ;;  %1293 = vmatmul.mubr.f32.vlgmr.msra.gmra.mrb[8].mxu0 %v888_v38  ;;  %v6286_v38 = vpack.c.bf16 %v1043_v41, %v1039_v4  ;;  %8515 = vst [vmem:[#allocation35_spill] sm:$0xff] %v6288_v21  ;;  %v1051_v43 = vld [vmem:[%s8401_s2 + $0x4e8] sm:$0xff]  ;;  %v1053_v4 = vld [vmem:[%s8401_s2 + $0x4f8] sm:$0xff]  ;;  %v8455_v41 = vmov 0.0   ;;  %8516 = vst [vmem:[#allocation36_spill] sm:$0xff] %v6312_v42 }
 0x1a0   : > { %4762 = vmatpush1.bf16.msra.mxu1 %v6240_v9  ;;  %4858 = vmatpush1.bf16.msra.mxu0 %v6242_v33  ;;  %8513 = vst [vmem:[#allocation33_spill] sm:$0xff] %v6276_v0  ;;  %8517 = vst [vmem:[#allocation37_spill] sm:$0xff] %v6314_v46  ;;  %v1052_v56 = vld [vmem:[%s8401_s2 + $0x4f0] sm:$0xff]  ;;  %v1059_v13 = vld [vmem:[%s8401_s2 + $0x528] sm:$0xff] }
 0x1a1   : > { %4764 = vmatprep.subr.bf16.mxu1 %v6250_v24  ;;  %4860 = vmatprep.subr.bf16.mxu0 %v6252_v62  ;;  %8514 = vst [vmem:[#allocation34_spill] sm:$0xff] %v6286_v38 }
 0x1a2   : > { %1221 = vmatprep.mubr.f32.mxu1 %v8455_v41  ;;  %1363 = vmatprep.mubr.f32.mxu0 %v8455_v41  ;;  %v6324_v41 = vpack.c.bf16 %v1051_v43, %v1047_v53  ;;  %v1057_v53 = vld [vmem:[%s8401_s2 + $0x518] sm:$0xff] }
 0x1a3   : > { %v1061_v43 = vld [vmem:[%s8401_s2 + $0x538] sm:$0xff] }
 0x1a4   : > { %4766 = vmatpush1.bf16.msra.mxu1 %v6274_v18  ;;  %4862 = vmatpush1.bf16.msra.mxu0 %v6276_v0  ;;  %8518 = vst [vmem:[#allocation38_spill] sm:$0xff] %v6324_v41  ;;  %v6326_v18 = vpack.c.bf16 %v1053_v4, %v1049_v55  ;;  %v6348_v55 = vpack.c.bf16 %v1050_v47, %v1046_v20  ;;  %v1056_v47 = vld [vmem:[%s8401_s2 + $0x510] sm:$0xff] }
 0x1a5   : > { %4768 = vmatprep.subr.bf16.mxu1 %v6286_v38  ;;  %4864 = vmatprep.subr.bf16.mxu0 %v6288_v21  ;;  %v6350_v4 = vpack.c.bf16 %v1052_v56, %v1048_v54  ;;  %v1054_v21 = vld [vmem:[%s8401_s2 + $0x500] sm:$0xff]  ;;  %v6360_v0 = vpack.c.bf16 %v1059_v13, %v1055_v60  ;;  %v1060_v20 = vld [vmem:[%s8401_s2 + $0x530] sm:$0xff]  ;;  %v1063_v54 = vld [vmem:[%s8401_s2 + $0x548] sm:$0xff] }
 0x1a6   : > { %8519 = vst [vmem:[#allocation39_spill] sm:$0xff] %v6326_v18  ;;  %8520 = vst [vmem:[#allocation40_spill] sm:$0xff] %v6348_v55  ;;  %v1058_v38 = vld [vmem:[%s8401_s2 + $0x520] sm:$0xff]  ;;  %v1067_v56 = vld [vmem:[%s8401_s2 + $0x568] sm:$0xff] }
 0x1a7   : > { %8521 = vst [vmem:[#allocation41_spill] sm:$0xff] %v6350_v4  ;;  %8522 = vst [vmem:[#allocation42_spill] sm:$0xff] %v6360_v0  ;;  %v1065_v60 = vld [vmem:[%s8401_s2 + $0x558] sm:$0xff] }
 0x1a8   : > { %4770 = vmatpush1.bf16.msra.mxu1 %v6312_v42  ;;  %4866 = vmatpush1.bf16.msra.mxu0 %v6314_v46  ;;  %v6362_v42 = vpack.c.bf16 %v1061_v43, %v1057_v53  ;;  %v1069_v13 = vld [vmem:[%s8401_s2 + $0x578] sm:$0xff]  ;;  %v6384_v53 = vpack.c.bf16 %v1058_v38, %v1054_v21  ;;  %v6386_v43 = vpack.c.bf16 %v1060_v20, %v1056_v47  ;;  %v1064_v38 = vld [vmem:[%s8401_s2 + $0x550] sm:$0xff]  ;;  %v1071_v47 = vld [vmem:[%s8401_s2 + $0x588] sm:$0xff] }
 0x1a9   : > { %4772 = vmatprep.subr.bf16.mxu1 %v6324_v41  ;;  %4868 = vmatprep.subr.bf16.mxu0 %v6326_v18  ;;  %v1062_v18 = vld [vmem:[%s8401_s2 + $0x540] sm:$0xff]  ;;  %v6396_v46 = vpack.c.bf16 %v1067_v56, %v1063_v54  ;;  %v1068_v21 = vld [vmem:[%s8401_s2 + $0x570] sm:$0xff]  ;;  %v1075_v20 = vld [vmem:[%s8401_s2 + $0x5a8] sm:$0xff] }
 0x1aa   : > { %8523 = vst [vmem:[#allocation43_spill] sm:$0xff] %v6362_v42  ;;  %8524 = vst [vmem:[#allocation44_spill] sm:$0xff] %v6384_v53  ;;  %v1066_v41 = vld [vmem:[%s8401_s2 + $0x560] sm:$0xff]  ;;  %v1073_v54 = vld [vmem:[%s8401_s2 + $0x598] sm:$0xff] }
 0x1ab   : > { %8525 = vst [vmem:[#allocation45_spill] sm:$0xff] %v6386_v43  ;;  %8526 = vst [vmem:[#allocation46_spill] sm:$0xff] %v6396_v46  ;;  %v1077_v56 = vld [vmem:[%s8401_s2 + $0x5b8] sm:$0xff] }
 0x1ac   : > { %4774 = vmatpush1.bf16.msra.mxu1 %v6348_v55  ;;  %4870 = vmatpush1.bf16.msra.mxu0 %v6350_v4  ;;  %v6398_v55 = vpack.c.bf16 %v1069_v13, %v1065_v60  ;;  %v6420_v60 = vpack.c.bf16 %v1066_v41, %v1062_v18  ;;  %v6422_v13 = vpack.c.bf16 %v1068_v21, %v1064_v38  ;;  %v1072_v18 = vld [vmem:[%s8401_s2 + $0x590] sm:$0xff]  ;;  %v1079_v38 = vld [vmem:[%s8401_s2 + $0x5c8] sm:$0xff] }
 0x1ad   : > { %4776 = vmatprep.subr.bf16.mxu1 %v6360_v0  ;;  %4872 = vmatprep.subr.bf16.mxu0 %v6362_v42  ;;  %v1070_v42 = vld [vmem:[%s8401_s2 + $0x580] sm:$0xff]  ;;  %v6432_v4 = vpack.c.bf16 %v1075_v20, %v1071_v47  ;;  %v1076_v41 = vld [vmem:[%s8401_s2 + $0x5b0] sm:$0xff]  ;;  %v1083_v21 = vld [vmem:[%s8401_s2 + $0x5e8] sm:$0xff] }
 0x1ae   : > { %8527 = vst [vmem:[#allocation47_spill] sm:$0xff] %v6398_v55  ;;  %8528 = vst [vmem:[#allocation48_spill] sm:$0xff] %v6422_v13  ;;  %v1074_v0 = vld [vmem:[%s8401_s2 + $0x5a0] sm:$0xff]  ;;  %v1081_v47 = vld [vmem:[%s8401_s2 + $0x5d8] sm:$0xff] }
 0x1af   : > { %v1085_v20 = vld [vmem:[%s8401_s2 + $0x5f8] sm:$0xff] }
 0x1b0   : > { %4778 = vmatpush1.bf16.msra.mxu1 %v6384_v53  ;;  %4874 = vmatpush1.bf16.msra.mxu0 %v6386_v43  ;;  %v6434_v53 = vpack.c.bf16 %v1077_v56, %v1073_v54  ;;  %v6456_v54 = vpack.c.bf16 %v1074_v0, %v1070_v42  ;;  %v6458_v56 = vpack.c.bf16 %v1076_v41, %v1072_v18  ;;  %v1080_v0 = vld [vmem:[%s8401_s2 + $0x5d0] sm:$0xff] }
 0x1b1   : > { %4780 = vmatprep.subr.bf16.mxu1 %v6396_v46  ;;  %4876 = vmatprep.subr.bf16.mxu0 %v6398_v55  ;;  %v1078_v55 = vld [vmem:[%s8401_s2 + $0x5c0] sm:$0xff]  ;;  %v6465_v46 = vpack.c.bf16 %v1083_v21, %v1079_v38  ;;  %v6467_v43 = vpack.c.bf16 %v1085_v20, %v1081_v47  ;;  %v1084_v42 = vld [vmem:[%s8401_s2 + $0x5f0] sm:$0xff]  ;;  %v6491_v38 = vsub.s32 2, %v6193_v12 }
 0x1b2   : > { %v6482_v41 = vpack.c.bf16 %v1084_v42, %v1080_v0  ;;  %v8565_v42 = vld [vmem:[#allocation41_spill] sm:$0xff] }
 0x1b4   : > { %4782 = vmatpush1.bf16.msra.mxu1 %v6420_v60  ;;  %4878 = vmatpush1.bf16.msra.mxu0 %v6422_v13  ;;  %v1082_v13 = vld [vmem:[%s8401_s2 + $0x5e0] sm:$0xff] }
 0x1b5   : > { %4784 = vmatprep.subr.bf16.mxu1 %v6432_v4  ;;  %4880 = vmatprep.subr.bf16.mxu0 %v6434_v53  ;;  %v6480_v18 = vpack.c.bf16 %v1082_v13, %v1078_v55  ;;  %v6495_v55 = vrot.slane %v6201_v32, %v6491_v38 }
 0x1b8   : > { %4786 = vmatpush1.bf16.msra.mxu1 %v6456_v54  ;;  %4882 = vmatpush1.bf16.msra.mxu0 %v6458_v56 }
 0x1b9   : > { %4788 = vmatprep.subr.bf16.mxu1 %v6465_v46  ;;  %4884 = vmatprep.subr.bf16.mxu0 %v6467_v43 }
 0x1bc   : > { %4790 = vmatpush1.bf16.msra.mxu1 %v6480_v18  ;;  %4886 = vmatpush1.bf16.msra.mxu0 %v6482_v41 }
 0x1bd   : > { %4888 = vmatprep.subr.bf16.mxu1 %v5561_v22  ;;  %4984 = vmatprep.subr.bf16.mxu0 %v5760_v11  ;;  %v876_v22 = vsub.s32 4, %v6193_v12  ;;  %v8540_v11 = vld [vmem:[#allocation20_spill] sm:$0xff] }
 0x1ca   : > { %v809_v13 = vpop.f32.mrb[0].mxu1 }
 0x1cb   : > { %v890_v21 = vmul.f32 %v6495_v55, %v809_v13  ;;  %v6498_v47 = vpop.f32.mrb[1].mxu1  ;;  %v8566_v13 = vld [vmem:[#allocation42_spill] sm:$0xff] }
 0x1cc   : > { %v813_v20 = vpop.f32.mrb[2].mxu1 }
 0x1cd   : > { %v814_v0 = vpop.f32.mrb[3].mxu1  ;;  %1222 = vmatmul.mubr.f32.vlgmr.msra.gmra.mrb[4].mxu1 %v890_v21  ;;  %1364 = vmatmul.mubr.f32.vlgmr.msra.gmra.mrb[8].mxu0 %v890_v21  ;;  %v8567_v21 = vld [vmem:[#allocation43_spill] sm:$0xff]  ;;  %v8569_v20 = vld [vmem:[#allocation45_spill] sm:$0xff] }
 0x1ce   : > { %4890 = vmatpush1.bf16.msra.mxu1 %v5579_v31  ;;  %4986 = vmatpush1.bf16.msra.mxu0 %v5783_v16  ;;  %v6530_v31 = vrot.slane %v6201_v32, %v876_v22  ;;  %v8542_v16 = vld [vmem:[#allocation21_spill] sm:$0xff]  ;;  %v8570_v0 = vld [vmem:[#allocation46_spill] sm:$0xff]  ;;  %v8571_v22 = vld [vmem:[#allocation47_spill] sm:$0xff] }
 0x1cf   : > { %4892 = vmatprep.subr.bf16.mxu1 %v5582_v35  ;;  %4988 = vmatprep.subr.bf16.mxu0 %v5798_v37  ;;  %v8544_v37 = vld [vmem:[#allocation22_spill] sm:$0xff] }
 0x1d0   : > { %8529 = vst [vmem:[#allocation49_spill] sm:$0xff] %v6530_v31 }
 0x1d2   : > { %4894 = vmatpush1.bf16.msra.mxu1 %v5602_v45  ;;  %4990 = vmatpush1.bf16.msra.mxu0 %v5821_v26  ;;  %v8545_v26 = vld [vmem:[#allocation10_spill] sm:$0xff] }
 0x1d3   : > { %4896 = vmatprep.subr.bf16.mxu1 %v5609_v48  ;;  %4992 = vmatprep.subr.bf16.mxu0 %v5836_v51  ;;  %v8547_v51 = vld [vmem:[#allocation11_spill] sm:$0xff] }
 0x1d6   : > { %4898 = vmatpush1.bf16.msra.mxu1 %v5627_v57  ;;  %4994 = vmatpush1.bf16.msra.mxu0 %v5857_v58  ;;  %v8548_v58 = vld [vmem:[#allocation24_spill] sm:$0xff] }
 0x1d7   : > { %4900 = vmatprep.subr.bf16.mxu1 %v5630_v59  ;;  %4996 = vmatprep.subr.bf16.mxu0 %v5872_v1 }
 0x1da   : > { %4902 = vmatpush1.bf16.msra.mxu1 %v5650_v7  ;;  %4998 = vmatpush1.bf16.msra.mxu0 %v5893_v10  ;;  %v8530_v7 = vld [vmem:[#allocation15_spill] sm:$0xff]  ;;  %v8549_v10 = vld [vmem:[#allocation12_spill] sm:$0xff] }
 0x1db   : > { %4904 = vmatprep.subr.bf16.mxu1 %v5653_v8  ;;  %5000 = vmatprep.subr.bf16.mxu0 %v5908_v5  ;;  %v8531_v8 = vld [vmem:[#allocation3_spill] sm:$0xff]  ;;  %v8550_v5 = vld [vmem:[#allocation25_spill] sm:$0xff] }
 0x1de   : > { %4906 = vmatpush1.bf16.msra.mxu1 %v5671_v19  ;;  %5002 = vmatpush1.bf16.msra.mxu0 %v5929_v39  ;;  %v8532_v19 = vld [vmem:[#allocation16_spill] sm:$0xff]  ;;  %v8551_v39 = vld [vmem:[#allocation13_spill] sm:$0xff] }
 0x1df   : > { %4908 = vmatprep.subr.bf16.mxu1 %v5674_v49  ;;  %5004 = vmatprep.subr.bf16.mxu0 %v5944_v23  ;;  %v8533_v49 = vld [vmem:[#allocation4_spill] sm:$0xff]  ;;  %v8552_v23 = vld [vmem:[#allocation26_spill] sm:$0xff] }
 0x1e2   : > { %4910 = vmatpush1.bf16.msra.mxu1 %v5694_v40  ;;  %5006 = vmatpush1.bf16.msra.mxu0 %v5965_v36  ;;  %v8534_v40 = vld [vmem:[#allocation17_spill] sm:$0xff] }
 0x1e3   : > { %4912 = vmatprep.subr.bf16.mxu1 %v5697_v17  ;;  %5008 = vmatprep.subr.bf16.mxu0 %v5980_v3  ;;  %v8535_v17 = vld [vmem:[#allocation5_spill] sm:$0xff]  ;;  %v8553_v3 = vld [vmem:[#allocation14_spill] sm:$0xff] }
 0x1e6   : > { %4914 = vmatpush1.bf16.msra.mxu1 %v5715_v34  ;;  %5010 = vmatpush1.bf16.msra.mxu0 %v6001_v25  ;;  %v8536_v34 = vld [vmem:[#allocation18_spill] sm:$0xff]  ;;  %v8554_v25 = vld [vmem:[#allocation27_spill] sm:$0xff] }
 0x1e7   : > { %4916 = vmatprep.subr.bf16.mxu1 %v5718_v63  ;;  %5012 = vmatprep.subr.bf16.mxu0 %v6016_v29  ;;  %v8537_v63 = vld [vmem:[#allocation6_spill] sm:$0xff]  ;;  %v8555_v29 = vmov 0.0  }
 0x1ea   : > { %4918 = vmatpush1.bf16.msra.mxu1 %v5744_v50  ;;  %5014 = vmatpush1.bf16.msra.mxu0 %v6037_v61  ;;  %v8538_v50 = vld [vmem:[#allocation19_spill] sm:$0xff]  ;;  %v8556_v61 = vld [vmem:[#allocation32_spill] sm:$0xff] }
 0x1eb   : > { %4920 = vmatprep.subr.bf16.mxu1 %v5750_v6  ;;  %5016 = vmatprep.subr.bf16.mxu0 %v6043_v2  ;;  %v850_v35 = vpop.f32.mrb[4].mxu0  ;;  %v8539_v6 = vld [vmem:[#allocation7_spill] sm:$0xff]  ;;  %v8557_v2 = vld [vmem:[#allocation33_spill] sm:$0xff] }
 0x1ec   : > { %v892_v45 = vmul.f32 %v6530_v31, %v850_v35  ;;  %v6537_v48 = vpop.f32.mrb[5].mxu0  ;;  %v8572_v35 = vld [vmem:[#allocation48_spill] sm:$0xff] }
 0x1ed   : > { %v854_v57 = vpop.f32.mrb[6].mxu0 }
 0x1ee   : > { %4922 = vmatpush1.bf16.msra.mxu1 %v5781_v27  ;;  %5018 = vmatpush1.bf16.msra.mxu0 %v6059_v15  ;;  %v855_v59 = vpop.f32.mrb[7].mxu0  ;;  %v8541_v27 = vld [vmem:[#allocation8_spill] sm:$0xff]  ;;  %v8558_v15 = vld [vmem:[#allocation34_spill] sm:$0xff] }
 0x1ef   : > { %4924 = vmatprep.subr.bf16.mxu1 %v5789_v30  ;;  %5020 = vmatprep.subr.bf16.mxu0 %v6063_v28  ;;  %v8543_v30 = vld [vmem:[#allocation9_spill] sm:$0xff]  ;;  %v8559_v28 = vld [vmem:[#allocation35_spill] sm:$0xff] }
 0x1f0   : > { %1460 = vmatprep.mubr.f32.mxu1 %v892_v45  ;;  %1602 = vmatprep.mubr.f32.mxu0 %v892_v45  ;;  %v880_v45 = vsub.s32 5, %v6193_v12 }
 0x1f2   : > { %4926 = vmatpush1.bf16.msra.mxu1 %v5818_v44  ;;  %5022 = vmatpush1.bf16.msra.mxu0 %v6078_v52  ;;  %v6562_v44 = vsub.s32 3, %v6193_v12  ;;  %v8560_v52 = vld [vmem:[#allocation36_spill] sm:$0xff]  ;;  %v6610_v57 = vrot.slane %v6201_v32, %v880_v45  ;;  %v5201_v45 = vmov 65535  }
 0x1f3   : > { %4928 = vmatprep.subr.bf16.mxu1 %v5827_v14  ;;  %5024 = vmatprep.subr.bf16.mxu0 %v8530_v7  ;;  %v8546_v14 = vld [vmem:[#allocation23_spill] sm:$0xff] }
 0x1f4   : > { %v6570_v1 = vrot.slane %v6201_v32, %v6562_v44  ;;  %8573 = vst [vmem:[#allocation15_spill] sm:$0xff] %v6610_v57  ;;  %v893_v12 = vmul.f32 %v6610_v57, %v6537_v48  ;;  %v8575_v32 = vld [vmem:[#allocation28_spill] sm:$0xff] }
 0x1f6   : > { %4930 = vmatpush1.bf16.msra.mxu1 %v8531_v8  ;;  %5026 = vmatpush1.bf16.msra.mxu0 %v8532_v19  ;;  %v891_v36 = vmul.f32 %v6570_v1, %v6498_v47  ;;  %v8568_v47 = vld [vmem:[#allocation44_spill] sm:$0xff]  ;;  %v8578_v8 = vld [vmem:[#allocation29_spill] sm:$0xff] }
 0x1f7   : > { %4932 = vmatprep.subr.bf16.mxu1 %v8533_v49  ;;  %5028 = vmatprep.subr.bf16.mxu0 %v8534_v40 }
 0x1fa   : > { %4934 = vmatpush1.bf16.msra.mxu1 %v8535_v17  ;;  %5030 = vmatpush1.bf16.msra.mxu0 %v8536_v34 }
 0x1fb   : > { %4936 = vmatprep.subr.bf16.mxu1 %v8537_v63  ;;  %5032 = vmatprep.subr.bf16.mxu0 %v8538_v50  ;;  %v4622_v50 = vld [vmem:[%s5286_s20 + $0x4] sm:$0xf] }
 0x1fe   : > { %4938 = vmatpush1.bf16.msra.mxu1 %v8539_v6  ;;  %5034 = vmatpush1.bf16.msra.mxu0 %v8540_v11  ;;  %v1686_v6 = vrot.slane %v4622_v50, %v8575_v32  ;;  %v1694_v11 = vrot.slane %v4622_v50, %v6491_v38 }
 0x1ff   : > { %4940 = vmatprep.subr.bf16.mxu1 %v8541_v27  ;;  %5036 = vmatprep.subr.bf16.mxu0 %v8542_v16 }
 0x202   : > { %4942 = vmatpush1.bf16.msra.mxu1 %v8543_v30  ;;  %5038 = vmatpush1.bf16.msra.mxu0 %v8544_v37 }
 0x203   : > { %4944 = vmatprep.subr.bf16.mxu1 %v8545_v26  ;;  %5040 = vmatprep.subr.bf16.mxu0 %v8546_v14 }
 0x206   : > { %4946 = vmatpush1.bf16.msra.mxu1 %v8547_v51  ;;  %5042 = vmatpush1.bf16.msra.mxu0 %v8548_v58 }
 0x207   : > { %4948 = vmatprep.subr.bf16.mxu1 %v8549_v10  ;;  %5044 = vmatprep.subr.bf16.mxu0 %v8550_v5  ;;  %v1690_v10 = vrot.slane %v4622_v50, %v8578_v8 }
 0x20a   : > { %4950 = vmatpush1.bf16.msra.mxu1 %v8551_v39  ;;  %5046 = vmatpush1.bf16.msra.mxu0 %v8552_v23 }
 0x20b   : > { %4952 = vmatprep.subr.bf16.mxu1 %v8553_v3  ;;  %5048 = vmatprep.subr.bf16.mxu0 %v8554_v25 }
 0x20d   : > { %1461 = vmatmul.mubr.f32.vlgmr.msra.gmra.mrb[6].mxu1 %v891_v36  ;;  %1603 = vmatmul.mubr.f32.vlgmr.msra.gmra.mrb[10].mxu0 %v891_v36  ;;  %v1698_v36 = vrot.slane %v4622_v50, %v6562_v44 }
 0x20e   : > { %4954 = vmatpush1.bf16.msra.mxu1 %v6240_v9  ;;  %5050 = vmatpush1.bf16.msra.mxu0 %v6242_v33  ;;  %v8561_v9 = vld [vmem:[#allocation37_spill] sm:$0xff]  ;;  %v8562_v33 = vld [vmem:[#allocation38_spill] sm:$0xff] }
 0x20f   : > { %4956 = vmatprep.subr.bf16.mxu1 %v6250_v24  ;;  %5052 = vmatprep.subr.bf16.mxu0 %v6252_v62  ;;  %v8563_v24 = vld [vmem:[#allocation39_spill] sm:$0xff]  ;;  %v8564_v62 = vld [vmem:[#allocation40_spill] sm:$0xff] }
 0x210   : > { %1531 = vmatprep.mubr.f32.mxu1 %v8555_v29  ;;  %1673 = vmatprep.mubr.f32.mxu0 %v8555_v29 }
 0x212   : > { %4958 = vmatpush1.bf16.msra.mxu1 %v8556_v61  ;;  %5054 = vmatpush1.bf16.msra.mxu0 %v8557_v2 }
 0x213   : > { %4960 = vmatprep.subr.bf16.mxu1 %v8558_v15  ;;  %5056 = vmatprep.subr.bf16.mxu0 %v8559_v28 }
 0x216   : > { %4962 = vmatpush1.bf16.msra.mxu1 %v8560_v52  ;;  %5058 = vmatpush1.bf16.msra.mxu0 %v8561_v9 }
 0x217   : > { %4964 = vmatprep.subr.bf16.mxu1 %v8562_v33  ;;  %5060 = vmatprep.subr.bf16.mxu0 %v8563_v24 }
 0x21a   : > { %4966 = vmatpush1.bf16.msra.mxu1 %v8564_v62  ;;  %5062 = vmatpush1.bf16.msra.mxu0 %v8565_v42 }
 0x21b   : > { %4968 = vmatprep.subr.bf16.mxu1 %v8566_v13  ;;  %5064 = vmatprep.subr.bf16.mxu0 %v8567_v21 }
 0x21e   : > { %4970 = vmatpush1.bf16.msra.mxu1 %v8568_v47  ;;  %5066 = vmatpush1.bf16.msra.mxu0 %v8569_v20 }
 0x21f   : > { %4972 = vmatprep.subr.bf16.mxu1 %v8570_v0  ;;  %5068 = vmatprep.subr.bf16.mxu0 %v8571_v22 }
 0x222   : > { %4974 = vmatpush1.bf16.msra.mxu1 %v6420_v60  ;;  %5070 = vmatpush1.bf16.msra.mxu0 %v8572_v35 }
 0x223   : > { %4976 = vmatprep.subr.bf16.mxu1 %v6432_v4  ;;  %5072 = vmatprep.subr.bf16.mxu0 %v6434_v53  ;;  %v8574_v4 = vmov 0   ;;  %v1370_v53 = vld [vmem:[%s5286_s20] sm:$0xf]  ;;  %s4615_s20 = sshll.u32 %s5172_s27, 2 }
 0x224   : > { %v1375_v60 = vrot.slane %v1370_v53, %v8575_v32  ;;  %v1379_v19 = vrot.slane %v1370_v53, %v8578_v8  ;;  %v1387_v17 = vrot.slane %v1370_v53, %v6562_v44  ;;  %s381_s16 = scalar_lea.vmem %s8404_s5, %s4615_s20 }
 0x226   : > { %4978 = vmatpush1.bf16.msra.mxu1 %v6456_v54  ;;  %5074 = vmatpush1.bf16.msra.mxu0 %v6458_v56 }
 0x227   : > { %4980 = vmatprep.subr.bf16.mxu1 %v6465_v46  ;;  %5076 = vmatprep.subr.bf16.mxu0 %v6467_v43  ;;  %v1383_v46 = vrot.slane %v1370_v53, %v6491_v38 }
 0x22a   : > { %4982 = vmatpush1.bf16.msra.mxu1 %v6480_v18  ;;  %5078 = vmatpush1.bf16.msra.mxu0 %v6482_v41 }
 0x22d   : > { %1532 = vmatmul.mubr.f32.vlgmr.msra.gmra.mrb[6].mxu1 %v893_v12  ;;  %1674 = vmatmul.mubr.f32.vlgmr.msra.gmra.mrb[10].mxu0 %v893_v12  ;;  %v2171_v12 = vsel %vm615_vm2, 4294967295, %v5201_v45 }
 0x22e   : > { %2217 = vmatprep.mubr.bf16.mxu1 %v8574_v4  ;;  %2748 = vmatprep.mubr.bf16.mxu0 %v8574_v4 }
 0x2a0   : > { %v1223_v54 = vpop.f32.mrb[4].mxu1  ;;  %v1365_v43 = vpop.f32.mrb[8].mxu0 }
 0x2a1   : > { %v1392_v56 = vsub.f32 %v1223_v54, %v1375_v60  ;;  %v1394_v18 = vsub.f32 %v1365_v43, %v1383_v46  ;;  %v1225_v59 = vpop.f32.mrb[5].mxu1  ;;  %v1367_v41 = vpop.f32.mrb[9].mxu0 }
 0x2a2   : > { %v1393_v49 = vsub.f32 %v1225_v59, %v1379_v19  ;;  %v1395_v34 = vsub.f32 %v1367_v41, %v1387_v17  ;;  %v6791_v17 = vsel %vm2170_vm12, %v2171_v12, 0  ;;  %vm6822_vm12 = vmand %vm2105_vm15, %vm2106_vm9 }
 0x2a3   : > { %v6623_v7 = vpack.c.bf16 %v1392_v56, %v1392_v56  ;;  %v6625_v48 = vpack.c.bf16 %v1394_v18, %v1394_v18 }
 0x2a4   : > { %v6652_v40 = vpack.c.bf16 %v1393_v49, %v1393_v49  ;;  %v1710_v63 = vpack.c.bf16 %v1395_v34, %v1395_v34 }
 0x2a5   : > { %1723 = vrot.lane.b32.xlu1 %v6625_v48, %s5191_s24  ;;  %1719 = vrot.lane.b32.xlu0 %v6623_v7, %s5191_s24 }
 0x2a9   : > { %1771 = vrot.lane.b32.xlu1 %v6625_v48, %s5192_s25  ;;  %1749 = vrot.lane.b32.xlu0 %v6625_v48, %s8576_s14 }
 0x2ad   : > { %1767 = vrot.lane.b32.xlu1 %v6623_v7, %s5192_s25  ;;  %1745 = vrot.lane.b32.xlu0 %v6623_v7, %s8576_s14 }
 0x2b1   : > { %1811 = vrot.lane.b32.xlu1 %v6623_v7, %s8577_s15  ;;  %1815 = vrot.lane.b32.xlu0 %v6625_v48, %s8577_s15 }
 0x2b5   : > { %1855 = vrot.lane.b32.xlu1 %v6623_v7, %s8579_s28  ;;  %1793 = vrot.lane.b32.xlu0 %v6625_v48, %s8580_s26 }
 0x2b9   : > { %1877 = vrot.lane.b32.xlu1 %v6623_v7, %s8581_s12  ;;  %1789 = vrot.lane.b32.xlu0 %v6623_v7, %s8580_s26 }
 0x2bd   : > { %1859 = vrot.lane.b32.xlu0 %v6625_v48, %s8579_s28  ;;  %1747 = vrot.lane.b32.xlu1 %v6652_v40, %s8576_s14 }
 0x2c1   : > { %1837 = vrot.lane.b32.xlu0 %v6625_v48, %s8582_s13  ;;  %1813 = vrot.lane.b32.xlu1 %v6652_v40, %s8577_s15 }
 0x2c5   : > { %1833 = vrot.lane.b32.xlu0 %v6623_v7, %s8582_s13  ;;  %1791 = vrot.lane.b32.xlu1 %v6652_v40, %s8580_s26 }
 0x2c9   : > { %1881 = vrot.lane.b32.xlu0 %v6625_v48, %s8581_s12  ;;  %1857 = vrot.lane.b32.xlu1 %v6652_v40, %s8579_s28 }
 0x2cd   : > { %1835 = vrot.lane.b32.xlu1 %v6652_v40, %s8582_s13  ;;  %1721 = vrot.lane.b32.xlu0 %v6652_v40, %s5191_s24 }
 0x2d1   : > { %1879 = vrot.lane.b32.xlu1 %v6652_v40, %s8581_s12  ;;  %1769 = vrot.lane.b32.xlu0 %v6652_v40, %s5192_s25 }
 0x2d5   : > { %1773 = vrot.lane.b32.xlu1 %v1710_v63, %s5192_s25  ;;  %1725 = vrot.lane.b32.xlu0 %v1710_v63, %s5191_s24 }
 0x2d9   : > { %1817 = vrot.lane.b32.xlu1 %v1710_v63, %s8577_s15  ;;  %1751 = vrot.lane.b32.xlu0 %v1710_v63, %s8576_s14 }
 0x2dd   : > { %1861 = vrot.lane.b32.xlu1 %v1710_v63, %s8579_s28  ;;  %1795 = vrot.lane.b32.xlu0 %v1710_v63, %s8580_s26 }
 0x2e1   : > { %1883 = vrot.lane.b32.xlu1 %v1710_v63, %s8581_s12  ;;  %1839 = vrot.lane.b32.xlu0 %v1710_v63, %s8582_s13 }
 0x300   : > { %v1533_v27 = vpop.f32.mrb[6].mxu1  ;;  %v1675_v16 = vpop.f32.mrb[10].mxu0 }
 0x301   : > { %v1703_v30 = vsub.f32 %v1533_v27, %v1686_v6  ;;  %v1705_v37 = vsub.f32 %v1675_v16, %v1694_v11  ;;  %v1535_v26 = vpop.f32.mrb[7].mxu1  ;;  %v1677_v14 = vpop.f32.mrb[11].mxu0 }
 0x302   : > { %v1704_v38 = vsub.f32 %v1535_v26, %v1690_v10  ;;  %v1706_v29 = vsub.f32 %v1677_v14, %v1698_v36 }
 0x303   : > { %v6690_v51 = vpack.c.bf16 %v1703_v30, %v1703_v30  ;;  %v6692_v58 = vpack.c.bf16 %v1705_v37, %v1705_v37 }
 0x304   : > { %v6707_v5 = vpack.c.bf16 %v1704_v38, %v1704_v38  ;;  %v1714_v44 = vpack.c.bf16 %v1706_v29, %v1706_v29 }
 0x305   : > { %1734 = vrot.lane.b32.xlu1 %v6690_v51, %s5191_s24  ;;  %1738 = vrot.lane.b32.xlu0 %v6692_v58, %s5191_s24 }
 0x309   : > { %1778 = vrot.lane.b32.xlu1 %v6690_v51, %s5192_s25  ;;  %1782 = vrot.lane.b32.xlu0 %v6692_v58, %s5192_s25 }
 0x30d   : > { %1756 = vrot.lane.b32.xlu1 %v6690_v51, %s8576_s14  ;;  %1760 = vrot.lane.b32.xlu0 %v6692_v58, %s8576_s14 }
 0x311   : > { %1822 = vrot.lane.b32.xlu1 %v6690_v51, %s8577_s15  ;;  %1736 = vrot.lane.b32.xlu0 %v6707_v5, %s5191_s24 }
 0x315   : > { %1800 = vrot.lane.b32.xlu1 %v6690_v51, %s8580_s26  ;;  %1780 = vrot.lane.b32.xlu0 %v6707_v5, %s5192_s25 }
 0x317   : > { %v6717_v39 = vpop.permute.xlu1 %1723  ;;  %v1720_v23 = vpop.permute.xlu0 %1719 }
 0x319   : > { %1866 = vrot.lane.b32.xlu1 %v6690_v51, %s8579_s28  ;;  %1758 = vrot.lane.b32.xlu0 %v6707_v5, %s8576_s14 }
 0x31b   : > { %v6724_v3 = vpop.permute.xlu1 %1771  ;;  %v6726_v25 = vpop.permute.xlu0 %1749 }
 0x31d   : > { %1844 = vrot.lane.b32.xlu1 %v6690_v51, %s8582_s13  ;;  %1824 = vrot.lane.b32.xlu0 %v6707_v5, %s8577_s15 }
 0x31f   : > { %v6732_v61 = vpop.permute.xlu1 %1767  ;;  %v1746_v2 = vpop.permute.xlu0 %1745 }
 0x321   : > { %1888 = vrot.lane.b32.xlu1 %v6690_v51, %s8581_s12  ;;  %1802 = vrot.lane.b32.xlu0 %v6707_v5, %s8580_s26 }
 0x323   : > { %v1812_v15 = vpop.permute.xlu1 %1811  ;;  %v6738_v28 = vpop.permute.xlu0 %1815 }
 0x325   : > { %1740 = vrot.lane.b32.xlu1 %v1714_v44, %s5191_s24  ;;  %1868 = vrot.lane.b32.xlu0 %v6707_v5, %s8579_s28 }
 0x327   : > { %v1856_v52 = vpop.permute.xlu1 %1855  ;;  %v6743_v9 = vpop.permute.xlu0 %1793 }
 0x329   : > { %1784 = vrot.lane.b32.xlu1 %v1714_v44, %s5192_s25  ;;  %1846 = vrot.lane.b32.xlu0 %v6707_v5, %s8582_s13 }
 0x32b   : > { %v6748_v33 = vpop.permute.xlu1 %1877  ;;  %v1790_v24 = vpop.permute.xlu0 %1789 }
 0x32d   : > { %1762 = vrot.lane.b32.xlu1 %v1714_v44, %s8576_s14  ;;  %1890 = vrot.lane.b32.xlu0 %v6707_v5, %s8581_s12 }
 0x32f   : > { %v6753_v62 = vpop.permute.xlu0 %1859  ;;  %v1748_v42 = vpop.permute.xlu1 %1747 }
 0x330   : > { %v1753_v54 = vsel %vm8476_vm3, %v1746_v2, %v1748_v42  ;;  %v1754_v43 = vsel %vm8476_vm3, %v1748_v42, %v6726_v25  ;;  %vm2140_vm3 = vsmask.f32 3328 }
 0x331   : > { %1828 = vrot.lane.b32.xlu1 %v1714_v44, %s8577_s15  ;;  %1826 = vrot.lane.b32.xlu0 %v6692_v58, %s8577_s15  ;;  %v1923_v34 = vrot.slane %v1753_v54, 7  ;;  %v1924_v63 = vrot.slane %v1754_v43, 7  ;;  %vm6838_vm9 = vmand %vm615_vm2, %vm2140_vm3  ;;  %vm8477_vm3 = vcmask 72704  }
 0x333   : > { %v6758_v13 = vpop.permute.xlu0 %1837  ;;  %v1814_v21 = vpop.permute.xlu1 %1813 }
 0x334   : > { %v1819_v53 = vsel %vm8475_vm4, %v1812_v15, %v1814_v21  ;;  %v1820_v32 = vsel %vm8475_vm4, %v1814_v21, %v6738_v28  ;;  %vm6786_vm4 = vmand %vm2037_vm10, %vm2038_vm11 }
 0x335   : > { %1806 = vrot.lane.b32.xlu1 %v1714_v44, %s8580_s26  ;;  %1804 = vrot.lane.b32.xlu0 %v6692_v58, %s8580_s26  ;;  %v1966_v41 = vshll.u32 %v1819_v53, 16  ;;  %v1970_v8 = vshll.u32 %v1820_v32, 16  ;;  %vm6811_vm11 = vmand %vm2071_vm13, %vm2072_vm14  ;;  %vm8591_vm14 = vcmask 1031168  }
 0x337   : > { %v1834_v47 = vpop.permute.xlu0 %1833  ;;  %v1792_v20 = vpop.permute.xlu1 %1791  ;;  %v1968_v38 = vrot.slane %v1966_v41, 6 }
 0x338   : > { %v1797_v11 = vsel %vm484_vm5, %v1790_v24, %v1792_v20  ;;  %v1798_v27 = vsel %vm484_vm5, %v1792_v20, %v6743_v9 }
 0x339   : > { %1872 = vrot.lane.b32.xlu1 %v1714_v44, %s8579_s28  ;;  %1870 = vrot.lane.b32.xlu0 %v6692_v58, %s8579_s28  ;;  %v1960_v24 = vrot.slane %v1798_v27, 6  ;;  %v6860_v27 = vld [vmem:[%s381_s16] sm:$0xf] }
 0x33b   : > { %v6766_v0 = vpop.permute.xlu0 %1881  ;;  %v1858_v22 = vpop.permute.xlu1 %1857 }
 0x33c   : > { %v1863_v50 = vsel %vm553_vm6, %v1856_v52, %v1858_v22  ;;  %v1864_v6 = vsel %vm553_vm6, %v1858_v22, %v6753_v62  ;;  %v1959_v52 = vrot.slane %v1797_v11, 6 }
 0x33d   : > { %1850 = vrot.lane.b32.xlu1 %v1714_v44, %s8582_s13  ;;  %1848 = vrot.lane.b32.xlu0 %v6692_v58, %s8582_s13  ;;  %v2002_v36 = vshll.u32 %v1863_v50, 16  ;;  %v2006_v29 = vshll.u32 %v1864_v6, 16 }
 0x33f   : > { %v1722_v35 = vpop.permute.xlu0 %1721  ;;  %v1836_v56 = vpop.permute.xlu1 %1835  ;;  %v2008_v54 = vrot.slane %v2006_v29, 5 }
 0x340   : > { %v1727_v60 = vsel %vm411_vm0, %v1720_v23, %v1722_v35  ;;  %v1728_v46 = vsel %vm411_vm0, %v1722_v35, %v6717_v39  ;;  %v1972_v23 = vrot.slane %v1970_v8, 6 }
 0x341   : > { %1894 = vrot.lane.b32.xlu1 %v1714_v44, %s8581_s12  ;;  %1892 = vrot.lane.b32.xlu0 %v6692_v58, %s8581_s12  ;;  %v1900_v18 = vshll.u32 %v1727_v60, 16  ;;  %v1903_v59 = vshll.u32 %v1728_v46, 16  ;;  %v1841_v44 = vsel %vm530_vm7, %v1834_v47, %v1836_v56  ;;  %v2004_v46 = vrot.slane %v2002_v36, 5 }
 0x342   : > { %v1995_v12 = vrot.slane %v1841_v44, 5 }
 0x343   : > { %v1770_v49 = vpop.permute.xlu0 %1769  ;;  %v2040_v37 = vsel %vm6786_vm4, %v6623_v7, %v1900_v18  ;;  %v2041_v26 = vsel %vm6786_vm4, %v6652_v40, %v1903_v59  ;;  %v1880_v2 = vpop.permute.xlu1 %1879  ;;  %v1842_v7 = vsel %vm530_vm7, %v1836_v56, %v6758_v13 }
 0x344   : > { %v1775_v16 = vsel %vm461_vm1, %v6732_v61, %v1770_v49  ;;  %v1776_v30 = vsel %vm461_vm1, %v1770_v49, %v6724_v3  ;;  %v2049_v42 = vsel %vm2037_vm10, %v2040_v37, %v1923_v34  ;;  %v2053_v21 = vsel %vm2037_vm10, %v2041_v26, %v1924_v63 }
 0x345   : > { %v1930_v14 = vshll.u32 %v1775_v16, 16  ;;  %v1934_v10 = vshll.u32 %v1776_v30, 16  ;;  %v1885_v47 = vsel %vm576_vm8, %v6748_v33, %v1880_v2  ;;  %v1886_v22 = vsel %vm576_vm8, %v1880_v2, %v6766_v0 }
 0x346   : > { %v1996_v53 = vrot.slane %v1842_v7, 5  ;;  %v2031_v18 = vrot.slane %v1885_v47, 4  ;;  %v2032_v59 = vrot.slane %v1886_v22, 4 }
 0x347   : > { %v1932_v15 = vrot.slane %v1930_v14, 7  ;;  %v1936_v40 = vrot.slane %v1934_v10, 7  ;;  %v1774_v16 = vpop.permute.xlu1 %1773  ;;  %v1726_v30 = vpop.permute.xlu0 %1725 }
 0x348   : > { %v1729_v22 = vsel %vm411_vm0, %v6717_v39, %v1726_v30 }
 0x349   : > { %v2074_v35 = vsel %vm6811_vm11, %v2049_v42, %v1932_v15  ;;  %v2075_v45 = vsel %vm6811_vm11, %v2053_v21, %v1936_v40 }
 0x34a   : > { %v2083_v32 = vsel %vm2071_vm13, %v2074_v35, %v1959_v52  ;;  %v2087_v60 = vsel %vm2071_vm13, %v2075_v45, %v1960_v24  ;;  %v1777_v45 = vsel %vm461_vm1, %v6724_v3, %v1774_v16 }
 0x34b   : > { %v2108_v43 = vsel %vm6822_vm12, %v2083_v32, %v1968_v38  ;;  %v2109_v56 = vsel %vm6822_vm12, %v2087_v60, %v1972_v23  ;;  %v1818_v37 = vpop.permute.xlu1 %1817  ;;  %v1752_v26 = vpop.permute.xlu0 %1751 }
 0x34c   : > { %v2121_v41 = vsel %vm2105_vm15, %v2109_v56, %v1996_v53  ;;  %v2117_v8 = vsel %vm2105_vm15, %v2108_v43, %v1995_v12  ;;  %v1755_v35 = vsel %vm8591_vm14, %v6726_v25, %v1752_v26  ;;  %v1906_v12 = vshll.u32 %v1729_v22, 16 }
 0x34d   : > { %v2143_v49 = vsel %vm6838_vm9, %v2121_v41, %v2008_v54  ;;  %v2142_v34 = vsel %vm6838_vm9, %v2117_v8, %v2004_v46  ;;  %v1925_v46 = vrot.slane %v1755_v35, 7  ;;  %v1938_v43 = vshll.u32 %v1777_v45, 16 }
 0x34e   : > { %v2153_v63 = vsel %vm615_vm2, %v2143_v49, %v2032_v59  ;;  %v2150_v50 = vsel %vm615_vm2, %v2142_v34, %v2031_v18  ;;  %v2042_v18 = vsel %vm6786_vm4, %v6625_v48, %v1906_v12 }
 0x34f   : > { %v2175_v6 = vand.u32 %v6791_v17, %v2153_v63  ;;  %v2173_v11 = vand.u32 %v6791_v17, %v2150_v50  ;;  %v1862_v14 = vpop.permute.xlu1 %1861  ;;  %v1796_v10 = vpop.permute.xlu0 %1795  ;;  %v2057_v49 = vsel %vm2037_vm10, %v2042_v18, %v1925_v46  ;;  %v1940_v50 = vrot.slane %v1938_v43, 7 }
 0x350   : > { %v1799_v39 = vsel %vm484_vm5, %v6743_v9, %v1796_v10  ;;  %v1865_v48 = vsel %vm553_vm6, %v6753_v62, %v1862_v14 }
 0x351   : > { %2185 = vmatprep.subr.bf16.mxu1 %v2175_v6  ;;  %v1961_v34 = vrot.slane %v1799_v39, 6  ;;  %v2076_v30 = vsel %vm6811_vm11, %v2057_v49, %v1940_v50  ;;  %v2010_v62 = vshll.u32 %v1865_v48, 16 }
 0x352   : > { %2186 = vmatpush1.bf16.msra.mxu1 %v2173_v11 }
 0x353   : > { %v6865_v38 = vpop.permute.xlu1 %1883  ;;  %v1840_v23 = vpop.permute.xlu0 %1839  ;;  %v2012_v43 = vrot.slane %v2010_v62, 5 }
 0x355   : > { %4623 = vmatmul.mubr.msk.bf16.vlgmr.msra.gmra.mrb[8].mxu1 %vm8477_vm3, %v6860_v27  ;;  %vm8592_vm3 = vmmov %vm8591_vm14  ;;  %vm8593_vm14 = vcmask 883712  }
 0x356   : > { %2258 = vmatprep.mubr.bf16.mxu1 %v8574_v4  ;;  %v1821_v3 = vsel %vm8593_vm14, %v6738_v28, %v1818_v37  ;;  %v1843_v28 = vsel %vm530_vm7, %v6758_v13, %v1840_v23  ;;  %v2091_v13 = vsel %vm2071_vm13, %v2076_v30, %v1961_v34 }
 0x357   : > { %v1974_v6 = vshll.u32 %v1821_v3, 16  ;;  %v1997_v23 = vrot.slane %v1843_v28, 5 }
 0x377   : > { %v1735_v36 = vpop.permute.xlu1 %1734  ;;  %v6867_v29 = vpop.permute.xlu0 %1738 }
 0x37b   : > { %v1779_v2 = vpop.permute.xlu1 %1778  ;;  %v6869_v44 = vpop.permute.xlu0 %1782 }
 0x37f   : > { %v1757_v7 = vpop.permute.xlu1 %1756  ;;  %v6871_v15 = vpop.permute.xlu0 %1760 }
 0x383   : > { %v1823_v40 = vpop.permute.xlu1 %1822  ;;  %v6873_v52 = vpop.permute.xlu0 %1736 }
 0x384   : > { %v1742_v53 = vsel %vm411_vm0, %v1735_v36, %v6873_v52 }
 0x385   : > { %v1909_v56 = vshll.u32 %v1742_v53, 16 }
 0x387   : > { %v1801_v24 = vpop.permute.xlu1 %1800  ;;  %v6875_v42 = vpop.permute.xlu0 %1780  ;;  %v2043_v16 = vsel %vm6786_vm4, %v6690_v51, %v1909_v56 }
 0x388   : > { %v1786_v25 = vsel %vm461_vm1, %v1779_v2, %v6875_v42 }
 0x389   : > { %v1942_v63 = vshll.u32 %v1786_v25, 16 }
 0x38b   : > { %v1867_v21 = vpop.permute.xlu1 %1866  ;;  %v6877_v47 = vpop.permute.xlu0 %1758  ;;  %v1944_v2 = vrot.slane %v1942_v63, 7 }
 0x38c   : > { %v1764_v54 = vsel %vm8592_vm3, %v1757_v7, %v6877_v47  ;;  %vm8594_vm3 = vmmov %vm8593_vm14  ;;  %vm8595_vm14 = vcmask 1031168  }
 0x38d   : > { %v1926_v59 = vrot.slane %v1764_v54, 7 }
 0x38f   : > { %v1845_v32 = vpop.permute.xlu1 %1844  ;;  %v6887_v60 = vpop.permute.xlu0 %1824  ;;  %v2061_v37 = vsel %vm2037_vm10, %v2043_v16, %v1926_v59 }
 0x390   : > { %v1830_v11 = vsel %vm8594_vm3, %v1823_v40, %v6887_v60  ;;  %v1976_v40 = vrot.slane %v1974_v6, 6  ;;  %v2077_v51 = vsel %vm6811_vm11, %v2061_v37, %v1944_v2  ;;  %v1765_v6 = vsel %vm8595_vm14, %v6877_v47, %v6871_v15  ;;  %vm8596_vm3 = vmmov %vm8595_vm14 }
 0x391   : > { %v1978_v7 = vshll.u32 %v1830_v11, 16  ;;  %vm8597_vm14 = vcmask 883712  }
 0x393   : > { %v1889_v41 = vpop.permute.xlu1 %1888  ;;  %v6900_v8 = vpop.permute.xlu0 %1802  ;;  %v1980_v53 = vrot.slane %v1978_v7, 6 }
 0x394   : > { %v1808_v9 = vsel %vm484_vm5, %v1801_v24, %v6900_v8  ;;  %v2110_v24 = vsel %vm6822_vm12, %v2091_v13, %v1976_v40 }
 0x395   : > { %v1962_v26 = vrot.slane %v1808_v9, 6  ;;  %v2125_v12 = vsel %vm2105_vm15, %v2110_v24, %v1997_v23 }
 0x396   : > { %v2144_v3 = vsel %vm6838_vm9, %v2125_v12, %v2012_v43 }
 0x397   : > { %v1741_v10 = vpop.permute.xlu1 %1740  ;;  %v6917_v36 = vpop.permute.xlu0 %1868  ;;  %v2095_v22 = vsel %vm2071_vm13, %v2077_v51, %v1962_v26  ;;  %v1927_v26 = vrot.slane %v1765_v6, 7 }
 0x398   : > { %v1874_v14 = vsel %vm553_vm6, %v1867_v21, %v6917_v36  ;;  %v1887_v21 = vsel %vm576_vm8, %v6766_v0, %v6865_v38  ;;  %v2111_v25 = vsel %vm6822_vm12, %v2095_v22, %v1980_v53  ;;  %v1743_v0 = vsel %vm411_vm0, %v6873_v52, %v6867_v29 }
 0x399   : > { %v2014_v46 = vshll.u32 %v1874_v14, 16  ;;  %v2033_v49 = vrot.slane %v1887_v21, 4  ;;  %v1744_v38 = vsel %vm411_vm0, %v6867_v29, %v1741_v10  ;;  %v1787_v29 = vsel %vm461_vm1, %v6875_v42, %v6869_v44 }
 0x39a   : > { %v1912_v30 = vshll.u32 %v1743_v0, 16  ;;  %v1915_v37 = vshll.u32 %v1744_v38, 16 }
 0x39b   : > { %v1785_v35 = vpop.permute.xlu1 %1784  ;;  %v6927_v45 = vpop.permute.xlu0 %1846  ;;  %v2016_v34 = vrot.slane %v2014_v46, 5  ;;  %v2156_v50 = vsel %vm615_vm2, %v2144_v3, %v2033_v49 }
 0x39c   : > { %v1852_v54 = vsel %vm530_vm7, %v1845_v32, %v6927_v45  ;;  %v1788_v52 = vsel %vm461_vm1, %v6869_v44, %v1785_v35  ;;  %v2177_v47 = vand.u32 %v6791_v17, %v2156_v50  ;;  %v2044_v62 = vsel %vm6786_vm4, %v6707_v5, %v1912_v30 }
 0x39d   : > { %v1998_v39 = vrot.slane %v1852_v54, 5  ;;  %v1950_v13 = vshll.u32 %v1788_v52, 16  ;;  %v2045_v14 = vsel %vm6786_vm4, %v6692_v58, %v1915_v37  ;;  %v2065_v51 = vsel %vm2037_vm10, %v2044_v62, %v1927_v26 }
 0x39f   : > { %v2129_v56 = vsel %vm2105_vm15, %v2111_v25, %v1998_v39  ;;  %v1763_v18 = vpop.permute.xlu1 %1762  ;;  %v6940_v59 = vpop.permute.xlu0 %1890  ;;  %v1952_v46 = vrot.slane %v1950_v13, 7  ;;  %v8602_v13 = vld [vmem:[#allocation31_spill] sm:$0xff] }
 0x3a0   : > { %v1896_v32 = vsel %vm576_vm8, %v1889_v41, %v6940_v59  ;;  %v2145_v9 = vsel %vm6838_vm9, %v2129_v56, %v2016_v34  ;;  %v1766_v41 = vsel %vm8596_vm3, %v6871_v15, %v1763_v18  ;;  %v1946_v15 = vshll.u32 %v1787_v29, 16  ;;  %vm8598_vm3 = vmmov %vm8597_vm14 }
 0x3a1   : > { %v2034_v63 = vrot.slane %v1896_v32, 4  ;;  %v1928_v10 = vrot.slane %v1766_v41, 7 }
 0x3a2   : > { %v1948_v5 = vrot.slane %v1946_v15, 7 }
 0x3a3   : > { %v1829_v28 = vpop.permute.xlu1 %1828  ;;  %v1827_v11 = vpop.permute.xlu0 %1826  ;;  %v2159_v48 = vsel %vm615_vm2, %v2145_v9, %v2034_v63  ;;  %v2069_v24 = vsel %vm2037_vm10, %v2045_v14, %v1928_v10  ;;  %v8601_v10 = vld [vmem:[#allocation30_spill] sm:$0xff]  ;;  %vm2323_vm10 = vcmask 154624  }
 0x3a4   : > { %v2179_v16 = vand.u32 %v6791_v17, %v2159_v48  ;;  %v1831_v42 = vsel %vm8597_vm14, %v6887_v60, %v1827_v11  ;;  %v1832_v7 = vsel %vm8598_vm3, %v1827_v11, %v1829_v28  ;;  %vm8599_vm14 = vcmask 72704  }
 0x3a5   : > { %v1982_v60 = vshll.u32 %v1831_v42, 16  ;;  %v1986_v22 = vshll.u32 %v1832_v7, 16  ;;  %v2079_v54 = vsel %vm6811_vm11, %v2069_v24, %v1952_v46  ;;  %v2078_v43 = vsel %vm6811_vm11, %v2065_v51, %v1948_v5  ;;  %vm8600_vm4 = vmmov %vm8599_vm14 }
 0x3a6   : > { %2226 = vmatprep.subr.bf16.mxu1 %v2179_v16  ;;  %vm8604_vm11 = vmmov %vm8598_vm3 }
 0x3a7   : > { %v1807_v23 = vpop.permute.xlu1 %1806  ;;  %2227 = vmatpush1.bf16.msra.mxu1 %v2177_v47  ;;  %v1805_v2 = vpop.permute.xlu0 %1804  ;;  %v1984_v21 = vrot.slane %v1982_v60, 6  ;;  %v1988_v39 = vrot.slane %v1986_v22, 6 }
 0x3a8   : > { %v1809_v44 = vsel %vm484_vm5, %v6900_v8, %v1805_v2  ;;  %v1810_v40 = vsel %vm484_vm5, %v1805_v2, %v1807_v23 }
 0x3a9   : > { %v1963_v8 = vrot.slane %v1809_v44, 6  ;;  %v1964_v35 = vrot.slane %v1810_v40, 6 }
 0x3aa   : > { %4624 = vmatmul.mubr.msk.bf16.vlgmr.msra.gmra.mrb[12].mxu1 %vm8599_vm14, %v6860_v27 }
 0x3ab   : > { %v1873_v12 = vpop.permute.xlu1 %1872  ;;  %v1871_v53 = vpop.permute.xlu0 %1870  ;;  %2299 = vmatprep.mubr.bf16.mxu1 %v8574_v4  ;;  %v2099_v25 = vsel %vm2071_vm13, %v2078_v43, %v1963_v8  ;;  %v2103_v3 = vsel %vm2071_vm13, %v2079_v54, %v1964_v35  ;;  %vm2334_vm13 = vcmask 1047704  }
 0x3ac   : > { %v1875_v58 = vsel %vm553_vm6, %v6917_v36, %v1871_v53  ;;  %v1876_v19 = vsel %vm553_vm6, %v1871_v53, %v1873_v12  ;;  %v2112_v61 = vsel %vm6822_vm12, %v2099_v25, %v1984_v21  ;;  %v2113_v38 = vsel %vm6822_vm12, %v2103_v3, %v1988_v39  ;;  %v5142_v12 = vld [vmem:[%s5291_s23] sm:$0xff]  ;;  %v5144_v3 = vld [vmem:[%s5291_s23 + $0x18] sm:$0xff] }
 0x3ad   : > { %v2018_v49 = vshll.u32 %v1875_v58, 16  ;;  %v2022_v34 = vshll.u32 %v1876_v19, 16  ;;  %v5143_v58 = vld [vmem:[%s5291_s23 + $0x8] sm:$0xff] }
 0x3af   : > { %v1851_v56 = vpop.permute.xlu1 %1850  ;;  %v1849_v18 = vpop.permute.xlu0 %1848  ;;  %v2020_v28 = vrot.slane %v2018_v49, 5  ;;  %v2024_v11 = vrot.slane %v2022_v34, 5  ;;  %v5145_v49 = vld [vmem:[%s5291_s23 + $0x10] sm:$0xff] }
 0x3b0   : > { %v1853_v36 = vsel %vm530_vm7, %v6927_v45, %v1849_v18  ;;  %v1854_v32 = vsel %vm530_vm7, %v1849_v18, %v1851_v56 }
 0x3b1   : > { %v1999_v63 = vrot.slane %v1853_v36, 5  ;;  %v2000_v0 = vrot.slane %v1854_v32, 5  ;;  %v5146_v36 = vld [vmem:[%s5291_s23 + $0x20] sm:$0xff] }
 0x3b3   : > { %v2133_v9 = vsel %vm2105_vm15, %v2112_v61, %v1999_v63  ;;  %v2137_v50 = vsel %vm2105_vm15, %v2113_v38, %v2000_v0  ;;  %v1895_v6 = vpop.permute.xlu1 %1894  ;;  %v1893_v41 = vpop.permute.xlu0 %1892  ;;  %vm8603_vm15 = vcmask 1031168  }
 0x3b4   : > { %v1897_v45 = vsel %vm576_vm8, %v6940_v59, %v1893_v41  ;;  %v1898_v48 = vsel %vm576_vm8, %v1893_v41, %v1895_v6  ;;  %v2146_v16 = vsel %vm6838_vm9, %v2133_v9, %v2020_v28  ;;  %v2147_v20 = vsel %vm6838_vm9, %v2137_v50, %v2024_v11  ;;  %v5147_v50 = vld [vmem:[%s5291_s23 + $0x28] sm:$0xff]  ;;  %v5148_v28 = vld [vmem:[%s5291_s23 + $0x38] sm:$0xff]  ;;  %vm8605_vm12 = vmmov %vm8603_vm15 }
 0x3b5   : > { %v2035_v29 = vrot.slane %v1897_v45, 4  ;;  %v2036_v52 = vrot.slane %v1898_v48, 4  ;;  %v5149_v45 = vld [vmem:[%s5291_s23 + $0x30] sm:$0xff]  ;;  %vm8606_vm9 = vmmov %vm8598_vm3  ;;  %vm8607_vm3 = vcmask 588800  }
 0x3b6   : > { %vm8608_vm14 = vmmov %vm8605_vm12 }
 0x3b7   : > { %v2162_v30 = vsel %vm615_vm2, %v2146_v16, %v2035_v29  ;;  %v2165_v37 = vsel %vm615_vm2, %v2147_v20, %v2036_v52 }
 0x3b8   : > { %v2183_v47 = vand.u32 %v6791_v17, %v2165_v37  ;;  %v2181_v26 = vand.u32 %v6791_v17, %v2162_v30 }
 0x3ba   : > { %2267 = vmatprep.subr.bf16.mxu1 %v2183_v47 }
 0x3bb   : > { %2268 = vmatpush1.bf16.msra.mxu1 %v2181_v26 }
 0x3be   : > { %4625 = vmatmul.mubr.msk.bf16.vlgmr.msra.gmra.mrb[16].mxu1 %vm8600_vm4, %v6860_v27  ;;  %vm8609_vm4 = vmmov %vm8605_vm12 }
 0x3bf   : > { %2789 = vmatprep.mubr.bf16.mxu1 %v8574_v4 }
 0x428   : > { %v2219_v59 = vpop.f32.mrb[8].mxu1 }
 0x429   : > { %v2308_v15 = vmul.f32 %v2219_v59, %v8601_v10  ;;  %v2221_v33 = vpop.f32.mrb[9].mxu1 }
 0x42a   : > { %v2309_v23 = vmul.f32 %v2221_v33, %v8602_v13  ;;  %v2223_v2 = vpop.f32.mrb[10].mxu1 }
 0x42b   : > { %2317 = vrot.lane.b32.xlu0 %v2308_v15, %s5202_s17  ;;  %v2224_v42 = vpop.f32.mrb[11].mxu1 }
 0x42c   : > { %2319 = vrot.lane.b32.xlu1 %v2309_v23, %s5202_s17 }
 0x47d   : > { %v2260_v17 = vpop.f32.mrb[12].mxu1 }
 0x47e   : > { %v2310_v7 = vmul.f32 %v2260_v17, %v6495_v55  ;;  %v2262_v44 = vpop.f32.mrb[13].mxu1 }
 0x47f   : > { %v2311_v27 = vmul.f32 %v2262_v44, %v6570_v1  ;;  %v2264_v40 = vpop.f32.mrb[14].mxu1 }
 0x480   : > { %2321 = vrot.lane.b32.xlu0 %v2310_v7, %s5202_s17  ;;  %v2265_v62 = vpop.f32.mrb[15].mxu1  ;;  %v2385_v7 = vld [vmem:[%s7171_s21] sm:$0xff] }
 0x481   : > { %2342 = vrot.lane.b32.xlu1 %v2311_v27, %s5202_s17 }
 0x491   : > { %v2301_v14 = vpop.f32.mrb[16].mxu1 }
 0x492   : > { %v2312_v51 = vmul.f32 %v2301_v14, %v6530_v31  ;;  %v2303_v24 = vpop.f32.mrb[17].mxu1 }
 0x493   : > { %v2313_v60 = vmul.f32 %v2303_v24, %v6610_v57  ;;  %v2305_v22 = vpop.f32.mrb[18].mxu1 }
 0x494   : > { %2344 = vrot.lane.b32.xlu0 %v2312_v51, %s5202_s17  ;;  %v2306_v8 = vpop.f32.mrb[19].mxu1 }
 0x495   : > { %2346 = vrot.lane.b32.xlu1 %v2313_v60, %s5202_s17 }
 0x49d   : > { %v2318_v35 = vpop.permute.xlu0 %2317 }
 0x49e   : > { %v2330_v53 = vsub.f32 %v5142_v12, %v2318_v35  ;;  %v2320_v5 = vpop.permute.xlu1 %2319 }
 0x49f   : > { %v2324_v46 = vsel %vm2323_vm10, %v2318_v35, %v2320_v5 }
 0x4a0   : > { %2335 = vst.msk [vmem:[#allocation2] sm:$0xff] %vm2334_vm13, %v2330_v53  ;;  %v2331_v19 = vsub.f32 %v5143_v58, %v2324_v46 }
 0x4a2   : > { %2336 = vst [vmem:[#allocation2 + $0x8] sm:$0xff] %v2331_v19  ;;  %v7044_v21 = vpack.c.bf16 %v2331_v19, %v2331_v19 }
 0x4a7   : > { %v2363_v54 = vld [vmem:[#allocation2] sm:$0xff] }
 0x4a8   : > { %v7030_v43 = vpack.c.bf16 %v2363_v54, %v2363_v54 }
 0x4aa   : > { %2390 = vrot.lane.b32.xlu0 %v7030_v43, %s5191_s24  ;;  %2438 = vrot.lane.b32.xlu1 %v7030_v43, %s5192_s25 }
 0x4ae   : > { %2416 = vrot.lane.b32.xlu0 %v7030_v43, %s8576_s14  ;;  %2482 = vrot.lane.b32.xlu1 %v7030_v43, %s8577_s15 }
 0x4b2   : > { %2460 = vrot.lane.b32.xlu0 %v7030_v43, %s8580_s26  ;;  %2526 = vrot.lane.b32.xlu1 %v7030_v43, %s8579_s28 }
 0x4b6   : > { %2504 = vrot.lane.b32.xlu0 %v7030_v43, %s8582_s13  ;;  %2548 = vrot.lane.b32.xlu1 %v7030_v43, %s8581_s12 }
 0x4ba   : > { %2392 = vrot.lane.b32.xlu0 %v7044_v21, %s5191_s24  ;;  %2440 = vrot.lane.b32.xlu1 %v7044_v21, %s5192_s25 }
 0x4be   : > { %2418 = vrot.lane.b32.xlu0 %v7044_v21, %s8576_s14  ;;  %2484 = vrot.lane.b32.xlu1 %v7044_v21, %s8577_s15 }
 0x4c2   : > { %2462 = vrot.lane.b32.xlu0 %v7044_v21, %s8580_s26  ;;  %2528 = vrot.lane.b32.xlu1 %v7044_v21, %s8579_s28 }
 0x4c6   : > { %2506 = vrot.lane.b32.xlu0 %v7044_v21, %s8582_s13 }
 0x4ca   : > { %2550 = vrot.lane.b32.xlu0 %v7044_v21, %s8581_s12 }
 0x4f2   : > { %v2322_v39 = vpop.permute.xlu0 %2321 }
 0x4f3   : > { %v2325_v25 = vsel %vm2323_vm10, %v2320_v5, %v2322_v39  ;;  %v2333_v56 = vsub.f32 %v5144_v3, %v2322_v39  ;;  %v2343_v18 = vpop.permute.xlu1 %2342 }
 0x4f4   : > { %v2332_v34 = vsub.f32 %v5145_v49, %v2325_v25  ;;  %v2354_v32 = vsub.f32 %v5146_v36, %v2343_v18 }
 0x4f5   : > { %2338 = vst.msk [vmem:[#allocation2 + $0x18] sm:$0xff] %vm2323_vm10, %v2333_v56 }
 0x4f6   : > { %2337 = vst [vmem:[#allocation2 + $0x10] sm:$0xff] %v2332_v34  ;;  %2359 = vst.msk [vmem:[#allocation2 + $0x20] sm:$0xff] %vm2334_vm13, %v2354_v32  ;;  %v7086_v29 = vpack.c.bf16 %v2332_v34, %v2332_v34 }
 0x4fc   : > { %v2366_v63 = vld [vmem:[#allocation2 + $0x18] sm:$0xff] }
 0x4fd   : > { %v2374_v0 = vpack.c.bf16 %v2366_v63, %v2366_v63  ;;  %v2367_v52 = vld [vmem:[#allocation2 + $0x20] sm:$0xff] }
 0x4fe   : > { %v7100_v16 = vpack.c.bf16 %v2367_v52, %v2367_v52 }
 0x4ff   : > { %2444 = vrot.lane.b32.xlu1 %v2374_v0, %s5192_s25  ;;  %2396 = vrot.lane.b32.xlu0 %v2374_v0, %s5191_s24 }
 0x503   : > { %2488 = vrot.lane.b32.xlu1 %v2374_v0, %s8577_s15  ;;  %2422 = vrot.lane.b32.xlu0 %v2374_v0, %s8576_s14 }
 0x506   : > { %v2345_v61 = vpop.permute.xlu0 %2344 }
 0x507   : > { %v2348_v38 = vsel %vm2323_vm10, %v2343_v18, %v2345_v61  ;;  %2532 = vrot.lane.b32.xlu1 %v2374_v0, %s8579_s28  ;;  %2466 = vrot.lane.b32.xlu0 %v2374_v0, %s8580_s26  ;;  %v2347_v9 = vpop.permute.xlu1 %2346 }
 0x508   : > { %v2355_v6 = vsub.f32 %v5147_v50, %v2348_v38  ;;  %v2349_v41 = vsel %vm2323_vm10, %v2345_v61, %v2347_v9  ;;  %v2357_v11 = vsub.f32 %v5148_v28, %v2347_v9 }
 0x509   : > { %v2356_v48 = vsub.f32 %v5149_v45, %v2349_v41 }
 0x50a   : > { %2360 = vst [vmem:[#allocation2 + $0x28] sm:$0xff] %v2355_v6  ;;  %2362 = vst.msk [vmem:[#allocation2 + $0x38] sm:$0xff] %vm2323_vm10, %v2357_v11  ;;  %v7118_v30 = vpack.c.bf16 %v2355_v6, %v2355_v6 }
 0x50b   : > { %2554 = vrot.lane.b32.xlu1 %v2374_v0, %s8581_s12  ;;  %2510 = vrot.lane.b32.xlu0 %v2374_v0, %s8582_s13  ;;  %2361 = vst [vmem:[#allocation2 + $0x30] sm:$0xff] %v2356_v48  ;;  %v7139_v26 = vpack.c.bf16 %v2356_v48, %v2356_v48 }
 0x50f   : > { %2442 = vrot.lane.b32.xlu0 %v7086_v29, %s5192_s25  ;;  %2394 = vrot.lane.b32.xlu1 %v7086_v29, %s5191_s24 }
 0x511   : > { %v2370_v20 = vld [vmem:[#allocation2 + $0x38] sm:$0xff] }
 0x512   : > { %v2378_v37 = vpack.c.bf16 %v2370_v20, %v2370_v20 }
 0x513   : > { %2486 = vrot.lane.b32.xlu0 %v7086_v29, %s8577_s15  ;;  %2420 = vrot.lane.b32.xlu1 %v7086_v29, %s8576_s14 }
 0x517   : > { %2530 = vrot.lane.b32.xlu0 %v7086_v29, %s8579_s28  ;;  %2464 = vrot.lane.b32.xlu1 %v7086_v29, %s8580_s26 }
 0x51b   : > { %2405 = vrot.lane.b32.xlu0 %v7100_v16, %s5191_s24  ;;  %2508 = vrot.lane.b32.xlu1 %v7086_v29, %s8582_s13 }
 0x51c   : > { %v2391_v47 = vpop.permute.xlu0 %2390  ;;  %v2439_v15 = vpop.permute.xlu1 %2438 }
 0x51f   : > { %2427 = vrot.lane.b32.xlu0 %v7100_v16, %s8576_s14  ;;  %2552 = vrot.lane.b32.xlu1 %v7086_v29, %s8581_s12 }
 0x520   : > { %v2417_v59 = vpop.permute.xlu0 %2416  ;;  %v2483_v23 = vpop.permute.xlu1 %2482 }
 0x523   : > { %2471 = vrot.lane.b32.xlu0 %v7100_v16, %s8580_s26  ;;  %2449 = vrot.lane.b32.xlu1 %v7100_v16, %s5192_s25 }
 0x524   : > { %v7148_v33 = vpop.permute.xlu0 %2460  ;;  %v2527_v42 = vpop.permute.xlu1 %2526 }
 0x527   : > { %2515 = vrot.lane.b32.xlu0 %v7100_v16, %s8582_s13  ;;  %2493 = vrot.lane.b32.xlu1 %v7100_v16, %s8577_s15 }
 0x528   : > { %v7157_v2 = vpop.permute.xlu0 %2504  ;;  %v7174_v44 = vpop.permute.xlu1 %2548 }
 0x52b   : > { %2537 = vrot.lane.b32.xlu1 %v7100_v16, %s8579_s28  ;;  %2451 = vrot.lane.b32.xlu0 %v7118_v30, %s5192_s25 }
 0x52c   : > { %v2393_v17 = vpop.permute.xlu0 %2392  ;;  %v2441_v40 = vpop.permute.xlu1 %2440 }
 0x52d   : > { %v2398_v19 = vsel %vm411_vm0, %v2391_v47, %v2393_v17  ;;  %v2446_v18 = vsel %vm461_vm1, %v2439_v15, %v2441_v40 }
 0x52e   : > { %v2570_v25 = vrot.slane %v2398_v19, 4  ;;  %v2576_v0 = vrot.slane %v2446_v18, 4 }
 0x52f   : > { %2455 = vrot.lane.b32.xlu0 %v2378_v37, %s5192_s25  ;;  %2407 = vrot.lane.b32.xlu1 %v7118_v30, %s5191_s24 }
 0x530   : > { %v2419_v27 = vpop.permute.xlu0 %2418  ;;  %v2485_v14 = vpop.permute.xlu1 %2484  ;;  %v2596_v9 = vsel %vm615_vm2, %v7030_v43, %v2570_v25 }
 0x531   : > { %v2424_v50 = vsel %vm8605_vm12, %v2417_v59, %v2419_v27  ;;  %v2490_v6 = vsel %vm8606_vm9, %v2483_v23, %v2485_v14  ;;  %vm8612_vm12 = vmmov %vm8609_vm4 }
 0x532   : > { %v2582_v45 = vrot.slane %v2490_v6, 4  ;;  %v2620_v52 = vsel %vm615_vm2, %v2424_v50, %v2576_v0 }
 0x533   : > { %2495 = vrot.lane.b32.xlu0 %v7118_v30, %s8577_s15  ;;  %2411 = vrot.lane.b32.xlu1 %v2378_v37, %s5191_s24 }
 0x534   : > { %v2463_v62 = vpop.permute.xlu0 %2462  ;;  %v2529_v24 = vpop.permute.xlu1 %2528 }
 0x535   : > { %v2468_v20 = vsel %vm484_vm5, %v7148_v33, %v2463_v62 }
 0x537   : > { %2499 = vrot.lane.b32.xlu0 %v2378_v37, %s8577_s15  ;;  %2429 = vrot.lane.b32.xlu1 %v7118_v30, %s8576_s14 }
 0x538   : > { %v2507_v51 = vpop.permute.xlu0 %2506 }
 0x539   : > { %v2512_v33 = vsel %vm530_vm7, %v7157_v2, %v2507_v51 }
 0x53b   : > { %2539 = vrot.lane.b32.xlu0 %v7118_v30, %s8579_s28  ;;  %2433 = vrot.lane.b32.xlu1 %v2378_v37, %s8576_s14 }
 0x53c   : > { %v2551_v60 = vpop.permute.xlu0 %2550 }
 0x53d   : > { %v2556_v19 = vsel %vm576_vm8, %v7174_v44, %v2551_v60 }
 0x53e   : > { %v2699_v25 = vsel %vm615_vm2, %v2556_v19, 0 }
 0x53f   : > { %2543 = vrot.lane.b32.xlu0 %v2378_v37, %s8579_s28  ;;  %2473 = vrot.lane.b32.xlu1 %v7118_v30, %s8580_s26 }
 0x543   : > { %2409 = vrot.lane.b32.xlu0 %v7139_v26, %s5191_s24  ;;  %2477 = vrot.lane.b32.xlu1 %v2378_v37, %s8580_s26 }
 0x547   : > { %2431 = vrot.lane.b32.xlu0 %v7139_v26, %s8576_s14  ;;  %2517 = vrot.lane.b32.xlu1 %v7118_v30, %s8582_s13 }
 0x54b   : > { %2475 = vrot.lane.b32.xlu0 %v7139_v26, %s8580_s26  ;;  %2521 = vrot.lane.b32.xlu1 %v2378_v37, %s8582_s13 }
 0x54f   : > { %2519 = vrot.lane.b32.xlu0 %v7139_v26, %s8582_s13  ;;  %2453 = vrot.lane.b32.xlu1 %v7139_v26, %s5192_s25 }
 0x553   : > { %2559 = vrot.lane.b32.xlu0 %v7100_v16, %s8581_s12  ;;  %2497 = vrot.lane.b32.xlu1 %v7139_v26, %s8577_s15 }
 0x557   : > { %2563 = vrot.lane.b32.xlu0 %v7139_v26, %s8581_s12  ;;  %2541 = vrot.lane.b32.xlu1 %v7139_v26, %s8579_s28 }
 0x55b   : > { %2561 = vrot.lane.b32.xlu1 %v7118_v30, %s8581_s12  ;;  %2692 = vperm.xlu0 %5140, %v2385_v7  }
 0x55f   : > { %2565 = vrot.lane.b32.xlu1 %v2378_v37, %s8581_s12  ;;  %v2534_v37 = vsel %vm553_vm6, %v2527_v42, %v2529_v24 }
 0x571   : > { %v7179_v22 = vpop.permute.xlu1 %2444  ;;  %v7181_v8 = vpop.permute.xlu0 %2396 }
 0x575   : > { %v7183_v35 = vpop.permute.xlu1 %2488  ;;  %v7185_v12 = vpop.permute.xlu0 %2422 }
 0x579   : > { %v7187_v53 = vpop.permute.xlu1 %2532  ;;  %v7189_v5 = vpop.permute.xlu0 %2466 }
 0x57d   : > { %v7191_v46 = vpop.permute.xlu1 %2554  ;;  %v7193_v58 = vpop.permute.xlu0 %2510 }
 0x581   : > { %v7196_v54 = vpop.permute.xlu1 %2394  ;;  %v7198_v39 = vpop.permute.xlu0 %2442 }
 0x582   : > { %v2399_v3 = vsel %vm411_vm0, %v2393_v17, %v7196_v54  ;;  %v2447_v56 = vsel %vm461_vm1, %v2441_v40, %v7198_v39  ;;  %v2588_v17 = vrot.slane %v2534_v37, 4 }
 0x583   : > { %v2571_v49 = vrot.slane %v2399_v3, 4  ;;  %v2577_v34 = vrot.slane %v2447_v56, 4  ;;  %v7257_v3 = vld [vmem:[%s7253_s19] sm:$0xf] }
 0x585   : > { %v7205_v36 = vpop.permute.xlu1 %2420  ;;  %v7207_v32 = vpop.permute.xlu0 %2486  ;;  %v2600_v63 = vsel %vm615_vm2, %v7044_v21, %v2571_v49  ;;  %v2400_v49 = vsel %vm411_vm0, %v7196_v54, %v7181_v8  ;;  %v2448_v54 = vsel %vm461_vm1, %v7198_v39, %v7179_v22 }
 0x586   : > { %v2425_v61 = vsel %vm8603_vm15, %v2419_v27, %v7205_v36  ;;  %v2491_v38 = vsel %vm8604_vm11, %v2485_v14, %v7207_v32  ;;  %2716 = vmatprep.subr.bf16.mxu0 %v2600_v63  ;;  %v2644_v27 = vsel %vm615_vm2, %v2468_v20, %v2582_v45  ;;  %v2668_v14 = vsel %vm615_vm2, %v2512_v33, %v2588_v17  ;;  %vm8610_vm15 = vmmov %vm8606_vm9 }
 0x587   : > { %2717 = vmatpush1.bf16.msra.mxu0 %v2596_v9  ;;  %v2624_v41 = vsel %vm615_vm2, %v2425_v61, %v2577_v34  ;;  %v2583_v21 = vrot.slane %v2491_v38, 4  ;;  %v2572_v0 = vrot.slane %v2400_v49, 4  ;;  %vm8611_vm11 = vmmov %vm8606_vm9 }
 0x588   : > { %2718 = vmatprep.subr.bf16.mxu0 %v2624_v41  ;;  %vm8613_vm9 = vmmov %vm8609_vm4 }
 0x589   : > { %v7220_v28 = vpop.permute.xlu1 %2464  ;;  %v7222_v11 = vpop.permute.xlu0 %2530  ;;  %v2604_v8 = vsel %vm615_vm2, %v7086_v29, %v2572_v0 }
 0x58a   : > { %v2469_v48 = vsel %vm484_vm5, %v2463_v62, %v7220_v28  ;;  %v2535_v43 = vsel %vm553_vm6, %v2529_v24, %v7222_v11  ;;  %v2470_v39 = vsel %vm484_vm5, %v7220_v28, %v7189_v5  ;;  %v2536_v28 = vsel %vm553_vm6, %v7222_v11, %v7187_v53 }
 0x58b   : > { %2719 = vmatpush1.bf16.msra.mxu0 %v2620_v52  ;;  %v2648_v47 = vsel %vm615_vm2, %v2469_v48, %v2583_v21  ;;  %v2589_v59 = vrot.slane %v2535_v43, 4  ;;  %v2426_v21 = vsel %vm8608_vm14, %v7205_v36, %v7185_v12  ;;  %v2492_v12 = vsel %vm8611_vm11, %v7207_v32, %v7183_v35 }
 0x58c   : > { %2720 = vmatprep.subr.bf16.mxu0 %v2648_v47  ;;  %v2584_v17 = vrot.slane %v2492_v12, 4  ;;  %v2590_v49 = vrot.slane %v2536_v28, 4 }
 0x58d   : > { %v7233_v15 = vpop.permute.xlu1 %2508  ;;  %v2406_v23 = vpop.permute.xlu0 %2405 }
 0x58e   : > { %v2513_v7 = vsel %vm530_vm7, %v2507_v51, %v7233_v15  ;;  %v2652_v33 = vsel %vm615_vm2, %v2470_v39, %v2584_v17  ;;  %v2514_v19 = vsel %vm530_vm7, %v7233_v15, %v7193_v58 }
 0x58f   : > { %2721 = vmatpush1.bf16.msra.mxu0 %v2644_v27  ;;  %v2672_v42 = vsel %vm615_vm2, %v2513_v7, %v2589_v59  ;;  %v2676_v11 = vsel %vm615_vm2, %v2514_v19, %v2590_v49 }
 0x590   : > { %2722 = vmatprep.subr.bf16.mxu0 %v2672_v42 }
 0x591   : > { %v7241_v40 = vpop.permute.xlu1 %2552  ;;  %v2428_v62 = vpop.permute.xlu0 %2427 }
 0x592   : > { %v2557_v24 = vsel %vm576_vm8, %v2551_v60, %v7241_v40  ;;  %v2558_v39 = vsel %vm576_vm8, %v7241_v40, %v7191_v46 }
 0x593   : > { %2723 = vmatpush1.bf16.msra.mxu0 %v2668_v14 }
 0x594   : > { %4629 = vmatprep.subr.msk.bf16.mxu0 %vm615_vm2, %v2557_v24 }
 0x595   : > { %v2450_v2 = vpop.permute.xlu1 %2449  ;;  %v2472_v51 = vpop.permute.xlu0 %2471 }
 0x597   : > { %2725 = vmatpush1.bf16.msra.mxu0 %v2699_v25 }
 0x599   : > { %v2494_v56 = vpop.permute.xlu1 %2493  ;;  %v2516_v18 = vpop.permute.xlu0 %2515 }
 0x59a   : > { %4630 = vmatmul.mubr.msk.bf16.vlgmr.msra.gmra.mrb[12].mxu0 %vm8607_vm3, %v7257_v3  ;;  %vm8614_vm3 = vmmov %vm8611_vm11 }
 0x59b   : > { %2830 = vmatprep.mubr.bf16.mxu0 %v8574_v4  ;;  %vm8615_vm14 = vmmov %vm8614_vm3 }
 0x59c   : > { %vm8618_vm11 = vmmov %vm8613_vm9 }
 0x59d   : > { %v2538_v44 = vpop.permute.xlu1 %2537  ;;  %v7262_v60 = vpop.permute.xlu0 %2451 }
 0x59e   : > { %v2457_v41 = vsel %vm461_vm1, %v2450_v2, %v7262_v60 }
 0x59f   : > { %v2579_v45 = vrot.slane %v2457_v41, 4 }
 0x5a1   : > { %v2408_v34 = vpop.permute.xlu1 %2407  ;;  %v7267_v63 = vpop.permute.xlu0 %2455 }
 0x5a2   : > { %v2413_v61 = vsel %vm411_vm0, %v2406_v23, %v2408_v34 }
 0x5a3   : > { %v2573_v38 = vrot.slane %v2413_v61, 4 }
 0x5a5   : > { %v2412_v9 = vpop.permute.xlu1 %2411  ;;  %v7270_v50 = vpop.permute.xlu0 %2495  ;;  %v2608_v6 = vsel %vm615_vm2, %v7100_v16, %v2573_v38  ;;  %v2578_v16 = vrot.slane %v2448_v54, 4 }
 0x5a6   : > { %2757 = vmatprep.subr.bf16.mxu1 %v2608_v6  ;;  %v2501_v22 = vsel %vm8610_vm15, %v2494_v56, %v7270_v50 }
 0x5a7   : > { %2758 = vmatpush1.bf16.msra.mxu1 %v2604_v8  ;;  %v2628_v29 = vsel %vm615_vm2, %v2426_v21, %v2578_v16  ;;  %v2585_v36 = vrot.slane %v2501_v22, 4 }
 0x5a9   : > { %v2430_v48 = vpop.permute.xlu1 %2429  ;;  %v2500_v43 = vpop.permute.xlu0 %2499 }
 0x5aa   : > { %v2435_v52 = vsel %vm8609_vm4, %v2428_v62, %v2430_v48  ;;  %vm8616_vm4 = vcmask 588800  }
 0x5ab   : > { %v2632_v20 = vsel %vm615_vm2, %v2435_v52, %v2579_v45  ;;  %vm8617_vm15 = vmmov %vm8616_vm4 }
 0x5ac   : > { %2759 = vmatprep.subr.bf16.mxu1 %v2632_v20 }
 0x5ad   : > { %v2434_v37 = vpop.permute.xlu1 %2433  ;;  %2760 = vmatpush1.bf16.msra.mxu1 %v2628_v29  ;;  %v2540_v47 = vpop.permute.xlu0 %2539 }
 0x5ae   : > { %v2545_v35 = vsel %vm553_vm6, %v2538_v44, %v2540_v47 }
 0x5af   : > { %v2591_v2 = vrot.slane %v2545_v35, 4 }
 0x5b1   : > { %v2474_v59 = vpop.permute.xlu1 %2473  ;;  %v2544_v23 = vpop.permute.xlu0 %2543 }
 0x5b2   : > { %v2479_v7 = vsel %vm484_vm5, %v2472_v51, %v2474_v59 }
 0x5b3   : > { %v2656_v27 = vsel %vm615_vm2, %v2479_v7, %v2585_v36 }
 0x5b4   : > { %2761 = vmatprep.subr.bf16.mxu1 %v2656_v27 }
 0x5b5   : > { %v2478_v42 = vpop.permute.xlu1 %2477  ;;  %2762 = vmatpush1.bf16.msra.mxu1 %v2652_v33  ;;  %v2410_v62 = vpop.permute.xlu0 %2409  ;;  %v2705_v33 = vsel %vm615_vm2, %v2558_v39, 0 }
 0x5b6   : > { %v2414_v32 = vsel %vm411_vm0, %v2408_v34, %v2410_v62  ;;  %v2415_v5 = vsel %vm411_vm0, %v2410_v62, %v2412_v9 }
 0x5b7   : > { %v2574_v14 = vrot.slane %v2414_v32, 4  ;;  %v2575_v24 = vrot.slane %v2415_v5, 4 }
 0x5b9   : > { %v2518_v51 = vpop.permute.xlu1 %2517  ;;  %v2432_v25 = vpop.permute.xlu0 %2431  ;;  %v2616_v56 = vsel %vm615_vm2, %v7139_v26, %v2575_v24  ;;  %v2612_v44 = vsel %vm615_vm2, %v7118_v30, %v2574_v14 }
 0x5ba   : > { %v2523_v34 = vsel %vm530_vm7, %v2516_v18, %v2518_v51  ;;  %2798 = vmatprep.subr.bf16.mxu0 %v2616_v56  ;;  %v2436_v9 = vsel %vm8612_vm12, %v2430_v48, %v2432_v25  ;;  %v2437_v6 = vsel %vm8613_vm9, %v2432_v25, %v2434_v37  ;;  %vm8619_vm12 = vmmov %vm8614_vm3 }
 0x5bb   : > { %2799 = vmatpush1.bf16.msra.mxu0 %v2612_v44  ;;  %v2680_v53 = vsel %vm615_vm2, %v2523_v34, %v2591_v2  ;;  %vm8620_vm9 = vmmov %vm8614_vm3 }
 0x5bc   : > { %2763 = vmatprep.subr.bf16.mxu1 %v2680_v53 }
 0x5bd   : > { %v2522_v58 = vpop.permute.xlu1 %2521  ;;  %2764 = vmatpush1.bf16.msra.mxu1 %v2676_v11  ;;  %v2476_v15 = vpop.permute.xlu0 %2475 }
 0x5be   : > { %v2480_v16 = vsel %vm484_vm5, %v2474_v59, %v2476_v15  ;;  %v2481_v48 = vsel %vm484_vm5, %v2476_v15, %v2478_v42 }
 0x5c1   : > { %v2454_v0 = vpop.permute.xlu1 %2453  ;;  %v2520_v18 = vpop.permute.xlu0 %2519 }
 0x5c2   : > { %v2458_v26 = vsel %vm461_vm1, %v7262_v60, %v2454_v0  ;;  %v2459_v30 = vsel %vm461_vm1, %v2454_v0, %v7267_v63  ;;  %v2524_v36 = vsel %vm530_vm7, %v2518_v51, %v2520_v18  ;;  %v2525_v59 = vsel %vm530_vm7, %v2520_v18, %v2522_v58 }
 0x5c3   : > { %v2580_v61 = vrot.slane %v2458_v26, 4  ;;  %v2581_v38 = vrot.slane %v2459_v30, 4 }
 0x5c5   : > { %v2498_v41 = vpop.permute.xlu1 %2497  ;;  %v2640_v8 = vsel %vm615_vm2, %v2437_v6, %v2581_v38  ;;  %v2636_v54 = vsel %vm615_vm2, %v2436_v9, %v2580_v61  ;;  %v2560_v52 = vpop.permute.xlu0 %2559 }
 0x5c6   : > { %v2502_v21 = vsel %vm8614_vm3, %v7270_v50, %v2498_v41  ;;  %v2503_v60 = vsel %vm8615_vm14, %v2498_v41, %v2500_v43  ;;  %2800 = vmatprep.subr.bf16.mxu0 %v2640_v8  ;;  %vm8621_vm3 = vmmov %vm8618_vm11 }
 0x5c7   : > { %v2586_v45 = vrot.slane %v2502_v21, 4  ;;  %v2587_v63 = vrot.slane %v2503_v60, 4  ;;  %2801 = vmatpush1.bf16.msra.mxu0 %v2636_v54  ;;  %vm8622_vm14 = vmmov %vm8621_vm3 }
 0x5c9   : > { %v2542_v20 = vpop.permute.xlu1 %2541  ;;  %v2664_v29 = vsel %vm615_vm2, %v2481_v48, %v2587_v63  ;;  %v2660_v37 = vsel %vm615_vm2, %v2480_v16, %v2586_v45 }
 0x5ca   : > { %v2546_v22 = vsel %vm553_vm6, %v2540_v47, %v2542_v20  ;;  %v2547_v50 = vsel %vm553_vm6, %v2542_v20, %v2544_v23  ;;  %2802 = vmatprep.subr.bf16.mxu0 %v2664_v29  ;;  %v2564_v23 = vpop.permute.xlu0 %2563 }
 0x5cb   : > { %v2592_v43 = vrot.slane %v2546_v22, 4  ;;  %v2593_v12 = vrot.slane %v2547_v50, 4  ;;  %2803 = vmatpush1.bf16.msra.mxu0 %v2660_v37 }
 0x5cd   : > { %v2562_v17 = vpop.permute.xlu1 %2561  ;;  %v2688_v7 = vsel %vm615_vm2, %v2525_v59, %v2593_v12  ;;  %v2684_v27 = vsel %vm615_vm2, %v2524_v36, %v2592_v43 }
 0x5ce   : > { %2804 = vmatprep.subr.bf16.mxu0 %v2688_v7  ;;  %v2567_v47 = vsel %vm576_vm8, %v2560_v52, %v2562_v17  ;;  %v2568_v46 = vsel %vm576_vm8, %v2562_v17, %v2564_v23 }
 0x5cf   : > { %4631 = vmatprep.subr.msk.bf16.mxu1 %vm615_vm2, %v2567_v47  ;;  %2805 = vmatpush1.bf16.msra.mxu0 %v2684_v27  ;;  %v2711_v62 = vsel %vm615_vm2, %v2568_v46, 0 }
 0x5d0   : > { %2766 = vmatpush1.bf16.msra.mxu1 %v2705_v33 }
 0x5d1   : > { %v2566_v40 = vpop.permute.xlu1 %2565 }
 0x5d2   : > { %v2569_v42 = vsel %vm576_vm8, %v2564_v23, %v2566_v40 }
 0x5d3   : > { %4632 = vmatmul.mubr.msk.bf16.vlgmr.msra.gmra.mrb[20].mxu1 %vm8616_vm4, %v7257_v3  ;;  %4633 = vmatprep.subr.msk.bf16.mxu0 %vm615_vm2, %v2569_v42  ;;  %vm8623_vm4 = vmmov %vm8621_vm3 }
 0x5d4   : > { %2807 = vmatpush1.bf16.msra.mxu0 %v2711_v62  ;;  %3275 = vmatprep.mubr.bf16.mxu1 %v8574_v4 }
 0x5d7   : > { %4634 = vmatmul.mubr.msk.bf16.vlgmr.msra.gmra.mrb[16].mxu0 %vm8617_vm15, %v7257_v3  ;;  %vm8624_vm15 = vmmov %vm8620_vm9 }
 0x5d8   : > { %3316 = vmatprep.mubr.bf16.mxu0 %v8574_v4 }
 0x5da   : > { %v2693_v35 = vpop.permute.xlu0 %2692 }
 0x66d   : > { %v2750_v32 = vpop.f32.mrb[12].mxu0 }
 0x66e   : > { %v2752_v5 = vpop.f32.mrb[13].mxu0  ;;  %v2751_v28 = vadd.f32 %v2750_v32, %v2693_v35 }
 0x66f   : > { %v2753_v14 = vadd.f32 %v2752_v5, %v2693_v35  ;;  %v2754_v24 = vpop.f32.mrb[14].mxu0 }
 0x670   : > { %v2755_v19 = vpop.f32.mrb[15].mxu0  ;;  %v2839_v2 = vmax.f32 %v2751_v28, 0.0 }
 0x671   : > { %v2840_v51 = vmax.f32 %v2753_v14, 0.0  ;;  %v4644_v14 = vld [vmem:[%s7171_s21 + $0x8] sm:$0xff] }
 0x672   : > { %v2845_v25 = vmul.f32 %v2839_v2, %v8601_v10 }
 0x673   : > { %v2846_v56 = vmul.f32 %v2840_v51, %v8602_v13 }
 0x674   : > { %2854 = vrot.lane.b32.xlu1 %v2845_v25, %s5202_s17 }
 0x678   : > { %2856 = vrot.lane.b32.xlu1 %v2846_v56, %s5202_s17 }
 0x6a6   : > { %v2791_v3 = vpop.f32.mrb[20].mxu1 }
 0x6a7   : > { %v2792_v44 = vadd.f32 %v2791_v3, %v2693_v35  ;;  %v2793_v49 = vpop.f32.mrb[21].mxu1 }
 0x6a8   : > { %v2794_v34 = vadd.f32 %v2793_v49, %v2693_v35  ;;  %v2795_v53 = vpop.f32.mrb[22].mxu1 }
 0x6a9   : > { %v2841_v11 = vmax.f32 %v2792_v44, 0.0  ;;  %v2796_v58 = vpop.f32.mrb[23].mxu1 }
 0x6aa   : > { %v2842_v15 = vmax.f32 %v2794_v34, 0.0  ;;  %v2832_v0 = vpop.f32.mrb[16].mxu0 }
 0x6ab   : > { %v2847_v26 = vmul.f32 %v2841_v11, %v6495_v55  ;;  %v2833_v30 = vadd.f32 %v2832_v0, %v2693_v35  ;;  %v2834_v61 = vpop.f32.mrb[17].mxu0 }
 0x6ac   : > { %v2848_v38 = vmul.f32 %v2842_v15, %v6570_v1  ;;  %v2835_v18 = vadd.f32 %v2834_v61, %v2693_v35  ;;  %v2836_v9 = vpop.f32.mrb[18].mxu0 }
 0x6ad   : > { %v2843_v6 = vmax.f32 %v2833_v30, 0.0  ;;  %2858 = vrot.lane.b32.xlu0 %v2847_v26, %s5202_s17  ;;  %v2837_v41 = vpop.f32.mrb[19].mxu0 }
 0x6ae   : > { %v2844_v8 = vmax.f32 %v2835_v18, 0.0  ;;  %2873 = vrot.lane.b32.xlu1 %v2848_v38, %s5202_s17 }
 0x6af   : > { %v2849_v54 = vmul.f32 %v2843_v6, %v6530_v31 }
 0x6b0   : > { %v2850_v21 = vmul.f32 %v2844_v8, %v6610_v57 }
 0x6b1   : > { %2875 = vrot.lane.b32.xlu0 %v2849_v54, %s5202_s17 }
 0x6b2   : > { %2877 = vrot.lane.b32.xlu1 %v2850_v21, %s5202_s17 }
 0x6e6   : > { %v2855_v60 = vpop.permute.xlu1 %2854 }
 0x6e7   : > { %2866 = vst.msk [vmem:[%s5291_s23] sm:$0xff] %vm2334_vm13, %v2855_v60 }
 0x6ea   : > { %v2857_v45 = vpop.permute.xlu1 %2856 }
 0x6eb   : > { %v2860_v63 = vsel %vm2323_vm10, %v2855_v60, %v2857_v45 }
 0x6ec   : > { %2867 = vst [vmem:[%s5291_s23 + $0x8] sm:$0xff] %v2860_v63 }
 0x6ee   : > { %v2890_v50 = vld [vmem:[%s5291_s23] sm:$0xff] }
 0x6ef   : > { %v7384_v12 = vpack.c.bf16 %v2890_v50, %v2890_v50 }
 0x6f1   : > { %2917 = vrot.lane.b32.xlu0 %v7384_v12, %s5191_s24 }
 0x6f3   : > { %v2891_v17 = vld [vmem:[%s5291_s23 + $0x8] sm:$0xff] }
 0x6f4   : > { %v7421_v7 = vpack.c.bf16 %v2891_v17, %v2891_v17 }
 0x6f5   : > { %2965 = vrot.lane.b32.xlu0 %v7384_v12, %s5192_s25 }
 0x6f9   : > { %2943 = vrot.lane.b32.xlu0 %v7384_v12, %s8576_s14 }
 0x6fd   : > { %3009 = vrot.lane.b32.xlu0 %v7384_v12, %s8577_s15 }
 0x701   : > { %2987 = vrot.lane.b32.xlu0 %v7384_v12, %s8580_s26 }
 0x705   : > { %3053 = vrot.lane.b32.xlu0 %v7384_v12, %s8579_s28 }
 0x709   : > { %3031 = vrot.lane.b32.xlu0 %v7384_v12, %s8582_s13 }
 0x70d   : > { %3075 = vrot.lane.b32.xlu0 %v7384_v12, %s8581_s12 }
 0x71f   : > { %v2859_v16 = vpop.permute.xlu0 %2858 }
 0x720   : > { %v2861_v48 = vsel %vm2323_vm10, %v2857_v45, %v2859_v16  ;;  %2869 = vst.msk [vmem:[%s5291_s23 + $0x18] sm:$0xff] %vm2323_vm10, %v2859_v16  ;;  %v2874_v52 = vpop.permute.xlu1 %2873 }
 0x721   : > { %2868 = vst [vmem:[%s5291_s23 + $0x10] sm:$0xff] %v2861_v48  ;;  %4635 = vst.msk [vmem:[%s5291_s23 + $0x20] sm:$0xff] %vm2334_vm13, %v2874_v52 }
 0x723   : > { %v2876_v20 = vpop.permute.xlu0 %2875 }
 0x724   : > { %v2879_v29 = vsel %vm2323_vm10, %v2874_v52, %v2876_v20  ;;  %v2878_v37 = vpop.permute.xlu1 %2877 }
 0x725   : > { %4636 = vst [vmem:[%s5291_s23 + $0x28] sm:$0xff] %v2879_v29  ;;  %v7376_v22 = vsel %vm2323_vm10, %v2876_v20, %v2878_v37  ;;  %4638 = vst.msk [vmem:[%s5291_s23 + $0x38] sm:$0xff] %vm2323_vm10, %v2878_v37  ;;  %v7430_v27 = vpack.c.bf16 %v2879_v29, %v2879_v29 }
 0x726   : > { %4637 = vst [vmem:[%s5291_s23 + $0x30] sm:$0xff] %v7376_v22  ;;  %v7490_v40 = vpack.c.bf16 %v7376_v22, %v7376_v22 }
 0x727   : > { %v2893_v36 = vld [vmem:[%s5291_s23 + $0x18] sm:$0xff] }
 0x728   : > { %v2894_v43 = vld [vmem:[%s5291_s23 + $0x20] sm:$0xff]  ;;  %v2901_v59 = vpack.c.bf16 %v2893_v36, %v2893_v36  ;;  %v2892_v33 = vld [vmem:[%s5291_s23 + $0x10] sm:$0xff] }
 0x729   : > { %v7386_v39 = vpack.c.bf16 %v2894_v43, %v2894_v43  ;;  %v7470_v46 = vpack.c.bf16 %v2892_v33, %v2892_v33 }
 0x72b   : > { %2932 = vrot.lane.b32.xlu1 %v7386_v39, %s5191_s24  ;;  %3086 = vrot.lane.b32.xlu0 %v7386_v39, %s8581_s12 }
 0x72c   : > { %v2897_v47 = vld [vmem:[%s5291_s23 + $0x38] sm:$0xff] }
 0x72d   : > { %v2905_v23 = vpack.c.bf16 %v2897_v47, %v2897_v47 }
 0x72f   : > { %2976 = vrot.lane.b32.xlu1 %v7386_v39, %s5192_s25  ;;  %2919 = vrot.lane.b32.xlu0 %v7421_v7, %s5191_s24 }
 0x733   : > { %2954 = vrot.lane.b32.xlu1 %v7386_v39, %s8576_s14  ;;  %2934 = vrot.lane.b32.xlu0 %v7430_v27, %s5191_s24 }
 0x737   : > { %3020 = vrot.lane.b32.xlu1 %v7386_v39, %s8577_s15  ;;  %2967 = vrot.lane.b32.xlu0 %v7421_v7, %s5192_s25 }
 0x73b   : > { %2998 = vrot.lane.b32.xlu1 %v7386_v39, %s8580_s26  ;;  %2978 = vrot.lane.b32.xlu0 %v7430_v27, %s5192_s25 }
 0x73f   : > { %3064 = vrot.lane.b32.xlu1 %v7386_v39, %s8579_s28  ;;  %2956 = vrot.lane.b32.xlu0 %v7430_v27, %s8576_s14 }
 0x743   : > { %3042 = vrot.lane.b32.xlu1 %v7386_v39, %s8582_s13  ;;  %3011 = vrot.lane.b32.xlu0 %v7421_v7, %s8577_s15 }
 0x747   : > { %2923 = vrot.lane.b32.xlu1 %v2901_v59, %s5191_s24  ;;  %3022 = vrot.lane.b32.xlu0 %v7430_v27, %s8577_s15 }
 0x74b   : > { %2945 = vrot.lane.b32.xlu1 %v7421_v7, %s8576_s14  ;;  %3000 = vrot.lane.b32.xlu0 %v7430_v27, %s8580_s26 }
 0x74f   : > { %2971 = vrot.lane.b32.xlu1 %v2901_v59, %s5192_s25  ;;  %3055 = vrot.lane.b32.xlu0 %v7421_v7, %s8579_s28 }
 0x753   : > { %2949 = vrot.lane.b32.xlu1 %v2901_v59, %s8576_s14  ;;  %3066 = vrot.lane.b32.xlu0 %v7430_v27, %s8579_s28 }
 0x757   : > { %2989 = vrot.lane.b32.xlu1 %v7421_v7, %s8580_s26  ;;  %3044 = vrot.lane.b32.xlu0 %v7430_v27, %s8582_s13 }
 0x75b   : > { %3015 = vrot.lane.b32.xlu1 %v2901_v59, %s8577_s15  ;;  %2938 = vrot.lane.b32.xlu0 %v2905_v23, %s5191_s24 }
 0x75f   : > { %2993 = vrot.lane.b32.xlu1 %v2901_v59, %s8580_s26  ;;  %2947 = vrot.lane.b32.xlu0 %v7470_v46, %s8576_s14 }
 0x763   : > { %3033 = vrot.lane.b32.xlu1 %v7421_v7, %s8582_s13  ;;  %2991 = vrot.lane.b32.xlu0 %v7470_v46, %s8580_s26  ;;  %v2918_v42 = vpop.permute.xlu0 %2917 }
 0x767   : > { %3059 = vrot.lane.b32.xlu1 %v2901_v59, %s8579_s28  ;;  %3035 = vrot.lane.b32.xlu0 %v7470_v46, %s8582_s13  ;;  %v2966_v35 = vpop.permute.xlu0 %2965 }
 0x76b   : > { %3037 = vrot.lane.b32.xlu1 %v2901_v59, %s8582_s13  ;;  %3079 = vrot.lane.b32.xlu0 %v7470_v46, %s8581_s12  ;;  %v7511_v5 = vpop.permute.xlu0 %2943 }
 0x76f   : > { %3077 = vrot.lane.b32.xlu1 %v7421_v7, %s8581_s12  ;;  %2980 = vrot.lane.b32.xlu0 %v7490_v40, %s5192_s25  ;;  %v7517_v24 = vpop.permute.xlu0 %3009 }
 0x773   : > { %3081 = vrot.lane.b32.xlu1 %v2901_v59, %s8581_s12  ;;  %2958 = vrot.lane.b32.xlu0 %v7490_v40, %s8576_s14  ;;  %v7519_v2 = vpop.permute.xlu0 %2987 }
 0x777   : > { %3088 = vrot.lane.b32.xlu1 %v7430_v27, %s8581_s12  ;;  %3024 = vrot.lane.b32.xlu0 %v7490_v40, %s8577_s15  ;;  %v7523_v25 = vpop.permute.xlu0 %3053 }
 0x77b   : > { %2982 = vrot.lane.b32.xlu1 %v2905_v23, %s5192_s25  ;;  %3002 = vrot.lane.b32.xlu0 %v7490_v40, %s8580_s26  ;;  %v7527_v3 = vpop.permute.xlu0 %3031 }
 0x77f   : > { %2921 = vrot.lane.b32.xlu1 %v7470_v46, %s5191_s24  ;;  %3068 = vrot.lane.b32.xlu0 %v7490_v40, %s8579_s28  ;;  %v7531_v49 = vpop.permute.xlu0 %3075 }
 0x783   : > { %2969 = vrot.lane.b32.xlu1 %v7470_v46, %s5192_s25  ;;  %3046 = vrot.lane.b32.xlu0 %v7490_v40, %s8582_s13 }
 0x787   : > { %3013 = vrot.lane.b32.xlu1 %v7470_v46, %s8577_s15  ;;  %3090 = vrot.lane.b32.xlu0 %v7490_v40, %s8581_s12 }
 0x78b   : > { %3057 = vrot.lane.b32.xlu1 %v7470_v46, %s8579_s28  ;;  %3219 = vperm.xlu0 %5140, %v4644_v14  }
 0x78f   : > { %2960 = vrot.lane.b32.xlu1 %v2905_v23, %s8576_s14 }
 0x793   : > { %2936 = vrot.lane.b32.xlu1 %v7490_v40, %s5191_s24 }
 0x797   : > { %3026 = vrot.lane.b32.xlu1 %v2905_v23, %s8577_s15 }
 0x79b   : > { %3004 = vrot.lane.b32.xlu1 %v2905_v23, %s8580_s26 }
 0x79d   : > { %v2933_v62 = vpop.permute.xlu1 %2932  ;;  %v7533_v53 = vpop.permute.xlu0 %3086 }
 0x79f   : > { %3070 = vrot.lane.b32.xlu1 %v2905_v23, %s8579_s28 }
 0x7a1   : > { %v2977_v32 = vpop.permute.xlu1 %2976  ;;  %v2920_v58 = vpop.permute.xlu0 %2919 }
 0x7a2   : > { %v2925_v36 = vsel %vm411_vm0, %v2918_v42, %v2920_v58 }
 0x7a3   : > { %3048 = vrot.lane.b32.xlu1 %v2905_v23, %s8582_s13  ;;  %v3097_v59 = vrot.slane %v2925_v36, 4 }
 0x7a5   : > { %v2955_v28 = vpop.permute.xlu1 %2954  ;;  %v7535_v0 = vpop.permute.xlu0 %2934 }
 0x7a6   : > { %v2940_v30 = vsel %vm411_vm0, %v2933_v62, %v7535_v0 }
 0x7a7   : > { %3092 = vrot.lane.b32.xlu1 %v2905_v23, %s8581_s12  ;;  %v3100_v61 = vrot.slane %v2940_v30, 4 }
 0x7a9   : > { %v3021_v19 = vpop.permute.xlu1 %3020  ;;  %v2968_v38 = vpop.permute.xlu0 %2967  ;;  %v3135_v9 = vsel %vm615_vm2, %v7386_v39, %v3100_v61 }
 0x7aa   : > { %3284 = vmatprep.subr.bf16.mxu0 %v3135_v9  ;;  %v2973_v23 = vsel %vm461_vm1, %v2966_v35, %v2968_v38 }
 0x7ab   : > { %v3103_v57 = vrot.slane %v2973_v23, 4 }
 0x7ad   : > { %v7521_v51 = vpop.permute.xlu1 %2998  ;;  %v7543_v6 = vpop.permute.xlu0 %2978 }
 0x7ae   : > { %v2984_v33 = vsel %vm461_vm1, %v2977_v32, %v7543_v6 }
 0x7af   : > { %v3106_v31 = vrot.slane %v2984_v33, 4 }
 0x7b1   : > { %v7525_v56 = vpop.permute.xlu1 %3064  ;;  %v7545_v8 = vpop.permute.xlu0 %2956 }
 0x7b2   : > { %v2962_v9 = vsel %vm8618_vm11, %v2955_v28, %v7545_v8  ;;  %v3123_v28 = vsel %vm615_vm2, %v7384_v12, %v3097_v59  ;;  %vm8625_vm11 = vmmov %vm8620_vm9 }
 0x7b5   : > { %v7529_v44 = vpop.permute.xlu1 %3042  ;;  %v3012_v21 = vpop.permute.xlu0 %3011 }
 0x7b9   : > { %v2924_v34 = vpop.permute.xlu1 %2923  ;;  %v7551_v45 = vpop.permute.xlu0 %3022 }
 0x7ba   : > { %v3028_v32 = vsel %vm8619_vm12, %v3021_v19, %v7551_v45  ;;  %vm8626_vm12 = vmmov %vm8621_vm3 }
 0x7bd   : > { %v2946_v11 = vpop.permute.xlu1 %2945  ;;  %v7555_v16 = vpop.permute.xlu0 %3000 }
 0x7be   : > { %v3006_v19 = vsel %vm484_vm5, %v7521_v51, %v7555_v16 }
 0x7c1   : > { %v2972_v15 = vpop.permute.xlu1 %2971  ;;  %v7559_v52 = vpop.permute.xlu0 %3055 }
 0x7c5   : > { %v2950_v26 = vpop.permute.xlu1 %2949  ;;  %v7563_v29 = vpop.permute.xlu0 %3066 }
 0x7c9   : > { %v7539_v18 = vpop.permute.xlu1 %2989  ;;  %v7567_v22 = vpop.permute.xlu0 %3044 }
 0x7cd   : > { %v3016_v41 = vpop.permute.xlu1 %3015  ;;  %v7571_v43 = vpop.permute.xlu0 %2938 }
 0x7d1   : > { %v7547_v54 = vpop.permute.xlu1 %2993  ;;  %v2948_v17 = vpop.permute.xlu0 %2947 }
 0x7d2   : > { %v2953_v12 = vsel %vm8623_vm4, %v2948_v17, %v2950_v26  ;;  %v3061_v26 = vsel %vm553_vm6, %v7523_v25, %v7559_v52  ;;  %v2995_v25 = vsel %vm484_vm5, %v7519_v2, %v7539_v18 }
 0x7d5   : > { %v7549_v60 = vpop.permute.xlu1 %3033  ;;  %v2992_v42 = vpop.permute.xlu0 %2991 }
 0x7d9   : > { %v7553_v63 = vpop.permute.xlu1 %3059 }
 0x7dd   : > { %v7557_v48 = vpop.permute.xlu1 %3037 }
 0x7e1   : > { %v7561_v20 = vpop.permute.xlu1 %3077 }
 0x7e5   : > { %v7565_v37 = vpop.permute.xlu1 %3081 }
 0x7e9   : > { %v7569_v50 = vpop.permute.xlu1 %3088 }
 0x7ed   : > { %v7573_v39 = vpop.permute.xlu1 %2982 }
 0x7f1   : > { %v2922_v47 = vpop.permute.xlu1 %2921 }
 0x7f2   : > { %v2926_v62 = vsel %vm411_vm0, %v2920_v58, %v2922_v47  ;;  %v2927_v14 = vsel %vm411_vm0, %v2922_v47, %v2924_v34  ;;  %v3017_v47 = vsel %vm8620_vm9, %v7517_v24, %v3012_v21  ;;  %v3036_v24 = vpop.permute.xlu0 %3035  ;;  %vm8627_vm9 = vcmask 588800  }
 0x7f3   : > { %v3098_v30 = vrot.slane %v2926_v62, 4  ;;  %v3099_v61 = vrot.slane %v2927_v14, 4  ;;  %v3109_v14 = vrot.slane %v3017_v47, 4  ;;  %v3041_v47 = vsel %vm530_vm7, %v3036_v24, %v7557_v48 }
 0x7f5   : > { %v2970_v36 = vpop.permute.xlu1 %2969  ;;  %v3127_v13 = vsel %vm615_vm2, %v7421_v7, %v3098_v30  ;;  %v3131_v35 = vsel %vm615_vm2, %v7470_v46, %v3099_v61  ;;  %v3159_v7 = vsel %vm615_vm2, %v2962_v9, %v3106_v31  ;;  %v2951_v46 = vsel %vm8621_vm3, %v7511_v5, %v2946_v11  ;;  %vm8628_vm3 = vmmov %vm8625_vm11 }
 0x7f6   : > { %v2974_v34 = vsel %vm461_vm1, %v2968_v38, %v2970_v36  ;;  %v2975_v58 = vsel %vm461_vm1, %v2970_v36, %v2972_v15  ;;  %3243 = vmatprep.subr.bf16.mxu1 %v3127_v13  ;;  %3285 = vmatpush1.bf16.msra.mxu0 %v3131_v35  ;;  %v2952_v13 = vsel %vm8622_vm14, %v2946_v11, %v2948_v17  ;;  %v3112_v15 = vrot.slane %v3028_v32, 4  ;;  %v3080_v9 = vpop.permute.xlu0 %3079  ;;  %vm8629_vm14 = vmmov %vm8627_vm9 }
 0x7f7   : > { %v3104_v23 = vrot.slane %v2974_v34, 4  ;;  %v3105_v33 = vrot.slane %v2975_v58, 4  ;;  %3244 = vmatpush1.bf16.msra.mxu1 %v3123_v28  ;;  %3286 = vmatprep.subr.bf16.mxu0 %v3159_v7  ;;  %v3147_v31 = vsel %vm615_vm2, %v2951_v46, %v3103_v57  ;;  %v3072_v5 = vsel %vm553_vm6, %v7525_v56, %v7563_v29 }
 0x7f8   : > { %v3183_v57 = vsel %vm615_vm2, %v3006_v19, %v3112_v15  ;;  %v3050_v61 = vsel %vm530_vm7, %v7529_v44, %v7567_v22  ;;  %v2996_v56 = vsel %vm484_vm5, %v7539_v18, %v2992_v42  ;;  %v3115_v34 = vrot.slane %v3061_v26, 4 }
 0x7f9   : > { %v3014_v38 = vpop.permute.xlu1 %3013  ;;  %v3151_v59 = vsel %vm615_vm2, %v2952_v13, %v3104_v23  ;;  %v3155_v62 = vsel %vm615_vm2, %v2953_v12, %v3105_v33  ;;  %v3040_v18 = vsel %vm530_vm7, %v7549_v60, %v3036_v24  ;;  %v3083_v46 = vsel %vm576_vm8, %v7531_v49, %v7561_v20 }
 0x7fa   : > { %v3018_v51 = vsel %vm8624_vm15, %v3012_v21, %v3014_v38  ;;  %v3019_v11 = vsel %vm8625_vm11, %v3014_v38, %v3016_v41  ;;  %3245 = vmatprep.subr.bf16.mxu1 %v3151_v59  ;;  %3287 = vmatpush1.bf16.msra.mxu0 %v3155_v62  ;;  %v2997_v41 = vsel %vm484_vm5, %v2992_v42, %v7547_v54  ;;  %v3118_v21 = vrot.slane %v3072_v5, 4  ;;  %v4641_v59 = vld [vmem:[%s7253_s19 + $0x4] sm:$0xf]  ;;  %vm8630_vm15 = vmmov %vm8628_vm3 }
 0x7fb   : > { %v3110_v17 = vrot.slane %v3018_v51, 4  ;;  %v3111_v30 = vrot.slane %v3019_v11, 4  ;;  %3246 = vmatpush1.bf16.msra.mxu1 %v3147_v31  ;;  %3288 = vmatprep.subr.bf16.mxu0 %v3183_v57  ;;  %v3171_v54 = vsel %vm615_vm2, %v2995_v25, %v3109_v14  ;;  %v3085_v48 = vsel %vm576_vm8, %v3080_v9, %v7565_v37  ;;  %vm8631_vm11 = vmmov %vm8627_vm9 }
 0x7fc   : > { %v3207_v2 = vsel %vm615_vm2, %v3050_v61, %v3118_v21  ;;  %v3232_v15 = vsel %vm615_vm2, %v3085_v48, 0  ;;  %v3226_v24 = vsel %vm615_vm2, %v3083_v46, 0 }
 0x7fd   : > { %v3058_v36 = vpop.permute.xlu1 %3057  ;;  %v3175_v35 = vsel %vm615_vm2, %v2996_v56, %v3110_v17  ;;  %v3179_v32 = vsel %vm615_vm2, %v2997_v41, %v3111_v30 }
 0x7fe   : > { %v3062_v44 = vsel %vm553_vm6, %v7559_v52, %v3058_v36  ;;  %v3063_v58 = vsel %vm553_vm6, %v3058_v36, %v7553_v63  ;;  %3247 = vmatprep.subr.bf16.mxu1 %v3175_v35  ;;  %3289 = vmatpush1.bf16.msra.mxu0 %v3179_v32  ;;  %v3039_v63 = vsel %vm530_vm7, %v7527_v3, %v7549_v60  ;;  %v2981_v52 = vpop.permute.xlu0 %2980 }
 0x7ff   : > { %v3116_v42 = vrot.slane %v3062_v44, 4  ;;  %v3117_v28 = vrot.slane %v3063_v58, 4  ;;  %3248 = vmatpush1.bf16.msra.mxu1 %v3171_v54  ;;  %3290 = vmatprep.subr.bf16.mxu0 %v3207_v2  ;;  %v3195_v19 = vsel %vm615_vm2, %v3039_v63, %v3115_v34  ;;  %v3094_v3 = vsel %vm576_vm8, %v7533_v53, %v7569_v50 }
 0x800   : > { %v3084_v60 = vsel %vm576_vm8, %v7561_v20, %v3080_v9  ;;  %v2986_v53 = vsel %vm461_vm1, %v2981_v52, %v7573_v39  ;;  %v2985_v5 = vsel %vm461_vm1, %v7543_v6, %v2981_v52 }
 0x801   : > { %v2961_v23 = vpop.permute.xlu1 %2960  ;;  %v3199_v33 = vsel %vm615_vm2, %v3040_v18, %v3116_v42  ;;  %v3203_v7 = vsel %vm615_vm2, %v3041_v47, %v3117_v28  ;;  %v3108_v51 = vrot.slane %v2986_v53, 4 }
 0x802   : > { %3249 = vmatprep.subr.bf16.mxu1 %v3199_v33  ;;  %3291 = vmatpush1.bf16.msra.mxu0 %v3203_v7  ;;  %v2959_v49 = vpop.permute.xlu0 %2958 }
 0x803   : > { %3250 = vmatpush1.bf16.msra.mxu1 %v3195_v19  ;;  %4647 = vmatprep.subr.msk.bf16.mxu0 %vm615_vm2, %v3094_v3  ;;  %v2964_v62 = vsel %vm8626_vm12, %v2959_v49, %v2961_v23  ;;  %v2963_v11 = vsel %vm8623_vm4, %v7545_v8, %v2959_v49  ;;  %vm8635_vm12 = vmmov %vm8623_vm4 }
 0x804   : > { %4645 = vmatprep.subr.msk.bf16.mxu1 %vm615_vm2, %v3084_v60 }
 0x805   : > { %v2937_v13 = vpop.permute.xlu1 %2936 }
 0x806   : > { %v2941_v12 = vsel %vm411_vm0, %v7535_v0, %v2937_v13  ;;  %v2942_v37 = vsel %vm411_vm0, %v2937_v13, %v7571_v43  ;;  %3293 = vmatpush1.bf16.msra.mxu0 %v3232_v15  ;;  %v3025_v31 = vpop.permute.xlu0 %3024  ;;  %v8632_v15 = vld [vmem:[#allocation31_spill] sm:$0xff] }
 0x807   : > { %v3101_v20 = vrot.slane %v2941_v12, 4  ;;  %v3102_v38 = vrot.slane %v2942_v37, 4  ;;  %3252 = vmatpush1.bf16.msra.mxu1 %v3226_v24  ;;  %v3029_v30 = vsel %vm8630_vm15, %v7551_v45, %v3025_v31 }
 0x808   : > { %v3113_v41 = vrot.slane %v3029_v30, 4 }
 0x809   : > { %v3027_v14 = vpop.permute.xlu1 %3026  ;;  %v3143_v0 = vsel %vm615_vm2, %v7490_v40, %v3102_v38  ;;  %v3139_v43 = vsel %vm615_vm2, %v7430_v27, %v3101_v20  ;;  %4648 = vmatmul.mubr.msk.bf16.vlgmr.msra.gmra.mrb[20].mxu0 %vm8627_vm9, %v4641_v59  ;;  %v3167_v40 = vsel %vm615_vm2, %v2964_v62, %v3108_v51  ;;  %v3107_v27 = vrot.slane %v2985_v5, 4  ;;  %v3375_v51 = vld [vmem:[#allocation2 + $0x18] sm:$0xff]  ;;  %vm8636_vm9 = vmmov %vm8623_vm4 }
 0x80a   : > { %v3030_v39 = vsel %vm8628_vm3, %v3025_v31, %v3027_v14  ;;  %4646 = vmatmul.mubr.msk.bf16.vlgmr.msra.gmra.mrb[24].mxu1 %vm8629_vm14, %v4641_v59  ;;  %3325 = vmatprep.subr.bf16.mxu1 %v3143_v0  ;;  %v3003_v26 = vpop.permute.xlu0 %3002  ;;  %v8633_v31 = vld [vmem:[#allocation49_spill] sm:$0xff]  ;;  %vm8637_vm14 = vmmov %vm8628_vm3 }
 0x80b   : > { %3357 = vmatprep.mubr.bf16.mxu1 %v8574_v4  ;;  %3326 = vmatpush1.bf16.msra.mxu1 %v3139_v43  ;;  %v3114_v6 = vrot.slane %v3030_v39, 4  ;;  %v3163_v61 = vsel %vm615_vm2, %v2963_v11, %v3107_v27  ;;  %v3007_v8 = vsel %vm484_vm5, %v7555_v16, %v3003_v26  ;;  %v8634_v43 = vld [vmem:[#allocation15_spill] sm:$0xff]  ;;  %vm8638_vm4 = vmmov %vm8631_vm11 }
 0x80c   : > { %3811 = vmatprep.mubr.bf16.mxu0 %v8574_v4  ;;  %3327 = vmatprep.subr.bf16.mxu1 %v3167_v40  ;;  %v3187_v45 = vsel %vm615_vm2, %v3007_v8, %v3113_v41  ;;  %v3399_v40 = vld [vmem:[#allocation2 + $0x20] sm:$0xff]  ;;  %vm8639_vm15 = vmmov %vm8636_vm9 }
 0x80d   : > { %v3005_v17 = vpop.permute.xlu1 %3004 }
 0x80e   : > { %v3008_v57 = vsel %vm484_vm5, %v3003_v26, %v3005_v17  ;;  %v3069_v25 = vpop.permute.xlu0 %3068  ;;  %v3372_v26 = vld [vmem:[#allocation2] sm:$0xff] }
 0x80f   : > { %v3191_v56 = vsel %vm615_vm2, %v3008_v57, %v3114_v6  ;;  %3328 = vmatpush1.bf16.msra.mxu1 %v3163_v61  ;;  %v3073_v9 = vsel %vm553_vm6, %v7563_v29, %v3069_v25  ;;  %v3373_v61 = vld [vmem:[#allocation2 + $0x8] sm:$0xff] }
 0x810   : > { %3329 = vmatprep.subr.bf16.mxu1 %v3191_v56  ;;  %v3119_v35 = vrot.slane %v3073_v9, 4  ;;  %v3374_v56 = vld [vmem:[#allocation2 + $0x10] sm:$0xff] }
 0x811   : > { %v3071_v21 = vpop.permute.xlu1 %3070 }
 0x812   : > { %v3074_v36 = vsel %vm553_vm6, %v3069_v25, %v3071_v21  ;;  %v3047_v34 = vpop.permute.xlu0 %3046 }
 0x813   : > { %3330 = vmatpush1.bf16.msra.mxu1 %v3187_v45  ;;  %v3120_v32 = vrot.slane %v3074_v36, 4  ;;  %v3051_v16 = vsel %vm530_vm7, %v7567_v22, %v3047_v34 }
 0x814   : > { %v3211_v42 = vsel %vm615_vm2, %v3051_v16, %v3119_v35  ;;  %v3400_v35 = vld [vmem:[#allocation2 + $0x28] sm:$0xff] }
 0x815   : > { %v3049_v44 = vpop.permute.xlu1 %3048 }
 0x816   : > { %v3052_v58 = vsel %vm530_vm7, %v3047_v34, %v3049_v44  ;;  %v3091_v29 = vpop.permute.xlu0 %3090  ;;  %v3402_v34 = vld [vmem:[#allocation2 + $0x38] sm:$0xff] }
 0x817   : > { %v3215_v54 = vsel %vm615_vm2, %v3052_v58, %v3120_v32  ;;  %v3095_v2 = vsel %vm576_vm8, %v7569_v50, %v3091_v29  ;;  %v3401_v58 = vld [vmem:[#allocation2 + $0x30] sm:$0xff] }
 0x818   : > { %3331 = vmatprep.subr.bf16.mxu1 %v3215_v54  ;;  %v3238_v47 = vsel %vm615_vm2, %v3095_v2, 0 }
 0x819   : > { %3332 = vmatpush1.bf16.msra.mxu1 %v3211_v42  ;;  %v3093_v28 = vpop.permute.xlu1 %3092 }
 0x81a   : > { %v3096_v18 = vsel %vm576_vm8, %v3091_v29, %v3093_v28  ;;  %v3220_v22 = vpop.permute.xlu0 %3219 }
 0x81b   : > { %4649 = vmatprep.subr.msk.bf16.mxu1 %vm615_vm2, %v3096_v18 }
 0x81d   : > { %3334 = vmatpush1.bf16.msra.mxu1 %v3238_v47 }
 0x820   : > { %4650 = vmatmul.mubr.msk.bf16.vlgmr.msra.gmra.mrb[28].mxu1 %vm8631_vm11, %v4641_v59  ;;  %vm8640_vm11 = vmmov %vm8636_vm9 }
 0x821   : > { %3852 = vmatprep.mubr.bf16.mxu1 %v8574_v4 }
 0x8dc   : > { %v3318_v63 = vpop.f32.mrb[20].mxu0 }
 0x8dd   : > { %v3277_v52 = vpop.f32.mrb[24].mxu1  ;;  %v3319_v23 = vadd.f32 %v3318_v63, %v3220_v22  ;;  %v3320_v33 = vpop.f32.mrb[21].mxu0 }
 0x8de   : > { %v3279_v7 = vpop.f32.mrb[25].mxu1  ;;  %v3321_v46 = vadd.f32 %v3320_v33, %v3220_v22  ;;  %v3322_v19 = vpop.f32.mrb[22].mxu0  ;;  %v3278_v3 = vadd.f32 %v3277_v52, %v3220_v22 }
 0x8df   : > { %v3281_v50 = vpop.f32.mrb[26].mxu1  ;;  %v3368_v48 = vmul.f32 %v3319_v23, %v6495_v55  ;;  %v3323_v60 = vpop.f32.mrb[23].mxu0  ;;  %v3280_v12 = vadd.f32 %v3279_v7, %v3220_v22 }
 0x8e0   : > { %v3282_v49 = vpop.f32.mrb[27].mxu1  ;;  %v3369_v13 = vmul.f32 %v3321_v46, %v6570_v1  ;;  %v3366_v37 = vmul.f32 %v3278_v3, %v8601_v10 }
 0x8e1   : > { %3383 = vrot.lane.b32.xlu1 %v3368_v48, %s5202_s17  ;;  %v3367_v24 = vmul.f32 %v3280_v12, %v8632_v15  ;;  %v4656_v49 = vld [vmem:[%s7171_s21 + $0x10] sm:$0xff] }
 0x8e2   : > { %3406 = vrot.lane.b32.xlu0 %v3369_v13, %s5202_s17 }
 0x8e5   : > { %3379 = vrot.lane.b32.xlu1 %v3366_v37, %s5202_s17 }
 0x8e6   : > { %3381 = vrot.lane.b32.xlu0 %v3367_v24, %s5202_s17 }
 0x8f3   : > { %v3359_v53 = vpop.f32.mrb[28].mxu1 }
 0x8f4   : > { %v3360_v20 = vadd.f32 %v3359_v53, %v3220_v22  ;;  %v3361_v38 = vpop.f32.mrb[29].mxu1 }
 0x8f5   : > { %v3362_v59 = vadd.f32 %v3361_v38, %v3220_v22  ;;  %v3363_v62 = vpop.f32.mrb[30].mxu1 }
 0x8f6   : > { %v3370_v14 = vmul.f32 %v3360_v20, %v8633_v31  ;;  %v3364_v0 = vpop.f32.mrb[31].mxu1 }
 0x8f7   : > { %v3371_v5 = vmul.f32 %v3362_v59, %v8634_v43 }
 0x8f8   : > { %3408 = vrot.lane.b32.xlu1 %v3370_v14, %s5202_s17 }
 0x8f9   : > { %3410 = vrot.lane.b32.xlu0 %v3371_v5, %s5202_s17 }
 0x953   : > { %v3384_v39 = vpop.permute.xlu1 %3383 }
 0x954   : > { %v3394_v11 = vadd.f32 %v3384_v39, %v3375_v51  ;;  %v3407_v27 = vpop.permute.xlu0 %3406 }
 0x955   : > { %v3418_v6 = vadd.f32 %v3407_v27, %v3399_v40 }
 0x956   : > { %3398 = vst.msk [vmem:[#allocation2 + $0x18] sm:$0xff] %vm2323_vm10, %v3394_v11 }
 0x957   : > { %3422 = vst.msk [vmem:[#allocation2 + $0x20] sm:$0xff] %vm2334_vm13, %v3418_v6  ;;  %v3380_v17 = vpop.permute.xlu1 %3379 }
 0x958   : > { %v3391_v30 = vadd.f32 %v3380_v17, %v3372_v26  ;;  %v3382_v57 = vpop.permute.xlu0 %3381 }
 0x959   : > { %v3385_v8 = vsel %vm2323_vm10, %v3380_v17, %v3382_v57  ;;  %v3386_v41 = vsel %vm2323_vm10, %v3382_v57, %v3384_v39 }
 0x95a   : > { %3395 = vst.msk [vmem:[#allocation2] sm:$0xff] %vm2334_vm13, %v3391_v30  ;;  %v3392_v25 = vadd.f32 %v3385_v8, %v3373_v61  ;;  %v3393_v21 = vadd.f32 %v3386_v41, %v3374_v56 }
 0x95c   : > { %3396 = vst [vmem:[#allocation2 + $0x8] sm:$0xff] %v3392_v25  ;;  %3397 = vst [vmem:[#allocation2 + $0x10] sm:$0xff] %v3393_v21  ;;  %v7762_v22 = vpack.c.bf16 %v3393_v21, %v3393_v21  ;;  %v7768_v63 = vpack.c.bf16 %v3392_v25, %v3392_v25 }
 0x95d   : > { %v3429_v9 = vld [vmem:[#allocation2 + $0x18] sm:$0xff] }
 0x95e   : > { %v3437_v36 = vpack.c.bf16 %v3429_v9, %v3429_v9  ;;  %v3430_v18 = vld [vmem:[#allocation2 + $0x20] sm:$0xff] }
 0x95f   : > { %v7748_v47 = vpack.c.bf16 %v3430_v18, %v3430_v18 }
 0x960   : > { %3507 = vrot.lane.b32.xlu0 %v3437_v36, %s5192_s25  ;;  %3459 = vrot.lane.b32.xlu1 %v3437_v36, %s5191_s24 }
 0x961   : > { %v3426_v29 = vld [vmem:[#allocation2] sm:$0xff] }
 0x962   : > { %v7730_v2 = vpack.c.bf16 %v3426_v29, %v3426_v29 }
 0x964   : > { %3551 = vrot.lane.b32.xlu0 %v3437_v36, %s8577_s15  ;;  %3485 = vrot.lane.b32.xlu1 %v3437_v36, %s8576_s14 }
 0x968   : > { %3595 = vrot.lane.b32.xlu0 %v3437_v36, %s8579_s28  ;;  %3529 = vrot.lane.b32.xlu1 %v3437_v36, %s8580_s26 }
 0x96a   : > { %v3409_v45 = vpop.permute.xlu1 %3408 }
 0x96b   : > { %v3412_v32 = vsel %vm2323_vm10, %v3407_v27, %v3409_v45  ;;  %v3411_v44 = vpop.permute.xlu0 %3410 }
 0x96c   : > { %v3419_v16 = vadd.f32 %v3412_v32, %v3400_v35  ;;  %v3413_v54 = vsel %vm2323_vm10, %v3409_v45, %v3411_v44  ;;  %v3421_v42 = vadd.f32 %v3411_v44, %v3402_v34  ;;  %3617 = vrot.lane.b32.xlu0 %v3437_v36, %s8581_s12  ;;  %3573 = vrot.lane.b32.xlu1 %v3437_v36, %s8582_s13 }
 0x96d   : > { %v3420_v28 = vadd.f32 %v3413_v54, %v3401_v58 }
 0x96e   : > { %3423 = vst [vmem:[#allocation2 + $0x28] sm:$0xff] %v3419_v16  ;;  %3425 = vst.msk [vmem:[#allocation2 + $0x38] sm:$0xff] %vm2323_vm10, %v3421_v42  ;;  %v7798_v52 = vpack.c.bf16 %v3419_v16, %v3419_v16 }
 0x96f   : > { %3424 = vst [vmem:[#allocation2 + $0x30] sm:$0xff] %v3420_v28  ;;  %v7822_v7 = vpack.c.bf16 %v3420_v28, %v3420_v28 }
 0x970   : > { %3501 = vrot.lane.b32.xlu0 %v7730_v2, %s5192_s25  ;;  %3453 = vrot.lane.b32.xlu1 %v7730_v2, %s5191_s24 }
 0x974   : > { %3545 = vrot.lane.b32.xlu0 %v7730_v2, %s8577_s15  ;;  %3479 = vrot.lane.b32.xlu1 %v7730_v2, %s8576_s14 }
 0x975   : > { %v3433_v23 = vld [vmem:[#allocation2 + $0x38] sm:$0xff] }
 0x976   : > { %v3441_v33 = vpack.c.bf16 %v3433_v23, %v3433_v23 }
 0x978   : > { %3589 = vrot.lane.b32.xlu0 %v7730_v2, %s8579_s28  ;;  %3523 = vrot.lane.b32.xlu1 %v7730_v2, %s8580_s26 }
 0x97c   : > { %3611 = vrot.lane.b32.xlu0 %v7730_v2, %s8581_s12  ;;  %3567 = vrot.lane.b32.xlu1 %v7730_v2, %s8582_s13 }
 0x980   : > { %3512 = vrot.lane.b32.xlu0 %v7748_v47, %s5192_s25  ;;  %3468 = vrot.lane.b32.xlu1 %v7748_v47, %s5191_s24 }
 0x984   : > { %3556 = vrot.lane.b32.xlu0 %v7748_v47, %s8577_s15  ;;  %3490 = vrot.lane.b32.xlu1 %v7748_v47, %s8576_s14 }
 0x988   : > { %3600 = vrot.lane.b32.xlu0 %v7748_v47, %s8579_s28  ;;  %3534 = vrot.lane.b32.xlu1 %v7748_v47, %s8580_s26 }
 0x98c   : > { %3457 = vrot.lane.b32.xlu0 %v7762_v22, %s5191_s24  ;;  %3578 = vrot.lane.b32.xlu1 %v7748_v47, %s8582_s13 }
 0x990   : > { %3503 = vrot.lane.b32.xlu0 %v7768_v63, %s5192_s25  ;;  %3455 = vrot.lane.b32.xlu1 %v7768_v63, %s5191_s24 }
 0x994   : > { %3483 = vrot.lane.b32.xlu0 %v7762_v22, %s8576_s14  ;;  %3505 = vrot.lane.b32.xlu1 %v7762_v22, %s5192_s25 }
 0x998   : > { %3547 = vrot.lane.b32.xlu0 %v7768_v63, %s8577_s15  ;;  %3481 = vrot.lane.b32.xlu1 %v7768_v63, %s8576_s14 }
 0x99c   : > { %3527 = vrot.lane.b32.xlu0 %v7762_v22, %s8580_s26  ;;  %3549 = vrot.lane.b32.xlu1 %v7762_v22, %s8577_s15 }
 0x9a0   : > { %3591 = vrot.lane.b32.xlu0 %v7768_v63, %s8579_s28  ;;  %3525 = vrot.lane.b32.xlu1 %v7768_v63, %s8580_s26 }
 0x9a4   : > { %3571 = vrot.lane.b32.xlu0 %v7762_v22, %s8582_s13  ;;  %3593 = vrot.lane.b32.xlu1 %v7762_v22, %s8579_s28 }
 0x9a8   : > { %3615 = vrot.lane.b32.xlu0 %v7762_v22, %s8581_s12  ;;  %3569 = vrot.lane.b32.xlu1 %v7768_v63, %s8582_s13 }
 0x9ac   : > { %3613 = vrot.lane.b32.xlu1 %v7768_v63, %s8581_s12  ;;  %3470 = vrot.lane.b32.xlu0 %v7798_v52, %s5191_s24 }
 0x9b0   : > { %3514 = vrot.lane.b32.xlu1 %v7798_v52, %s5192_s25  ;;  %3474 = vrot.lane.b32.xlu0 %v3441_v33, %s5191_s24 }
 0x9b4   : > { %3518 = vrot.lane.b32.xlu1 %v3441_v33, %s5192_s25  ;;  %3492 = vrot.lane.b32.xlu0 %v7798_v52, %s8576_s14 }
 0x9b8   : > { %3558 = vrot.lane.b32.xlu1 %v7798_v52, %s8577_s15  ;;  %3496 = vrot.lane.b32.xlu0 %v3441_v33, %s8576_s14 }
 0x9bc   : > { %3562 = vrot.lane.b32.xlu1 %v3441_v33, %s8577_s15  ;;  %3536 = vrot.lane.b32.xlu0 %v7798_v52, %s8580_s26 }
 0x9c0   : > { %3602 = vrot.lane.b32.xlu1 %v7798_v52, %s8579_s28  ;;  %3540 = vrot.lane.b32.xlu0 %v3441_v33, %s8580_s26 }
 0x9c4   : > { %3606 = vrot.lane.b32.xlu1 %v3441_v33, %s8579_s28  ;;  %3580 = vrot.lane.b32.xlu0 %v7798_v52, %s8582_s13 }
 0x9c8   : > { %3472 = vrot.lane.b32.xlu1 %v7822_v7, %s5191_s24  ;;  %3584 = vrot.lane.b32.xlu0 %v3441_v33, %s8582_s13 }
 0x9cc   : > { %3494 = vrot.lane.b32.xlu1 %v7822_v7, %s8576_s14  ;;  %3516 = vrot.lane.b32.xlu0 %v7822_v7, %s5192_s25 }
 0x9d0   : > { %3538 = vrot.lane.b32.xlu1 %v7822_v7, %s8580_s26  ;;  %3560 = vrot.lane.b32.xlu0 %v7822_v7, %s8577_s15 }
 0x9d2   : > { %v7835_v46 = vpop.permute.xlu0 %3507  ;;  %v7837_v19 = vpop.permute.xlu1 %3459 }
 0x9d4   : > { %3582 = vrot.lane.b32.xlu1 %v7822_v7, %s8582_s13  ;;  %3604 = vrot.lane.b32.xlu0 %v7822_v7, %s8579_s28 }
 0x9d6   : > { %v7843_v50 = vpop.permute.xlu0 %3551  ;;  %v7845_v48 = vpop.permute.xlu1 %3485 }
 0x9d8   : > { %3622 = vrot.lane.b32.xlu1 %v7748_v47, %s8581_s12  ;;  %3624 = vrot.lane.b32.xlu0 %v7798_v52, %s8581_s12 }
 0x9da   : > { %v7851_v3 = vpop.permute.xlu0 %3595  ;;  %v7853_v60 = vpop.permute.xlu1 %3529 }
 0x9dc   : > { %3626 = vrot.lane.b32.xlu1 %v7822_v7, %s8581_s12  ;;  %3628 = vrot.lane.b32.xlu0 %v3441_v33, %s8581_s12 }
 0x9de   : > { %v7859_v13 = vpop.permute.xlu0 %3617  ;;  %v7861_v12 = vpop.permute.xlu1 %3573 }
 0x9e0   : > { %3755 = vperm.xlu1 %5141, %v4656_v49  }
 0x9e2   : > { %v3502_v37 = vpop.permute.xlu0 %3501  ;;  %v3454_v24 = vpop.permute.xlu1 %3453 }
 0x9e6   : > { %v3546_v53 = vpop.permute.xlu0 %3545  ;;  %v3480_v20 = vpop.permute.xlu1 %3479 }
 0x9ea   : > { %v3590_v38 = vpop.permute.xlu0 %3589  ;;  %v3524_v59 = vpop.permute.xlu1 %3523 }
 0x9ee   : > { %v7863_v62 = vpop.permute.xlu0 %3611  ;;  %v3568_v14 = vpop.permute.xlu1 %3567 }
 0x9f2   : > { %v7865_v0 = vpop.permute.xlu0 %3512  ;;  %v7867_v5 = vpop.permute.xlu1 %3468 }
 0x9f6   : > { %v7869_v51 = vpop.permute.xlu0 %3556  ;;  %v7871_v39 = vpop.permute.xlu1 %3490 }
 0x9fa   : > { %v7873_v11 = vpop.permute.xlu0 %3600  ;;  %v7875_v40 = vpop.permute.xlu1 %3534 }
 0x9fe   : > { %v3458_v27 = vpop.permute.xlu0 %3457  ;;  %v7877_v6 = vpop.permute.xlu1 %3578 }
 0xa02   : > { %v3504_v26 = vpop.permute.xlu0 %3503  ;;  %v3456_v17 = vpop.permute.xlu1 %3455 }
 0xa03   : > { %v3461_v30 = vsel %vm411_vm0, %v3454_v24, %v3456_v17  ;;  %v3462_v57 = vsel %vm411_vm0, %v3456_v17, %v3458_v27  ;;  %v3509_v9 = vsel %vm461_vm1, %v3502_v37, %v3504_v26 }
 0xa04   : > { %v3633_v61 = vrot.slane %v3461_v30, 4  ;;  %v3634_v56 = vrot.slane %v3462_v57, 4  ;;  %v3639_v45 = vrot.slane %v3509_v9, 4  ;;  %v3463_v9 = vsel %vm411_vm0, %v3458_v27, %v7837_v19 }
 0xa06   : > { %v7881_v8 = vpop.permute.xlu0 %3483  ;;  %v3506_v41 = vpop.permute.xlu1 %3505  ;;  %v3663_v25 = vsel %vm615_vm2, %v7768_v63, %v3634_v56  ;;  %v3659_v21 = vsel %vm615_vm2, %v7730_v2, %v3633_v61 }
 0xa07   : > { %v3510_v36 = vsel %vm461_vm1, %v3504_v26, %v3506_v41  ;;  %3779 = vmatprep.subr.bf16.mxu0 %v3663_v25 }
 0xa08   : > { %3780 = vmatpush1.bf16.msra.mxu0 %v3659_v21  ;;  %v3640_v35 = vrot.slane %v3510_v36, 4 }
 0xa0a   : > { %v3548_v32 = vpop.permute.xlu0 %3547  ;;  %v3482_v34 = vpop.permute.xlu1 %3481 }
 0xa0b   : > { %v3487_v44 = vsel %vm8635_vm12, %v3480_v20, %v3482_v34  ;;  %v3488_v16 = vsel %vm8636_vm9, %v3482_v34, %v7881_v8  ;;  %v3553_v28 = vsel %vm8628_vm3, %v3546_v53, %v3548_v32  ;;  %vm8641_vm12 = vmmov %vm8628_vm3 }
 0xa0c   : > { %v3687_v58 = vsel %vm615_vm2, %v3488_v16, %v3640_v35  ;;  %v3683_v54 = vsel %vm615_vm2, %v3487_v44, %v3639_v45  ;;  %v3645_v18 = vrot.slane %v3553_v28, 4  ;;  %v3511_v16 = vsel %vm461_vm1, %v3506_v41, %v7835_v46  ;;  %v7932_v28 = vld [vmem:[%s7253_s19 + $0x8] sm:$0xf]  ;;  %vm8642_vm9 = vmmov %vm8628_vm3 }
 0xa0d   : > { %3781 = vmatprep.subr.bf16.mxu0 %v3687_v58  ;;  %vm8643_vm3 = vmmov %vm8640_vm11 }
 0xa0e   : > { %v7894_v42 = vpop.permute.xlu0 %3527  ;;  %3782 = vmatpush1.bf16.msra.mxu0 %v3683_v54  ;;  %v3550_v29 = vpop.permute.xlu1 %3549 }
 0xa0f   : > { %v3554_v2 = vsel %vm8637_vm14, %v3548_v32, %v3550_v29  ;;  %v3635_v32 = vrot.slane %v3463_v9, 4  ;;  %vm8644_vm14 = vmmov %vm8643_vm3 }
 0xa10   : > { %v3646_v63 = vrot.slane %v3554_v2, 4 }
 0xa11   : > { %v3667_v2 = vsel %vm615_vm2, %v7762_v22, %v3635_v32 }
 0xa12   : > { %v3592_v23 = vpop.permute.xlu0 %3591  ;;  %v3526_v33 = vpop.permute.xlu1 %3525 }
 0xa13   : > { %v3531_v49 = vsel %vm484_vm5, %v3524_v59, %v3526_v33  ;;  %v3532_v37 = vsel %vm484_vm5, %v3526_v33, %v7894_v42  ;;  %v3597_v17 = vsel %vm553_vm6, %v3590_v38, %v3592_v23  ;;  %v3555_v33 = vsel %vm8641_vm12, %v3550_v29, %v7843_v50 }
 0xa14   : > { %v3711_v24 = vsel %vm615_vm2, %v3532_v37, %v3646_v63  ;;  %v3707_v20 = vsel %vm615_vm2, %v3531_v49, %v3645_v18  ;;  %v3651_v57 = vrot.slane %v3597_v17, 4  ;;  %v3641_v18 = vrot.slane %v3511_v16, 4 }
 0xa15   : > { %3783 = vmatprep.subr.bf16.mxu0 %v3711_v24 }
 0xa16   : > { %v7903_v26 = vpop.permute.xlu0 %3571  ;;  %3784 = vmatpush1.bf16.msra.mxu0 %v3707_v20  ;;  %v3594_v53 = vpop.permute.xlu1 %3593  ;;  %v3647_v20 = vrot.slane %v3555_v33, 4 }
 0xa17   : > { %v3598_v30 = vsel %vm553_vm6, %v3592_v23, %v3594_v53  ;;  %v3599_v29 = vsel %vm553_vm6, %v3594_v53, %v7851_v3 }
 0xa18   : > { %v3652_v61 = vrot.slane %v3598_v30, 4 }
 0xa1a   : > { %v7907_v56 = vpop.permute.xlu0 %3615  ;;  %v3570_v59 = vpop.permute.xlu1 %3569 }
 0xa1b   : > { %v3575_v25 = vsel %vm530_vm7, %v3568_v14, %v3570_v59  ;;  %v3576_v21 = vsel %vm530_vm7, %v3570_v59, %v7903_v26 }
 0xa1c   : > { %v3735_v36 = vsel %vm615_vm2, %v3576_v21, %v3652_v61  ;;  %v3731_v45 = vsel %vm615_vm2, %v3575_v25, %v3651_v57  ;;  %v3653_v25 = vrot.slane %v3599_v29, 4 }
 0xa1d   : > { %3785 = vmatprep.subr.bf16.mxu0 %v3735_v36 }
 0xa1e   : > { %v7916_v38 = vpop.permute.xlu0 %3470  ;;  %3786 = vmatpush1.bf16.msra.mxu0 %v3731_v45  ;;  %v3614_v35 = vpop.permute.xlu1 %3613 }
 0xa1f   : > { %v3476_v14 = vsel %vm411_vm0, %v7867_v5, %v7916_v38  ;;  %v3619_v34 = vsel %vm576_vm8, %v7863_v62, %v3614_v35  ;;  %v3620_v19 = vsel %vm576_vm8, %v3614_v35, %v7907_v56 }
 0xa20   : > { %v3636_v27 = vrot.slane %v3476_v14, 4  ;;  %4657 = vmatprep.subr.msk.bf16.mxu0 %vm615_vm2, %v3620_v19  ;;  %v3762_v44 = vsel %vm615_vm2, %v3619_v34, 0 }
 0xa22   : > { %v3475_v58 = vpop.permute.xlu0 %3474  ;;  %3788 = vmatpush1.bf16.msra.mxu0 %v3762_v44  ;;  %v3515_v54 = vpop.permute.xlu1 %3514  ;;  %v3671_v5 = vsel %vm615_vm2, %v7748_v47, %v3636_v27 }
 0xa23   : > { %v3520_v62 = vsel %vm461_vm1, %v7865_v0, %v3515_v54  ;;  %3820 = vmatprep.subr.bf16.mxu1 %v3671_v5  ;;  %v3489_v0 = vsel %vm8640_vm11, %v7881_v8, %v7845_v48  ;;  %v3533_v8 = vsel %vm484_vm5, %v7894_v42, %v7853_v60  ;;  %v3577_v42 = vsel %vm530_vm7, %v7903_v26, %v7861_v12 }
 0xa24   : > { %3821 = vmatpush1.bf16.msra.mxu1 %v3667_v2  ;;  %v3642_v46 = vrot.slane %v3520_v62, 4  ;;  %v3691_v22 = vsel %vm615_vm2, %v3489_v0, %v3641_v18  ;;  %v3715_v50 = vsel %vm615_vm2, %v3533_v8, %v3647_v20  ;;  %v3739_v3 = vsel %vm615_vm2, %v3577_v42, %v3653_v25 }
 0xa25   : > { %4658 = vmatmul.mubr.msk.bf16.vlgmr.msra.gmra.mrb[24].mxu0 %vm8638_vm4, %v7932_v28  ;;  %vm8645_vm4 = vmmov %vm8642_vm9  ;;  %v3621_v20 = vsel %vm576_vm8, %v7907_v56, %v7859_v13  ;;  %vm8647_vm11 = vcmask 588800  }
 0xa26   : > { %v3493_v41 = vpop.permute.xlu0 %3492  ;;  %v3519_v63 = vpop.permute.xlu1 %3518  ;;  %3893 = vmatprep.mubr.bf16.mxu0 %v8574_v4  ;;  %v3768_v29 = vsel %vm615_vm2, %v3621_v20, 0  ;;  %vm8648_vm12 = vmmov %vm8647_vm11 }
 0xa27   : > { %v3498_v47 = vsel %vm8639_vm15, %v7871_v39, %v3493_v41  ;;  %vm8646_vm15 = vmmov %vm8645_vm4 }
 0xa28   : > { %v3695_v23 = vsel %vm615_vm2, %v3498_v47, %v3642_v46 }
 0xa29   : > { %3822 = vmatprep.subr.bf16.mxu1 %v3695_v23 }
 0xa2a   : > { %v3497_v49 = vpop.permute.xlu0 %3496  ;;  %3823 = vmatpush1.bf16.msra.mxu1 %v3691_v22  ;;  %v3559_v37 = vpop.permute.xlu1 %3558 }
 0xa2b   : > { %v3564_v24 = vsel %vm8642_vm9, %v7869_v51, %v3559_v37  ;;  %vm8649_vm9 = vmmov %vm8645_vm4 }
 0xa2c   : > { %v3648_v39 = vrot.slane %v3564_v24, 4 }
 0xa2e   : > { %v3537_v17 = vpop.permute.xlu0 %3536  ;;  %v3563_v30 = vpop.permute.xlu1 %3562 }
 0xa2f   : > { %v3542_v48 = vsel %vm484_vm5, %v7875_v40, %v3537_v17 }
 0xa30   : > { %v3719_v57 = vsel %vm615_vm2, %v3542_v48, %v3648_v39 }
 0xa31   : > { %3824 = vmatprep.subr.bf16.mxu1 %v3719_v57 }
 0xa32   : > { %v3541_v51 = vpop.permute.xlu0 %3540  ;;  %3825 = vmatpush1.bf16.msra.mxu1 %v3715_v50  ;;  %v3603_v61 = vpop.permute.xlu1 %3602 }
 0xa33   : > { %v3608_v59 = vsel %vm553_vm6, %v7873_v11, %v3603_v61 }
 0xa34   : > { %v3654_v40 = vrot.slane %v3608_v59, 4 }
 0xa36   : > { %v3581_v21 = vpop.permute.xlu0 %3580  ;;  %v3607_v9 = vpop.permute.xlu1 %3606 }
 0xa37   : > { %v3586_v60 = vsel %vm530_vm7, %v7877_v6, %v3581_v21 }
 0xa38   : > { %v3743_v36 = vsel %vm615_vm2, %v3586_v60, %v3654_v40 }
 0xa39   : > { %3826 = vmatprep.subr.bf16.mxu1 %v3743_v36 }
 0xa3a   : > { %v3585_v53 = vpop.permute.xlu0 %3584  ;;  %3827 = vmatpush1.bf16.msra.mxu1 %v3739_v3  ;;  %v3473_v45 = vpop.permute.xlu1 %3472 }
 0xa3b   : > { %v3477_v11 = vsel %vm411_vm0, %v7916_v38, %v3473_v45  ;;  %v3478_v35 = vsel %vm411_vm0, %v3473_v45, %v3475_v58 }
 0xa3c   : > { %v3637_v32 = vrot.slane %v3477_v11, 4  ;;  %v3638_v14 = vrot.slane %v3478_v35, 4 }
 0xa3e   : > { %v3517_v6 = vpop.permute.xlu0 %3516  ;;  %v3495_v34 = vpop.permute.xlu1 %3494  ;;  %v3679_v12 = vsel %vm615_vm2, %v7822_v7, %v3638_v14  ;;  %v3675_v26 = vsel %vm615_vm2, %v7798_v52, %v3637_v32 }
 0xa3f   : > { %v3521_v19 = vsel %vm461_vm1, %v3515_v54, %v3517_v6  ;;  %v3522_v27 = vsel %vm461_vm1, %v3517_v6, %v3519_v63  ;;  %3861 = vmatprep.subr.bf16.mxu0 %v3679_v12  ;;  %v3499_v38 = vsel %vm8643_vm3, %v3493_v41, %v3495_v34  ;;  %v3500_v58 = vsel %vm8644_vm14, %v3495_v34, %v3497_v49  ;;  %vm8650_vm14 = vmmov %vm8643_vm3 }
 0xa40   : > { %v3643_v44 = vrot.slane %v3521_v19, 4  ;;  %v3644_v16 = vrot.slane %v3522_v27, 4  ;;  %3862 = vmatpush1.bf16.msra.mxu0 %v3675_v26 }
 0xa42   : > { %v3561_v5 = vpop.permute.xlu0 %3560  ;;  %v3539_v62 = vpop.permute.xlu1 %3538  ;;  %v3703_v2 = vsel %vm615_vm2, %v3500_v58, %v3644_v16  ;;  %v3699_v7 = vsel %vm615_vm2, %v3499_v38, %v3643_v44 }
 0xa43   : > { %v3565_v52 = vsel %vm8645_vm4, %v3559_v37, %v3561_v5  ;;  %v3566_v54 = vsel %vm8646_vm15, %v3561_v5, %v3563_v30  ;;  %3863 = vmatprep.subr.bf16.mxu0 %v3703_v2  ;;  %v3543_v63 = vsel %vm484_vm5, %v3537_v17, %v3539_v62  ;;  %v3544_v41 = vsel %vm484_vm5, %v3539_v62, %v3541_v51  ;;  %vm8651_vm15 = vmmov %vm8643_vm3 }
 0xa44   : > { %v3649_v18 = vrot.slane %v3565_v52, 4  ;;  %v3650_v46 = vrot.slane %v3566_v54, 4  ;;  %3864 = vmatpush1.bf16.msra.mxu0 %v3699_v7 }
 0xa46   : > { %v3605_v47 = vpop.permute.xlu0 %3604  ;;  %v3583_v0 = vpop.permute.xlu1 %3582  ;;  %v3727_v23 = vsel %vm615_vm2, %v3544_v41, %v3650_v46  ;;  %v3723_v22 = vsel %vm615_vm2, %v3543_v63, %v3649_v18 }
 0xa47   : > { %v3609_v33 = vsel %vm553_vm6, %v3603_v61, %v3605_v47  ;;  %v3610_v49 = vsel %vm553_vm6, %v3605_v47, %v3607_v9  ;;  %3865 = vmatprep.subr.bf16.mxu0 %v3727_v23  ;;  %v3587_v39 = vsel %vm530_vm7, %v3581_v21, %v3583_v0  ;;  %v3588_v17 = vsel %vm530_vm7, %v3583_v0, %v3585_v53 }
 0xa48   : > { %v3655_v37 = vrot.slane %v3609_v33, 4  ;;  %v3656_v24 = vrot.slane %v3610_v49, 4  ;;  %3866 = vmatpush1.bf16.msra.mxu0 %v3723_v22 }
 0xa4a   : > { %v3625_v30 = vpop.permute.xlu0 %3624  ;;  %v3623_v48 = vpop.permute.xlu1 %3622  ;;  %v3751_v8 = vsel %vm615_vm2, %v3588_v17, %v3656_v24  ;;  %v3747_v57 = vsel %vm615_vm2, %v3587_v39, %v3655_v37 }
 0xa4b   : > { %v3630_v50 = vsel %vm576_vm8, %v3623_v48, %v3625_v30  ;;  %3867 = vmatprep.subr.bf16.mxu0 %v3751_v8 }
 0xa4c   : > { %4659 = vmatprep.subr.msk.bf16.mxu1 %vm615_vm2, %v3630_v50  ;;  %3868 = vmatpush1.bf16.msra.mxu0 %v3747_v57 }
 0xa4d   : > { %3829 = vmatpush1.bf16.msra.mxu1 %v3768_v29 }
 0xa4e   : > { %v3629_v13 = vpop.permute.xlu0 %3628  ;;  %v3627_v56 = vpop.permute.xlu1 %3626 }
 0xa4f   : > { %v3631_v51 = vsel %vm576_vm8, %v3625_v30, %v3627_v56  ;;  %v3632_v61 = vsel %vm576_vm8, %v3627_v56, %v3629_v13 }
 0xa50   : > { %v3774_v59 = vsel %vm615_vm2, %v3631_v51, 0  ;;  %4660 = vmatmul.mubr.msk.bf16.vlgmr.msra.gmra.mrb[32].mxu1 %vm8647_vm11, %v7932_v28  ;;  %4661 = vmatprep.subr.msk.bf16.mxu0 %vm615_vm2, %v3632_v61  ;;  %vm8652_vm11 = vmmov %vm8643_vm3 }
 0xa51   : > { %3870 = vmatpush1.bf16.msra.mxu0 %v3774_v59  ;;  %4337 = vmatprep.mubr.bf16.mxu1 %v8574_v4 }
 0xa54   : > { %4662 = vmatmul.mubr.msk.bf16.vlgmr.msra.gmra.mrb[28].mxu0 %vm8648_vm12, %v7932_v28  ;;  %vm8653_vm12 = vmmov %vm8645_vm4 }
 0xa55   : > { %4378 = vmatprep.mubr.bf16.mxu0 %v8574_v4 }
 0xa5f   : > { %v3756_v25 = vpop.permute.xlu1 %3755 }
 0xaf8   : > { %v3813_v40 = vpop.f32.mrb[24].mxu0 }
 0xaf9   : > { %v3815_v21 = vpop.f32.mrb[25].mxu0  ;;  %v3814_v9 = vadd.f32 %v3813_v40, %v3756_v25 }
 0xafa   : > { %v3816_v60 = vadd.f32 %v3815_v21, %v3756_v25  ;;  %v3817_v42 = vpop.f32.mrb[26].mxu0 }
 0xafb   : > { %v3818_v36 = vpop.f32.mrb[27].mxu0  ;;  %v3902_v3 = vmax.f32 %v3814_v9, 0.0 }
 0xafc   : > { %v3903_v53 = vmax.f32 %v3816_v60, 0.0  ;;  %v4672_v60 = vld [vmem:[%s7171_s21 + $0x18] sm:$0xff] }
 0xafd   : > { %v3908_v45 = vmul.f32 %v3902_v3, %v8601_v10 }
 0xafe   : > { %v3909_v11 = vmul.f32 %v3903_v53, %v8632_v15 }
 0xaff   : > { %3917 = vrot.lane.b32.xlu0 %v3908_v45, %s5202_s17 }
 0xb00   : > { %3919 = vrot.lane.b32.xlu1 %v3909_v11, %s5202_s17 }
 0xb23   : > { %v3854_v28 = vpop.f32.mrb[32].mxu1 }
 0xb24   : > { %v3855_v35 = vadd.f32 %v3854_v28, %v3756_v25  ;;  %v3856_v32 = vpop.f32.mrb[33].mxu1 }
 0xb25   : > { %v3857_v14 = vadd.f32 %v3856_v32, %v3756_v25  ;;  %v3858_v6 = vpop.f32.mrb[34].mxu1 }
 0xb26   : > { %v3904_v34 = vmax.f32 %v3855_v35, 0.0  ;;  %v3859_v12 = vpop.f32.mrb[35].mxu1 }
 0xb27   : > { %v3905_v26 = vmax.f32 %v3857_v14, 0.0  ;;  %v3895_v19 = vpop.f32.mrb[28].mxu0 }
 0xb28   : > { %v3910_v27 = vmul.f32 %v3904_v34, %v6495_v55  ;;  %v3896_v44 = vadd.f32 %v3895_v19, %v3756_v25  ;;  %v3897_v16 = vpop.f32.mrb[29].mxu0 }
 0xb29   : > { %v3911_v38 = vmul.f32 %v3905_v26, %v6570_v1  ;;  %v3898_v58 = vadd.f32 %v3897_v16, %v3756_v25  ;;  %v3899_v5 = vpop.f32.mrb[30].mxu0 }
 0xb2a   : > { %v3906_v62 = vmax.f32 %v3896_v44, 0.0  ;;  %3921 = vrot.lane.b32.xlu0 %v3910_v27, %s5202_s17  ;;  %v3900_v2 = vpop.f32.mrb[31].mxu0 }
 0xb2b   : > { %v3907_v7 = vmax.f32 %v3898_v58, 0.0  ;;  %3936 = vrot.lane.b32.xlu1 %v3911_v38, %s5202_s17 }
 0xb2c   : > { %v3912_v52 = vmul.f32 %v3906_v62, %v8633_v31 }
 0xb2d   : > { %v3913_v54 = vmul.f32 %v3907_v7, %v8634_v43 }
 0xb2e   : > { %3938 = vrot.lane.b32.xlu0 %v3912_v52, %s5202_s17 }
 0xb2f   : > { %3940 = vrot.lane.b32.xlu1 %v3913_v54, %s5202_s17 }
 0xb71   : > { %v3918_v18 = vpop.permute.xlu0 %3917 }
 0xb72   : > { %3929 = vst.msk [vmem:[%s5291_s23] sm:$0xff] %vm2334_vm13, %v3918_v18  ;;  %v3920_v46 = vpop.permute.xlu1 %3919 }
 0xb73   : > { %v3923_v63 = vsel %vm2323_vm10, %v3918_v18, %v3920_v46 }
 0xb74   : > { %3930 = vst [vmem:[%s5291_s23 + $0x8] sm:$0xff] %v3923_v63 }
 0xb79   : > { %v3952_v37 = vld [vmem:[%s5291_s23] sm:$0xff] }
 0xb7a   : > { %v8043_v24 = vpack.c.bf16 %v3952_v37, %v3952_v37 }
 0xb7b   : > { %v3953_v17 = vld [vmem:[%s5291_s23 + $0x8] sm:$0xff] }
 0xb7c   : > { %4027 = vrot.lane.b32.xlu1 %v8043_v24, %s5192_s25  ;;  %3979 = vrot.lane.b32.xlu0 %v8043_v24, %s5191_s24  ;;  %v8077_v30 = vpack.c.bf16 %v3953_v17, %v3953_v17 }
 0xb80   : > { %4071 = vrot.lane.b32.xlu1 %v8043_v24, %s8577_s15  ;;  %4005 = vrot.lane.b32.xlu0 %v8043_v24, %s8576_s14 }
 0xb84   : > { %4115 = vrot.lane.b32.xlu1 %v8043_v24, %s8579_s28  ;;  %4049 = vrot.lane.b32.xlu0 %v8043_v24, %s8580_s26 }
 0xb88   : > { %4137 = vrot.lane.b32.xlu1 %v8043_v24, %s8581_s12  ;;  %4093 = vrot.lane.b32.xlu0 %v8043_v24, %s8582_s13 }
 0xb9c   : > { %v3922_v41 = vpop.permute.xlu0 %3921 }
 0xb9d   : > { %v3924_v47 = vsel %vm2323_vm10, %v3920_v46, %v3922_v41  ;;  %3932 = vst.msk [vmem:[%s5291_s23 + $0x18] sm:$0xff] %vm2323_vm10, %v3922_v41  ;;  %v3937_v0 = vpop.permute.xlu1 %3936 }
 0xb9e   : > { %3931 = vst [vmem:[%s5291_s23 + $0x10] sm:$0xff] %v3924_v47  ;;  %4663 = vst.msk [vmem:[%s5291_s23 + $0x20] sm:$0xff] %vm2334_vm13, %v3937_v0 }
 0xba0   : > { %v3939_v23 = vpop.permute.xlu0 %3938 }
 0xba1   : > { %v3942_v22 = vsel %vm2323_vm10, %v3937_v0, %v3939_v23  ;;  %v3941_v33 = vpop.permute.xlu1 %3940 }
 0xba2   : > { %4664 = vst [vmem:[%s5291_s23 + $0x28] sm:$0xff] %v3942_v22  ;;  %v8036_v49 = vsel %vm2323_vm10, %v3939_v23, %v3941_v33  ;;  %4666 = vst.msk [vmem:[%s5291_s23 + $0x38] sm:$0xff] %vm2323_vm10, %v3941_v33  ;;  %v8091_v48 = vpack.c.bf16 %v3942_v22, %v3942_v22 }
 0xba3   : > { %4665 = vst [vmem:[%s5291_s23 + $0x30] sm:$0xff] %v8036_v49  ;;  %v8149_v51 = vpack.c.bf16 %v8036_v49, %v8036_v49 }
 0xba4   : > { %v3955_v50 = vld [vmem:[%s5291_s23 + $0x18] sm:$0xff] }
 0xba5   : > { %v3956_v20 = vld [vmem:[%s5291_s23 + $0x20] sm:$0xff]  ;;  %v3963_v29 = vpack.c.bf16 %v3955_v50, %v3955_v50  ;;  %v3954_v13 = vld [vmem:[%s5291_s23 + $0x10] sm:$0xff] }
 0xba6   : > { %v8062_v39 = vpack.c.bf16 %v3956_v20, %v3956_v20  ;;  %v8128_v56 = vpack.c.bf16 %v3954_v13, %v3954_v13 }
 0xba8   : > { %4038 = vrot.lane.b32.xlu1 %v8062_v39, %s5192_s25  ;;  %3994 = vrot.lane.b32.xlu0 %v8062_v39, %s5191_s24 }
 0xba9   : > { %v3959_v8 = vld [vmem:[%s5291_s23 + $0x38] sm:$0xff] }
 0xbaa   : > { %v3967_v57 = vpack.c.bf16 %v3959_v8, %v3959_v8 }
 0xbac   : > { %4082 = vrot.lane.b32.xlu1 %v8062_v39, %s8577_s15  ;;  %4016 = vrot.lane.b32.xlu0 %v8062_v39, %s8576_s14 }
 0xbb0   : > { %4126 = vrot.lane.b32.xlu1 %v8062_v39, %s8579_s28  ;;  %4060 = vrot.lane.b32.xlu0 %v8062_v39, %s8580_s26 }
 0xbb4   : > { %4104 = vrot.lane.b32.xlu0 %v8062_v39, %s8582_s13  ;;  %4029 = vrot.lane.b32.xlu1 %v8077_v30, %s5192_s25 }
 0xbb8   : > { %4073 = vrot.lane.b32.xlu1 %v8077_v30, %s8577_s15  ;;  %3981 = vrot.lane.b32.xlu0 %v8077_v30, %s5191_s24 }
 0xbbc   : > { %4117 = vrot.lane.b32.xlu1 %v8077_v30, %s8579_s28  ;;  %4007 = vrot.lane.b32.xlu0 %v8077_v30, %s8576_s14 }
 0xbc0   : > { %3996 = vrot.lane.b32.xlu1 %v8091_v48, %s5191_s24  ;;  %4051 = vrot.lane.b32.xlu0 %v8077_v30, %s8580_s26 }
 0xbc4   : > { %4000 = vrot.lane.b32.xlu1 %v3967_v57, %s5191_s24  ;;  %4095 = vrot.lane.b32.xlu0 %v8077_v30, %s8582_s13 }
 0xbc8   : > { %4033 = vrot.lane.b32.xlu1 %v3963_v29, %s5192_s25  ;;  %4139 = vrot.lane.b32.xlu0 %v8077_v30, %s8581_s12 }
 0xbcc   : > { %4018 = vrot.lane.b32.xlu1 %v8091_v48, %s8576_s14  ;;  %3985 = vrot.lane.b32.xlu0 %v3963_v29, %s5191_s24 }
 0xbd0   : > { %4022 = vrot.lane.b32.xlu1 %v3967_v57, %s8576_s14  ;;  %4040 = vrot.lane.b32.xlu0 %v8091_v48, %s5192_s25 }
 0xbd4   : > { %4077 = vrot.lane.b32.xlu1 %v3963_v29, %s8577_s15  ;;  %4044 = vrot.lane.b32.xlu0 %v3967_v57, %s5192_s25 }
 0xbd8   : > { %4062 = vrot.lane.b32.xlu1 %v8091_v48, %s8580_s26  ;;  %4011 = vrot.lane.b32.xlu0 %v3963_v29, %s8576_s14 }
 0xbdc   : > { %4066 = vrot.lane.b32.xlu1 %v3967_v57, %s8580_s26  ;;  %4084 = vrot.lane.b32.xlu0 %v8091_v48, %s8577_s15 }
 0xbe0   : > { %4121 = vrot.lane.b32.xlu1 %v3963_v29, %s8579_s28  ;;  %4088 = vrot.lane.b32.xlu0 %v3967_v57, %s8577_s15 }
 0xbe4   : > { %4106 = vrot.lane.b32.xlu1 %v8091_v48, %s8582_s13  ;;  %4055 = vrot.lane.b32.xlu0 %v3963_v29, %s8580_s26 }
 0xbe8   : > { %4110 = vrot.lane.b32.xlu1 %v3967_v57, %s8582_s13  ;;  %4128 = vrot.lane.b32.xlu0 %v8091_v48, %s8579_s28 }
 0xbec   : > { %3983 = vrot.lane.b32.xlu1 %v8128_v56, %s5191_s24  ;;  %4132 = vrot.lane.b32.xlu0 %v3967_v57, %s8579_s28 }
 0xbee   : > { %v4028_v61 = vpop.permute.xlu1 %4027  ;;  %v8163_v59 = vpop.permute.xlu0 %3979 }
 0xbf0   : > { %4009 = vrot.lane.b32.xlu1 %v8128_v56, %s8576_s14  ;;  %4031 = vrot.lane.b32.xlu0 %v8128_v56, %s5192_s25 }
 0xbf2   : > { %v4072_v25 = vpop.permute.xlu1 %4071  ;;  %v4006_v40 = vpop.permute.xlu0 %4005 }
 0xbf4   : > { %4053 = vrot.lane.b32.xlu1 %v8128_v56, %s8580_s26  ;;  %4075 = vrot.lane.b32.xlu0 %v8128_v56, %s8577_s15 }
 0xbf6   : > { %v4116_v21 = vpop.permute.xlu1 %4115  ;;  %v4050_v9 = vpop.permute.xlu0 %4049 }
 0xbf8   : > { %4097 = vrot.lane.b32.xlu1 %v8128_v56, %s8582_s13  ;;  %4119 = vrot.lane.b32.xlu0 %v8128_v56, %s8579_s28 }
 0xbfa   : > { %v8177_v42 = vpop.permute.xlu1 %4137  ;;  %v4094_v36 = vpop.permute.xlu0 %4093 }
 0xbfc   : > { %4143 = vrot.lane.b32.xlu1 %v3963_v29, %s8581_s12  ;;  %4099 = vrot.lane.b32.xlu0 %v3963_v29, %s8582_s13 }
 0xc00   : > { %4141 = vrot.lane.b32.xlu1 %v8128_v56, %s8581_s12  ;;  %3998 = vrot.lane.b32.xlu0 %v8149_v51, %s5191_s24 }
 0xc04   : > { %4042 = vrot.lane.b32.xlu1 %v8149_v51, %s5192_s25  ;;  %4020 = vrot.lane.b32.xlu0 %v8149_v51, %s8576_s14 }
 0xc08   : > { %4086 = vrot.lane.b32.xlu1 %v8149_v51, %s8577_s15  ;;  %4064 = vrot.lane.b32.xlu0 %v8149_v51, %s8580_s26 }
 0xc0c   : > { %4130 = vrot.lane.b32.xlu1 %v8149_v51, %s8579_s28  ;;  %4108 = vrot.lane.b32.xlu0 %v8149_v51, %s8582_s13 }
 0xc10   : > { %4150 = vrot.lane.b32.xlu1 %v8091_v48, %s8581_s12  ;;  %4148 = vrot.lane.b32.xlu0 %v8062_v39, %s8581_s12 }
 0xc14   : > { %4154 = vrot.lane.b32.xlu1 %v3967_v57, %s8581_s12  ;;  %4152 = vrot.lane.b32.xlu0 %v8149_v51, %s8581_s12 }
 0xc18   : > { %4281 = vperm.xlu0 %5140, %v4672_v60  }
 0xc1a   : > { %v4039_v3 = vpop.permute.xlu1 %4038  ;;  %v3995_v53 = vpop.permute.xlu0 %3994 }
 0xc1e   : > { %v4083_v45 = vpop.permute.xlu1 %4082  ;;  %v4017_v11 = vpop.permute.xlu0 %4016 }
 0xc22   : > { %v4127_v28 = vpop.permute.xlu1 %4126  ;;  %v4061_v35 = vpop.permute.xlu0 %4060 }
 0xc26   : > { %v8179_v32 = vpop.permute.xlu1 %4029  ;;  %v4105_v14 = vpop.permute.xlu0 %4104 }
 0xc27   : > { %v4035_v12 = vsel %vm461_vm1, %v4028_v61, %v8179_v32 }
 0xc28   : > { %v4165_v26 = vrot.slane %v4035_v12, 4 }
 0xc2a   : > { %v8181_v6 = vpop.permute.xlu1 %4073  ;;  %v3982_v34 = vpop.permute.xlu0 %3981 }
 0xc2b   : > { %v4079_v44 = vsel %vm8649_vm9, %v4072_v25, %v8181_v6  ;;  %vm8654_vm9 = vmmov %vm8645_vm4 }
 0xc2c   : > { %v4171_v58 = vrot.slane %v4079_v44, 4 }
 0xc2e   : > { %v8185_v19 = vpop.permute.xlu1 %4117  ;;  %v8187_v27 = vpop.permute.xlu0 %4007 }
 0xc2f   : > { %v4013_v16 = vsel %vm8643_vm3, %v4006_v40, %v8187_v27  ;;  %v4123_v2 = vsel %vm553_vm6, %v4116_v21, %v8185_v19 }
 0xc30   : > { %v8194_v38 = vsel %vm615_vm2, %v4013_v16, %v4165_v26  ;;  %v4177_v46 = vrot.slane %v4123_v2, 4 }
 0xc32   : > { %v8196_v5 = vpop.permute.xlu1 %3996  ;;  %v8198_v62 = vpop.permute.xlu0 %4051 }
 0xc33   : > { %v4002_v7 = vsel %vm411_vm0, %v3995_v53, %v8196_v5  ;;  %v4057_v52 = vsel %vm484_vm5, %v4050_v9, %v8198_v62 }
 0xc34   : > { %v4162_v54 = vrot.slane %v4002_v7, 4  ;;  %v8207_v18 = vsel %vm615_vm2, %v4057_v52, %v4171_v58 }
 0xc36   : > { %v8209_v63 = vpop.permute.xlu1 %4000  ;;  %v8211_v41 = vpop.permute.xlu0 %4095  ;;  %v4197_v47 = vsel %vm615_vm2, %v8062_v39, %v4162_v54 }
 0xc37   : > { %v4101_v0 = vsel %vm530_vm7, %v4094_v36, %v8211_v41  ;;  %4346 = vmatprep.subr.bf16.mxu0 %v4197_v47 }
 0xc38   : > { %v8218_v23 = vsel %vm615_vm2, %v4101_v0, %v4177_v46 }
 0xc3a   : > { %v4034_v22 = vpop.permute.xlu1 %4033  ;;  %v8220_v33 = vpop.permute.xlu0 %4139 }
 0xc3e   : > { %v8222_v49 = vpop.permute.xlu1 %4018  ;;  %v3986_v37 = vpop.permute.xlu0 %3985 }
 0xc3f   : > { %v4024_v57 = vsel %vm8650_vm14, %v4017_v11, %v8222_v49  ;;  %vm8657_vm14 = vmmov %vm8645_vm4 }
 0xc42   : > { %v8224_v20 = vpop.permute.xlu1 %4022  ;;  %v8226_v17 = vpop.permute.xlu0 %4040 }
 0xc43   : > { %v4046_v39 = vsel %vm461_vm1, %v4039_v3, %v8226_v17 }
 0xc44   : > { %v4168_v8 = vrot.slane %v4046_v39, 4 }
 0xc46   : > { %v4078_v50 = vpop.permute.xlu1 %4077  ;;  %v8232_v29 = vpop.permute.xlu0 %4044  ;;  %v4221_v13 = vsel %vm615_vm2, %v4024_v57, %v4168_v8 }
 0xc4a   : > { %v8235_v61 = vpop.permute.xlu1 %4062  ;;  %v4012_v25 = vpop.permute.xlu0 %4011 }
 0xc4b   : > { %v4068_v36 = vsel %vm484_vm5, %v4061_v35, %v8235_v61 }
 0xc4e   : > { %v8237_v40 = vpop.permute.xlu1 %4066  ;;  %v8239_v21 = vpop.permute.xlu0 %4084 }
 0xc4f   : > { %v4090_v9 = vsel %vm8645_vm4, %v4083_v45, %v8239_v21  ;;  %v3987_v45 = vsel %vm411_vm0, %v8163_v59, %v3982_v34 }
 0xc50   : > { %v4174_v60 = vrot.slane %v4090_v9, 4  ;;  %v4159_v46 = vrot.slane %v3987_v45, 4 }
 0xc52   : > { %v4122_v3 = vpop.permute.xlu1 %4121  ;;  %v8245_v53 = vpop.permute.xlu0 %4088  ;;  %v4245_v11 = vsel %vm615_vm2, %v4068_v36, %v4174_v60 }
 0xc56   : > { %v8248_v12 = vpop.permute.xlu1 %4106  ;;  %v4056_v26 = vpop.permute.xlu0 %4055 }
 0xc57   : > { %v4112_v35 = vsel %vm530_vm7, %v4105_v14, %v8248_v12 }
 0xc5a   : > { %v8250_v44 = vpop.permute.xlu1 %4110  ;;  %v8252_v16 = vpop.permute.xlu0 %4128 }
 0xc5b   : > { %v4134_v58 = vsel %vm553_vm6, %v4127_v28, %v8252_v16 }
 0xc5c   : > { %v4180_v2 = vrot.slane %v4134_v58, 4 }
 0xc5e   : > { %v3984_v7 = vpop.permute.xlu1 %3983  ;;  %v8260_v52 = vpop.permute.xlu0 %4132  ;;  %v4269_v54 = vsel %vm615_vm2, %v4112_v35, %v4180_v2 }
 0xc5f   : > { %v3988_v47 = vsel %vm411_vm0, %v3982_v34, %v3984_v7  ;;  %v3989_v0 = vsel %vm411_vm0, %v3984_v7, %v3986_v37  ;;  %v4185_v34 = vsel %vm615_vm2, %v8043_v24, %v4159_v46 }
 0xc60   : > { %v4160_v39 = vrot.slane %v3988_v47, 4  ;;  %v4161_v8 = vrot.slane %v3989_v0, 4 }
 0xc62   : > { %v4010_v28 = vpop.permute.xlu1 %4009  ;;  %v4032_v57 = vpop.permute.xlu0 %4031  ;;  %v4189_v59 = vsel %vm615_vm2, %v8077_v30, %v4160_v39  ;;  %v4193_v14 = vsel %vm615_vm2, %v8128_v56, %v4161_v8 }
 0xc63   : > { %v4036_v9 = vsel %vm461_vm1, %v8179_v32, %v4032_v57  ;;  %v4037_v60 = vsel %vm461_vm1, %v4032_v57, %v4034_v22  ;;  %4305 = vmatprep.subr.bf16.mxu1 %v4189_v59  ;;  %4347 = vmatpush1.bf16.msra.mxu0 %v4193_v14  ;;  %v4014_v58 = vsel %vm8651_vm15, %v8187_v27, %v4010_v28 }
 0xc64   : > { %v4166_v37 = vrot.slane %v4036_v9, 4  ;;  %v4167_v36 = vrot.slane %v4037_v60, 4  ;;  %4306 = vmatpush1.bf16.msra.mxu1 %v4185_v34  ;;  %v4015_v30 = vsel %vm8652_vm11, %v4010_v28, %v4012_v25  ;;  %4348 = vmatprep.subr.bf16.mxu0 %v4221_v13 }
 0xc66   : > { %v4054_v56 = vpop.permute.xlu1 %4053  ;;  %v4076_v45 = vpop.permute.xlu0 %4075  ;;  %v4213_v32 = vsel %vm615_vm2, %v4014_v58, %v4166_v37  ;;  %v4217_v22 = vsel %vm615_vm2, %v4015_v30, %v4167_v36 }
 0xc67   : > { %v4080_v2 = vsel %vm8653_vm12, %v8181_v6, %v4076_v45  ;;  %v4081_v24 = vsel %vm8654_vm9, %v4076_v45, %v4078_v50  ;;  %4307 = vmatprep.subr.bf16.mxu1 %v4213_v32  ;;  %4349 = vmatpush1.bf16.msra.mxu0 %v4217_v22  ;;  %v4058_v27 = vsel %vm484_vm5, %v8198_v62, %v4054_v56 }
 0xc68   : > { %v4172_v35 = vrot.slane %v4080_v2, 4  ;;  %v4173_v7 = vrot.slane %v4081_v24, 4  ;;  %4308 = vmatpush1.bf16.msra.mxu1 %v8194_v38  ;;  %v4059_v13 = vsel %vm484_vm5, %v4054_v56, %v4056_v26  ;;  %4350 = vmatprep.subr.bf16.mxu0 %v4245_v11 }
 0xc6a   : > { %v4098_v25 = vpop.permute.xlu1 %4097  ;;  %v4120_v46 = vpop.permute.xlu0 %4119  ;;  %v4237_v47 = vsel %vm615_vm2, %v4058_v27, %v4172_v35  ;;  %v4241_v6 = vsel %vm615_vm2, %v4059_v13, %v4173_v7 }
 0xc6b   : > { %v4124_v50 = vsel %vm553_vm6, %v8185_v19, %v4120_v46  ;;  %v4125_v0 = vsel %vm553_vm6, %v4120_v46, %v4122_v3  ;;  %4309 = vmatprep.subr.bf16.mxu1 %v4237_v47  ;;  %4351 = vmatpush1.bf16.msra.mxu0 %v4241_v6  ;;  %v4102_v38 = vsel %vm530_vm7, %v8211_v41, %v4098_v25 }
 0xc6c   : > { %v4178_v39 = vrot.slane %v4124_v50, 4  ;;  %4310 = vmatpush1.bf16.msra.mxu1 %v8207_v18  ;;  %4352 = vmatprep.subr.bf16.mxu0 %v4269_v54  ;;  %v4179_v62 = vrot.slane %v4125_v0, 4  ;;  %v4145_v18 = vsel %vm576_vm8, %v8177_v42, %v8220_v33  ;;  %v4669_v42 = vld [vmem:[%s7253_s19 + $0xc] sm:$0xf] }
 0xc6e   : > { %v4144_v11 = vpop.permute.xlu1 %4143  ;;  %v4100_v26 = vpop.permute.xlu0 %4099  ;;  %v4261_v8 = vsel %vm615_vm2, %v4102_v38, %v4178_v39 }
 0xc6f   : > { %v4103_v28 = vsel %vm530_vm7, %v4098_v25, %v4100_v26  ;;  %4311 = vmatprep.subr.bf16.mxu1 %v4261_v8 }
 0xc70   : > { %4312 = vmatpush1.bf16.msra.mxu1 %v8218_v23  ;;  %v4265_v19 = vsel %vm615_vm2, %v4103_v28, %v4179_v62  ;;  %v4288_v23 = vsel %vm615_vm2, %v4145_v18, 0 }
 0xc71   : > { %4353 = vmatpush1.bf16.msra.mxu0 %v4265_v19 }
 0xc72   : > { %v4142_v41 = vpop.permute.xlu1 %4141  ;;  %v3999_v3 = vpop.permute.xlu0 %3998 }
 0xc73   : > { %v4146_v54 = vsel %vm576_vm8, %v8220_v33, %v4142_v41  ;;  %v4003_v57 = vsel %vm411_vm0, %v8196_v5, %v3999_v3  ;;  %v4004_v59 = vsel %vm411_vm0, %v3999_v3, %v8209_v63  ;;  %vm8655_vm0 = vcmask 588800  }
 0xc74   : > { %v4163_v14 = vrot.slane %v4003_v57, 4  ;;  %v4164_v9 = vrot.slane %v4004_v59, 4  ;;  %4673 = vmatprep.subr.msk.bf16.mxu1 %vm615_vm2, %v4146_v54 }
 0xc75   : > { %4314 = vmatpush1.bf16.msra.mxu1 %v4288_v23 }
 0xc76   : > { %v4043_v60 = vpop.permute.xlu1 %4042  ;;  %v4021_v34 = vpop.permute.xlu0 %4020  ;;  %v4205_v37 = vsel %vm615_vm2, %v8149_v51, %v4164_v9  ;;  %v4201_v58 = vsel %vm615_vm2, %v8091_v48, %v4163_v14 }
 0xc77   : > { %v4047_v33 = vsel %vm461_vm1, %v8226_v17, %v4043_v60  ;;  %v4048_v5 = vsel %vm461_vm1, %v4043_v60, %v8232_v29  ;;  %4387 = vmatprep.subr.bf16.mxu1 %v4205_v37  ;;  %v4026_v30 = vsel %vm8643_vm3, %v4021_v34, %v8224_v20  ;;  %vm8656_vm1 = vmmov %vm8643_vm3 }
 0xc78   : > { %v4169_v63 = vrot.slane %v4047_v33, 4  ;;  %v4170_v36 = vrot.slane %v4048_v5, 4  ;;  %4674 = vmatmul.mubr.msk.bf16.vlgmr.msra.gmra.mrb[36].mxu1 %vm8655_vm0, %v4669_v42  ;;  %v4025_v29 = vsel %vm8656_vm1, %v8222_v49, %v4021_v34 }
 0xc79   : > { %4388 = vmatpush1.bf16.msra.mxu1 %v4201_v58  ;;  %4419 = vmatprep.mubr.bf16.mxu1 %v8574_v4  ;;  %v4437_v58 = vld [vmem:[#allocation2 + $0x18] sm:$0xff] }
 0xc7a   : > { %v4087_v51 = vpop.permute.xlu1 %4086  ;;  %v4065_v56 = vpop.permute.xlu0 %4064  ;;  %v4229_v17 = vsel %vm615_vm2, %v4026_v30, %v4170_v36  ;;  %v4225_v20 = vsel %vm615_vm2, %v4025_v29, %v4169_v63 }
 0xc7b   : > { %v4091_v45 = vsel %vm8657_vm14, %v8239_v21, %v4087_v51  ;;  %v4092_v32 = vsel %vm8645_vm4, %v4087_v51, %v8245_v53  ;;  %4389 = vmatprep.subr.bf16.mxu1 %v4229_v17  ;;  %v4070_v4 = vsel %vm484_vm5, %v4065_v56, %v8237_v40  ;;  %v4069_v49 = vsel %vm484_vm5, %v8235_v61, %v4065_v56  ;;  %vm8658_vm5 = vmmov %vm8655_vm0  ;;  %v4461_v17 = vld [vmem:[#allocation2 + $0x20] sm:$0xff] }
 0xc7c   : > { %v4175_v48 = vrot.slane %v4091_v45, 4  ;;  %v4176_v22 = vrot.slane %v4092_v32, 4  ;;  %v4147_v40 = vsel %vm576_vm8, %v4142_v41, %v4144_v11  ;;  %v4435_v45 = vld [vmem:[#allocation2 + $0x8] sm:$0xff]  ;;  %v4436_v32 = vld [vmem:[#allocation2 + $0x10] sm:$0xff] }
 0xc7d   : > { %4390 = vmatpush1.bf16.msra.mxu1 %v4225_v20  ;;  %v4294_v6 = vsel %vm615_vm2, %v4147_v40, 0 }
 0xc7e   : > { %v4131_v2 = vpop.permute.xlu1 %4130  ;;  %v4109_v24 = vpop.permute.xlu0 %4108  ;;  %v4253_v35 = vsel %vm615_vm2, %v4070_v4, %v4176_v22  ;;  %v4249_v13 = vsel %vm615_vm2, %v4069_v49, %v4175_v48  ;;  %v4464_v49 = vld [vmem:[#allocation2 + $0x38] sm:$0xff] }
 0xc7f   : > { %v4135_v21 = vsel %vm553_vm6, %v8252_v16, %v4131_v2  ;;  %v4136_v53 = vsel %vm553_vm6, %v4131_v2, %v8260_v52  ;;  %4391 = vmatprep.subr.bf16.mxu1 %v4253_v35  ;;  %v4114_v25 = vsel %vm530_vm7, %v4109_v24, %v8250_v44  ;;  %v4113_v16 = vsel %vm530_vm7, %v8248_v12, %v4109_v24  ;;  %vm8659_vm6 = vmmov %vm8655_vm0  ;;  %v4462_v24 = vld [vmem:[#allocation2 + $0x28] sm:$0xff] }
 0xc80   : > { %v4181_v7 = vrot.slane %v4135_v21, 4  ;;  %v4182_v27 = vrot.slane %v4136_v53, 4 }
 0xc81   : > { %4392 = vmatpush1.bf16.msra.mxu1 %v4249_v13 }
 0xc82   : > { %v4151_v46 = vpop.permute.xlu1 %4150  ;;  %v4149_v47 = vpop.permute.xlu0 %4148  ;;  %v4277_v61 = vsel %vm615_vm2, %v4114_v25, %v4182_v27  ;;  %v4273_v50 = vsel %vm615_vm2, %v4113_v16, %v4181_v7  ;;  %v4463_v7 = vld [vmem:[#allocation2 + $0x30] sm:$0xff] }
 0xc83   : > { %v4156_v52 = vsel %vm576_vm8, %v4149_v47, %v4151_v46  ;;  %4393 = vmatprep.subr.bf16.mxu1 %v4277_v61 }
 0xc84   : > { %4675 = vmatprep.subr.msk.bf16.mxu0 %vm615_vm2, %v4156_v52 }
 0xc85   : > { %4355 = vmatpush1.bf16.msra.mxu0 %v4294_v6  ;;  %4394 = vmatpush1.bf16.msra.mxu1 %v4273_v50 }
 0xc86   : > { %v4155_v44 = vpop.permute.xlu1 %4154  ;;  %v4153_v0 = vpop.permute.xlu0 %4152 }
 0xc87   : > { %v4157_v39 = vsel %vm576_vm8, %v4151_v46, %v4153_v0  ;;  %v4158_v38 = vsel %vm576_vm8, %v4153_v0, %v4155_v44 }
 0xc88   : > { %v4300_v62 = vsel %vm615_vm2, %v4157_v39, 0  ;;  %4676 = vmatmul.mubr.msk.bf16.vlgmr.msra.gmra.mrb[32].mxu0 %vm8658_vm5, %v4669_v42  ;;  %4677 = vmatprep.subr.msk.bf16.mxu1 %vm615_vm2, %v4158_v38 }
 0xc89   : > { %4396 = vmatpush1.bf16.msra.mxu1 %v4300_v62 }
 0xc8c   : > { %4678 = vmatmul.mubr.msk.bf16.vlgmr.msra.gmra.mrb[40].mxu1 %vm8659_vm6, %v4669_v42 }
 0xc97   : > { %v4282_v28 = vpop.permute.xlu0 %4281 }
 0xd4b   : > { %v4339_v12 = vpop.f32.mrb[36].mxu1 }
 0xd4c   : > { %v4341_v11 = vpop.f32.mrb[37].mxu1  ;;  %v4340_v57 = vadd.f32 %v4339_v12, %v4282_v28 }
 0xd4d   : > { %v4343_v26 = vpop.f32.mrb[38].mxu1  ;;  %v4342_v14 = vadd.f32 %v4341_v11, %v4282_v28 }
 0xd4e   : > { %v4344_v8 = vpop.f32.mrb[39].mxu1  ;;  %v4428_v37 = vmul.f32 %v4340_v57, %v8601_v10 }
 0xd4f   : > { %v4429_v63 = vmul.f32 %v4342_v14, %v8632_v15  ;;  %v4434_v15 = vld [vmem:[#allocation2] sm:$0xff] }
 0xd5b   : > { %v4380_v19 = vpop.f32.mrb[32].mxu0 }
 0xd5c   : > { %v4381_v18 = vadd.f32 %v4380_v19, %v4282_v28  ;;  %v4382_v41 = vpop.f32.mrb[33].mxu0 }
 0xd5d   : > { %v4383_v3 = vadd.f32 %v4382_v41, %v4282_v28  ;;  %v4384_v54 = vpop.f32.mrb[34].mxu0 }
 0xd5e   : > { %v4430_v59 = vmul.f32 %v4381_v18, %v6495_v55  ;;  %v4385_v23 = vpop.f32.mrb[35].mxu0 }
 0xd5f   : > { %v4431_v9 = vmul.f32 %v4383_v3, %v6570_v1  ;;  %v4421_v60 = vpop.f32.mrb[40].mxu1 }
 0xd60   : > { %v4423_v34 = vpop.f32.mrb[41].mxu1  ;;  %4445 = vrot.lane.b32.xlu1 %v4430_v59, %s5202_s17  ;;  %v4422_v33 = vadd.f32 %v4421_v60, %v4282_v28 }
 0xd61   : > { %4468 = vrot.lane.b32.xlu0 %v4431_v9, %s5202_s17  ;;  %v4425_v42 = vpop.f32.mrb[42].mxu1  ;;  %v4424_v36 = vadd.f32 %v4423_v34, %v4282_v28 }
 0xd62   : > { %v4426_v5 = vpop.f32.mrb[43].mxu1  ;;  %v4432_v55 = vmul.f32 %v4422_v33, %v8633_v31 }
 0xd63   : > { %v4433_v1 = vmul.f32 %v4424_v36, %v8634_v43 }
 0xd64   : > { %4441 = vrot.lane.b32.xlu1 %v4428_v37, %s5202_s17 }
 0xd65   : > { %4443 = vrot.lane.b32.xlu0 %v4429_v63, %s5202_s17 }
 0xd68   : > { %4470 = vrot.lane.b32.xlu1 %v4432_v55, %s5202_s17 }
 0xd69   : > { %4472 = vrot.lane.b32.xlu0 %v4433_v1, %s5202_s17 }
 0xdd2   : > { %v4446_v10 = vpop.permute.xlu1 %4445 }
 0xdd3   : > { %v4456_v30 = vadd.f32 %v4446_v10, %v4437_v58  ;;  %v4469_v51 = vpop.permute.xlu0 %4468 }
 0xdd4   : > { %v4480_v43 = vadd.f32 %v4469_v51, %v4461_v17 }
 0xdd5   : > { %4460 = vst.msk [vmem:[%s5291_s23 + $0x18] sm:$0xff] %vm2323_vm10, %v4456_v30 }
 0xdd6   : > { %v4442_v56 = vpop.permute.xlu1 %4441  ;;  %4679 = vst.msk [vmem:[%s5291_s23 + $0x20] sm:$0xff] %vm2334_vm13, %v4480_v43 }
 0xdd7   : > { %v4453_v31 = vadd.f32 %v4442_v56, %v4434_v15  ;;  %v4444_v29 = vpop.permute.xlu0 %4443 }
 0xdd8   : > { %v4447_v48 = vsel %vm2323_vm10, %v4442_v56, %v4444_v29  ;;  %v4448_v22 = vsel %vm2323_vm10, %v4444_v29, %v4446_v10 }
 0xdd9   : > { %4457 = vst.msk [vmem:[%s5291_s23] sm:$0xff] %vm2334_vm13, %v4453_v31  ;;  %v4454_v20 = vadd.f32 %v4447_v48, %v4435_v45  ;;  %v4455_v4 = vadd.f32 %v4448_v22, %v4436_v32 }
 0xdda   : > { %v4471_v2 = vpop.permute.xlu1 %4470 }
 0xddb   : > { %4458 = vst [vmem:[%s5291_s23 + $0x8] sm:$0xff] %v4454_v20  ;;  %4459 = vst [vmem:[%s5291_s23 + $0x10] sm:$0xff] %v4455_v4  ;;  %v4474_v35 = vsel %vm2323_vm10, %v4469_v51, %v4471_v2  ;;  %v4473_v21 = vpop.permute.xlu0 %4472 }
 0xddc   : > { %v4481_v53 = vadd.f32 %v4474_v35, %v4462_v24  ;;  %v4475_v27 = vsel %vm2323_vm10, %v4471_v2, %v4473_v21  ;;  %v4483_v13 = vadd.f32 %v4473_v21, %v4464_v49 }
 0xddd   : > { %v4482_v40 = vadd.f32 %v4475_v27, %v4463_v7 }
 0xdde   : > { %4680 = vst [vmem:[%s5291_s23 + $0x28] sm:$0xff] %v4481_v53  ;;  %4682 = vst.msk [vmem:[%s5291_s23 + $0x38] sm:$0xff] %vm2323_vm10, %v4483_v13 }
 0xddf   : > { %4681 = vst [vmem:[%s5291_s23 + $0x30] sm:$0xff] %v4482_v40 }
 0xde0 PF: > { %s18_s9 = sadd.s32 1, %s5188_s9   ;;  %s8660_s27 = smov %s5180_s29 }
 0xde1   : > { %p15_p7 = scmp.ge.s32.totalorder %s18_s9, 6   ;;  %s8661_s28 = smov %s5184_s30 }
 0xde2   : > { %s8662_s29 = smov %s8665_s10  ;;  %s8663_s30 = smov %s8669_s11 }
 0xde3   :  { %17 = sbr.rel (!%p15_p7) target bundleno = 3 (0x3), region = 102 }

</bundles_post_ra>
